<compile_context>
chip_gen: v7x
topology: tpu7x:2x2x1
jax: 0.10.0
libtpu: 0.0.40
codegen_flags: <defaults>
</compile_context>

<pallas_src>
import jax
import jax.numpy as jnp
from jax import lax
from jax.experimental import pallas as pl
from jax.experimental.pallas import tpu as pltpu


def _round_up(x, m):
    return (x + m - 1) // m * m


def lyrics_kernel(emb_ref, wih_ref, whh_ref, b_ref, fcw_ref, fcb_ref,
                  logits_ref, hn_ref, cn_ref, buf, pre):
    """Multi-layer LSTM + fused final Linear for one batch chunk.

    emb_ref : (T, BT, P)       wih_ref : (L, P, 4Hp)    whh_ref : (L, Hp, 4Hp)
    b_ref   : (L, 1, 4Hp)      fcw_ref : (Hp, Vp)       fcb_ref : (1, Vp)
    logits_ref : (T, BT, Vp)   hn_ref/cn_ref : (L, BT, Hp)
    buf : VMEM (T, BT, Hp)  current layer's input/output (time-major)
    pre : VMEM (T, BT, 4Hp) hoisted x @ W_ih + b for the current layer
    """
    T, BT, _ = emb_ref.shape
    L, Hp, G = whh_ref.shape                 # G == 4 * Hp

    # Embedding (gathered in wrapper) -> layer-0 input. Dropout = identity (eval).
    buf[...] = emb_ref[...]

    for l in range(L):                       # static unroll over layers
        # -- hoisted input projection: all timesteps in ONE MXU op (+ bias) --
        x_all = buf[...].reshape(T * BT, Hp)                   # (T*BT, Hp)
        pre_all = jnp.dot(x_all, wih_ref[l],
                          preferred_element_type=jnp.float32) + b_ref[l]
        pre[...] = pre_all.reshape(T, BT, G)

        whh = whh_ref[l]                                       # (Hp, 4Hp), loaded once

        def step(t, carry):
            h, c = carry
            gates = pre[t] + jnp.dot(h, whh,
                                     preferred_element_type=jnp.float32)
            i = jax.nn.sigmoid(gates[:, 0 * Hp:1 * Hp])        # vreg-aligned slices
            f = jax.nn.sigmoid(gates[:, 1 * Hp:2 * Hp])
            g = jnp.tanh(gates[:, 2 * Hp:3 * Hp])
            o = jax.nn.sigmoid(gates[:, 3 * Hp:4 * Hp])
            c_new = f * c + i * g
            h_new = o * jnp.tanh(c_new)
            buf[t] = h_new                   # next layer's input / FC input
            return (h_new, c_new)

        h_fin, c_fin = lax.fori_loop(
            0, T, step,
            (jnp.zeros((BT, Hp), jnp.float32),
             jnp.zeros((BT, Hp), jnp.float32)),
            unroll=True)                     # T is small & static
        hn_ref[l] = h_fin
        cn_ref[l] = c_fin

    # -- batched final Linear over all timesteps (lane-dense Vp) --
    h_all = buf[...].reshape(T * BT, Hp)
    logits = jnp.dot(h_all, fcw_ref[...],
                     preferred_element_type=jnp.float32) + fcb_ref[...]
    logits_ref[...] = logits.reshape(T, BT, logits_ref.shape[-1])


def _pad_params_for_kernel(params, Hp, P, Vp):
    """Zero-pad weights (per gate block) to lane/sublane-aligned shapes."""
    emb, wih, whh, b, fcw, fcb = params
    V, E = emb.shape
    L, H = whh.shape[0], whh.shape[1]
    emb_p = jnp.zeros((V, P), jnp.float32).at[:, :E].set(emb)
    wih_p = jnp.zeros((L, P, 4 * Hp), jnp.float32)
    whh_p = jnp.zeros((L, Hp, 4 * Hp), jnp.float32)
    b_p = jnp.zeros((L, 1, 4 * Hp), jnp.float32)
    for k in range(4):                       # gate order (i, f, g, o)
        wih_p = wih_p.at[:, :E, k * Hp:k * Hp + H].set(wih[:, :, k * H:(k + 1) * H])
        whh_p = whh_p.at[:, :H, k * Hp:k * Hp + H].set(whh[:, :, k * H:(k + 1) * H])
        b_p = b_p.at[:, :, k * Hp:k * Hp + H].set(b[:, :, k * H:(k + 1) * H])
    fcw_p = jnp.zeros((Hp, Vp), jnp.float32).at[:H, :V].set(fcw)
    fcb_p = jnp.zeros((1, Vp), jnp.float32).at[:, :V].set(fcb)
    return emb_p, wih_p, whh_p, b_p, fcw_p, fcb_p


def lyrics_generator_forward(x, params):
    """x: (B, T) int32 token ids.  Returns (prediction (B,T,V), (h_n, c_n))."""
    emb_table, wih, whh, b, fcw, fcb = params
    B, T = x.shape
    V, E = emb_table.shape
    L, H = whh.shape[0], whh.shape[1]
    assert E == H, "kernel stacks per-layer input weights; requires E == H"

    Hp = _round_up(H, 128)                   # lane-aligned hidden dim
    P = Hp                                   # padded embedding dim (E == H)
    Vp = _round_up(V, 128)                   # lane-dense logits
    BT = _round_up(min(B, 128), 8)           # batch tile (sublane multiple)
    Bp = _round_up(B, BT)
    n_chunks = Bp // BT

    emb_p, wih_p, whh_p, b_p, fcw_p, fcb_p = _pad_params_for_kernel(params, Hp, P, Vp)

    # Glue: pad token ids, gather embedding directly time-major (no HBM transpose
    # pass over the activations). Padded batch rows are discarded afterwards.
    x_pad = jnp.zeros((Bp, T), x.dtype).at[:B, :].set(x)
    emb_tm = emb_p[x_pad.T]                  # (T, Bp, P)

    grid_spec = pltpu.PrefetchScalarGridSpec(
        num_scalar_prefetch=0,
        grid=(n_chunks,),
        in_specs=[
            pl.BlockSpec((T, BT, P), lambda i: (0, i, 0)),          # embedded input
            pl.BlockSpec((L, P, 4 * Hp), lambda i: (0, 0, 0)),      # W_ih (stacked)
            pl.BlockSpec((L, Hp, 4 * Hp), lambda i: (0, 0, 0)),     # W_hh (stacked)
            pl.BlockSpec((L, 1, 4 * Hp), lambda i: (0, 0, 0)),      # b_ih + b_hh
            pl.BlockSpec((Hp, Vp), lambda i: (0, 0)),               # fc weight
            pl.BlockSpec((1, Vp), lambda i: (0, 0)),                # fc bias
        ],
        out_specs=(
            pl.BlockSpec((T, BT, Vp), lambda i: (0, i, 0)),         # logits (time-major)
            pl.BlockSpec((L, BT, Hp), lambda i: (0, i, 0)),         # h_n
            pl.BlockSpec((L, BT, Hp), lambda i: (0, i, 0)),         # c_n
        ),
        scratch_shapes=[
            pltpu.VMEM((T, BT, Hp), jnp.float32),                   # layer buffer
            pltpu.VMEM((T, BT, 4 * Hp), jnp.float32),               # hoisted x@W_ih
        ],
    )
    out_shapes = (
        jax.ShapeDtypeStruct((T, Bp, Vp), jnp.float32),
        jax.ShapeDtypeStruct((L, Bp, Hp), jnp.float32),
        jax.ShapeDtypeStruct((L, Bp, Hp), jnp.float32),
    )

    logits_tm, h_n, c_n = pl.pallas_call(
        lyrics_kernel,
        out_shape=out_shapes,
        grid_spec=grid_spec,
        compiler_params=pltpu.CompilerParams(
            dimension_semantics=("parallel",),       # batch chunks -> megacore on v7x
            vmem_limit_bytes=32 * 1024 * 1024,
        ),
    )(emb_tm, wih_p, whh_p, b_p, fcw_p, fcb_p)

    # Strip padding; return batch-first prediction and PyTorch-shaped (h_n, c_n).
    prediction = jnp.transpose(logits_tm[:, :B, :V], (1, 0, 2))     # (B, T, V)
    return prediction, (h_n[:, :B, :H], c_n[:, :B, :H])


def init_params(key, vocab_size, embedding_dim, hidden_dim, n_layers):
    """Deterministic synthetic parameters matching PyTorch module shapes
    (stored pre-transposed for x @ W, unpadded)."""
    ks = jax.random.split(key, 7)
    kv = 1.0 / jnp.sqrt(jnp.float32(hidden_dim))
    emb_table = jax.random.normal(ks[0], (vocab_size, embedding_dim), jnp.float32)
    wih = jax.random.uniform(ks[1], (n_layers, embedding_dim, 4 * hidden_dim),
                             jnp.float32, -kv, kv)
    whh = jax.random.uniform(ks[2], (n_layers, hidden_dim, 4 * hidden_dim),
                             jnp.float32, -kv, kv)
    b_ih = jax.random.uniform(ks[3], (n_layers, 4 * hidden_dim), jnp.float32, -kv, kv)
    b_hh = jax.random.uniform(ks[4], (n_layers, 4 * hidden_dim), jnp.float32, -kv, kv)
    b = (b_ih + b_hh)[:, None, :]                       # (L, 1, 4H)
    kf = 1.0 / jnp.sqrt(jnp.float32(hidden_dim))
    fcw = jax.random.uniform(ks[5], (hidden_dim, vocab_size), jnp.float32, -kf, kf)
    fcb = jax.random.uniform(ks[6], (1, vocab_size), jnp.float32, -kf, kf)
    return (emb_table, wih, whh, b, fcw, fcb)


def reference_forward(x, params):
    """Pure-JAX reference (eval-mode PyTorch semantics), unpadded."""
    emb_table, wih, whh, b, fcw, fcb = params
    inp = emb_table[x]                                  # (B, T, E)
    B, T, _ = inp.shape
    L, H = whh.shape[0], whh.shape[1]
    hs, cs = [], []
    for l in range(L):
        h = jnp.zeros((B, H), jnp.float32)
        c = jnp.zeros((B, H), jnp.float32)
        outs = []
        for t in range(T):
            g = inp[:, t, :] @ wih[l] + h @ whh[l] + b[l]
            i = jax.nn.sigmoid(g[:, :H])
            f = jax.nn.sigmoid(g[:, H:2 * H])
            gg = jnp.tanh(g[:, 2 * H:3 * H])
            o = jax.nn.sigmoid(g[:, 3 * H:])
            c = f * c + i * gg
            h = o * jnp.tanh(c)
            outs.append(h)
        inp = jnp.stack(outs, axis=1)
        hs.append(h)
        cs.append(c)
    logits = inp @ fcw + fcb
    return logits, (jnp.stack(hs), jnp.stack(cs))


if __name__ == "__main__":
    vocab_size, embedding_dim, hidden_dim, n_layers = 64, 32, 32, 2
    batch, seq = 2, 8

    key = jax.random.PRNGKey(0)
    k_par, k_tok = jax.random.split(key)
    params = init_params(k_par, vocab_size, embedding_dim, hidden_dim, n_layers)
    x = jax.random.randint(k_tok, (batch, seq), 0, vocab_size, dtype=jnp.int32)

    pred, (h_n, c_n) = lyrics_generator_forward(x, params)
    jax.block_until_ready((pred, h_n, c_n))

    pred_ref, (h_ref, c_ref) = reference_forward(x, params)
    assert pred.shape == (batch, seq, vocab_size)
    assert h_n.shape == (n_layers, batch, hidden_dim)
    assert c_n.shape == (n_layers, batch, hidden_dim)
    assert jnp.max(jnp.abs(pred - pred_ref)) < 1e-3
    assert jnp.max(jnp.abs(h_n - h_ref)) < 1e-3
    assert jnp.max(jnp.abs(c_n - c_ref)) < 1e-3

    print("KERNEL_OK")
</pallas_src>

<mosaic_0001>
module attributes {stable_mosaic.version = 11 : i64} {
  func.func @lyrics_kernel(%arg0: i32, %arg1: memref<8x8x128xf32, #tpu.memory_space<vmem>>, %arg2: memref<2x128x512xf32, #tpu.memory_space<vmem>>, %arg3: memref<2x128x512xf32, #tpu.memory_space<vmem>>, %arg4: memref<2x1x512xf32, #tpu.memory_space<vmem>>, %arg5: memref<128x128xf32, #tpu.memory_space<vmem>>, %arg6: memref<1x128xf32, #tpu.memory_space<vmem>>, %arg7: memref<8x8x128xf32, #tpu.memory_space<vmem>>, %arg8: memref<2x8x128xf32, #tpu.memory_space<vmem>>, %arg9: memref<2x8x128xf32, #tpu.memory_space<vmem>>, %arg10: memref<8x8x128xf32, #tpu.memory_space<vmem>>, %arg11: memref<8x8x512xf32, #tpu.memory_space<vmem>>) attributes {dimension_semantics = [#tpu.dimension_semantics<parallel>], iteration_bounds = array<i64: 1>, scalar_prefetch = 0 : i64, scratch_operands = 2 : i64, tpu.core_type = #tpu.core_type<tc>, window_params = [{transform_indices = @transform_0, window_bounds = array<i64: 8, 8, 128>}, {pipeline_mode = #tpu.pipeline_mode<synchronous>, transform_indices = @transform_1, window_bounds = array<i64: 2, 128, 512>}, {pipeline_mode = #tpu.pipeline_mode<synchronous>, transform_indices = @transform_2, window_bounds = array<i64: 2, 128, 512>}, {pipeline_mode = #tpu.pipeline_mode<synchronous>, transform_indices = @transform_3, window_bounds = array<i64: 2, 1, 512>}, {pipeline_mode = #tpu.pipeline_mode<synchronous>, transform_indices = @transform_4, window_bounds = array<i64: 128, 128>}, {pipeline_mode = #tpu.pipeline_mode<synchronous>, transform_indices = @transform_5, window_bounds = array<i64: 1, 128>}, {transform_indices = @transform_6, window_bounds = array<i64: 8, 8, 128>}, {transform_indices = @transform_7, window_bounds = array<i64: 2, 8, 128>}, {transform_indices = @transform_8, window_bounds = array<i64: 2, 8, 128>}]} {
    %c0 = arith.constant 0 : index
    %c0_0 = arith.constant 0 : index
    %c0_1 = arith.constant 0 : index
    %0 = vector.load %arg1[%c0, %c0_0, %c0_1] : memref<8x8x128xf32, #tpu.memory_space<vmem>>, vector<8x8x128xf32>
    %c0_2 = arith.constant 0 : index
    %c0_3 = arith.constant 0 : index
    %c0_4 = arith.constant 0 : index
    %1 = vector.load %arg10[%c0_2, %c0_3, %c0_4] : memref<8x8x128xf32, #tpu.memory_space<vmem>>, vector<8x8x128xf32>
    tpu.vector_store %arg10[%c0_2, %c0_3, %c0_4], %0 {strides = array<i32>} : memref<8x8x128xf32, #tpu.memory_space<vmem>>, vector<8x8x128xf32>,
    %c0_5 = arith.constant 0 : index
    %c0_6 = arith.constant 0 : index
    %c0_7 = arith.constant 0 : index
    %2 = vector.load %arg10[%c0_5, %c0_6, %c0_7] : memref<8x8x128xf32, #tpu.memory_space<vmem>>, vector<8x8x128xf32>
    %3 = vector.shape_cast %2 : vector<8x8x128xf32> to vector<64x128xf32>
    %c0_8 = arith.constant 0 : index
    %c0_9 = arith.constant 0 : index
    %c0_10 = arith.constant 0 : index
    %4 = vector.load %arg2[%c0_8, %c0_9, %c0_10] : memref<2x128x512xf32, #tpu.memory_space<vmem>>, vector<1x128x512xf32>
    %5 = vector.shape_cast %4 : vector<1x128x512xf32> to vector<128x512xf32>
    %cst = arith.constant dense<0.000000e+00> : vector<64x512xf32>
    %6 = tpu.matmul %3, %5, %cst {dimension_numbers = #tpu.dot_dimension_numbers<[1], [0], [0], [1], [0, 0, 1, 1], [], []>} : vector<64x128xf32>, vector<128x512xf32>, vector<64x512xf32> -> vector<64x512xf32>
    %c0_11 = arith.constant 0 : index
    %c0_12 = arith.constant 0 : index
    %c0_13 = arith.constant 0 : index
    %7 = vector.load %arg4[%c0_11, %c0_12, %c0_13] : memref<2x1x512xf32, #tpu.memory_space<vmem>>, vector<1x1x512xf32>
    %8 = vector.shape_cast %7 : vector<1x1x512xf32> to vector<1x512xf32>
    %9 = vector.broadcast %8 : vector<1x512xf32> to vector<64x512xf32>
    %10 = arith.addf %6, %9 : vector<64x512xf32>
    %11 = vector.shape_cast %10 : vector<64x512xf32> to vector<8x8x512xf32>
    %c0_14 = arith.constant 0 : index
    %c0_15 = arith.constant 0 : index
    %c0_16 = arith.constant 0 : index
    %12 = vector.load %arg11[%c0_14, %c0_15, %c0_16] : memref<8x8x512xf32, #tpu.memory_space<vmem>>, vector<8x8x512xf32>
    tpu.vector_store %arg11[%c0_14, %c0_15, %c0_16], %11 {strides = array<i32>} : memref<8x8x512xf32, #tpu.memory_space<vmem>>, vector<8x8x512xf32>,
    %c0_17 = arith.constant 0 : index
    %c0_18 = arith.constant 0 : index
    %c0_19 = arith.constant 0 : index
    %13 = vector.load %arg3[%c0_17, %c0_18, %c0_19] : memref<2x128x512xf32, #tpu.memory_space<vmem>>, vector<1x128x512xf32>
    %14 = vector.shape_cast %13 : vector<1x128x512xf32> to vector<128x512xf32>
    %cst_20 = arith.constant 0.000000e+00 : f32
    %15 = vector.broadcast %cst_20 : f32 to vector<8x128xf32>
    %cst_21 = arith.constant 0.000000e+00 : f32
    %16 = vector.broadcast %cst_21 : f32 to vector<8x128xf32>
    %c0_i32 = arith.constant 0 : i32
    %17 = arith.index_cast %c0_i32 : i32 to index
    %c0_22 = arith.constant 0 : index
    %c0_23 = arith.constant 0 : index
    %18 = vector.load %arg11[%17, %c0_22, %c0_23] : memref<8x8x512xf32, #tpu.memory_space<vmem>>, vector<1x8x512xf32>
    %19 = vector.shape_cast %18 : vector<1x8x512xf32> to vector<8x512xf32>
    %cst_24 = arith.constant dense<0.000000e+00> : vector<8x512xf32>
    %20 = tpu.matmul %15, %14, %cst_24 {dimension_numbers = #tpu.dot_dimension_numbers<[1], [0], [0], [1], [0, 0, 1, 1], [], []>} : vector<8x128xf32>, vector<128x512xf32>, vector<8x512xf32> -> vector<8x512xf32>
    %21 = arith.addf %19, %20 : vector<8x512xf32>
    %22 = vector.extract_strided_slice %21 {offsets = [0, 0], sizes = [8, 128], strides = [1, 1]} : vector<8x512xf32> to vector<8x128xf32>
    %23 = arith.negf %22 : vector<8x128xf32>
    %24 = math.exp %23 : vector<8x128xf32>
    %cst_25 = arith.constant 1.000000e+00 : f32
    %25 = vector.broadcast %cst_25 : f32 to vector<8x128xf32>
    %26 = arith.addf %25, %24 : vector<8x128xf32>
    %27 = arith.divf %25, %26 : vector<8x128xf32>
    %28 = vector.extract_strided_slice %21 {offsets = [0, 128], sizes = [8, 128], strides = [1, 1]} : vector<8x512xf32> to vector<8x128xf32>
    %29 = arith.negf %28 : vector<8x128xf32>
    %30 = math.exp %29 : vector<8x128xf32>
    %cst_26 = arith.constant 1.000000e+00 : f32
    %31 = vector.broadcast %cst_26 : f32 to vector<8x128xf32>
    %32 = arith.addf %31, %30 : vector<8x128xf32>
    %33 = arith.divf %31, %32 : vector<8x128xf32>
    %34 = vector.extract_strided_slice %21 {offsets = [0, 256], sizes = [8, 128], strides = [1, 1]} : vector<8x512xf32> to vector<8x128xf32>
    %35 = math.tanh %34 : vector<8x128xf32>
    %36 = vector.extract_strided_slice %21 {offsets = [0, 384], sizes = [8, 128], strides = [1, 1]} : vector<8x512xf32> to vector<8x128xf32>
    %37 = arith.negf %36 : vector<8x128xf32>
    %38 = math.exp %37 : vector<8x128xf32>
    %cst_27 = arith.constant 1.000000e+00 : f32
    %39 = vector.broadcast %cst_27 : f32 to vector<8x128xf32>
    %40 = arith.addf %39, %38 : vector<8x128xf32>
    %41 = arith.divf %39, %40 : vector<8x128xf32>
    %42 = arith.mulf %33, %16 : vector<8x128xf32>
    %43 = arith.mulf %27, %35 : vector<8x128xf32>
    %44 = arith.addf %42, %43 : vector<8x128xf32>
    %45 = math.tanh %44 : vector<8x128xf32>
    %46 = arith.mulf %41, %45 : vector<8x128xf32>
    %47 = arith.index_cast %c0_i32 : i32 to index
    %c0_28 = arith.constant 0 : index
    %c0_29 = arith.constant 0 : index
    %48 = vector.load %arg10[%47, %c0_28, %c0_29] : memref<8x8x128xf32, #tpu.memory_space<vmem>>, vector<1x8x128xf32>
    %49 = vector.shape_cast %48 : vector<1x8x128xf32> to vector<8x128xf32>
    %50 = vector.shape_cast %46 : vector<8x128xf32> to vector<1x8x128xf32>
    tpu.vector_store %arg10[%47, %c0_28, %c0_29], %50 {strides = array<i32>} : memref<8x8x128xf32, #tpu.memory_space<vmem>>, vector<1x8x128xf32>,
    %c1_i32 = arith.constant 1 : i32
    %51 = arith.index_cast %c1_i32 : i32 to index
    %c0_30 = arith.constant 0 : index
    %c0_31 = arith.constant 0 : index
    %52 = vector.load %arg11[%51, %c0_30, %c0_31] : memref<8x8x512xf32, #tpu.memory_space<vmem>>, vector<1x8x512xf32>
    %53 = vector.shape_cast %52 : vector<1x8x512xf32> to vector<8x512xf32>
    %cst_32 = arith.constant dense<0.000000e+00> : vector<8x512xf32>
    %54 = tpu.matmul %46, %14, %cst_32 {dimension_numbers = #tpu.dot_dimension_numbers<[1], [0], [0], [1], [0, 0, 1, 1], [], []>} : vector<8x128xf32>, vector<128x512xf32>, vector<8x512xf32> -> vector<8x512xf32>
    %55 = arith.addf %53, %54 : vector<8x512xf32>
    %56 = vector.extract_strided_slice %55 {offsets = [0, 0], sizes = [8, 128], strides = [1, 1]} : vector<8x512xf32> to vector<8x128xf32>
    %57 = arith.negf %56 : vector<8x128xf32>
    %58 = math.exp %57 : vector<8x128xf32>
    %cst_33 = arith.constant 1.000000e+00 : f32
    %59 = vector.broadcast %cst_33 : f32 to vector<8x128xf32>
    %60 = arith.addf %59, %58 : vector<8x128xf32>
    %61 = arith.divf %59, %60 : vector<8x128xf32>
    %62 = vector.extract_strided_slice %55 {offsets = [0, 128], sizes = [8, 128], strides = [1, 1]} : vector<8x512xf32> to vector<8x128xf32>
    %63 = arith.negf %62 : vector<8x128xf32>
    %64 = math.exp %63 : vector<8x128xf32>
    %cst_34 = arith.constant 1.000000e+00 : f32
    %65 = vector.broadcast %cst_34 : f32 to vector<8x128xf32>
    %66 = arith.addf %65, %64 : vector<8x128xf32>
    %67 = arith.divf %65, %66 : vector<8x128xf32>
    %68 = vector.extract_strided_slice %55 {offsets = [0, 256], sizes = [8, 128], strides = [1, 1]} : vector<8x512xf32> to vector<8x128xf32>
    %69 = math.tanh %68 : vector<8x128xf32>
    %70 = vector.extract_strided_slice %55 {offsets = [0, 384], sizes = [8, 128], strides = [1, 1]} : vector<8x512xf32> to vector<8x128xf32>
    %71 = arith.negf %70 : vector<8x128xf32>
    %72 = math.exp %71 : vector<8x128xf32>
    %cst_35 = arith.constant 1.000000e+00 : f32
    %73 = vector.broadcast %cst_35 : f32 to vector<8x128xf32>
    %74 = arith.addf %73, %72 : vector<8x128xf32>
    %75 = arith.divf %73, %74 : vector<8x128xf32>
    %76 = arith.mulf %67, %44 : vector<8x128xf32>
    %77 = arith.mulf %61, %69 : vector<8x128xf32>
    %78 = arith.addf %76, %77 : vector<8x128xf32>
    %79 = math.tanh %78 : vector<8x128xf32>
    %80 = arith.mulf %75, %79 : vector<8x128xf32>
    %81 = arith.index_cast %c1_i32 : i32 to index
    %c0_36 = arith.constant 0 : index
    %c0_37 = arith.constant 0 : index
    %82 = vector.load %arg10[%81, %c0_36, %c0_37] : memref<8x8x128xf32, #tpu.memory_space<vmem>>, vector<1x8x128xf32>
    %83 = vector.shape_cast %82 : vector<1x8x128xf32> to vector<8x128xf32>
    %84 = vector.shape_cast %80 : vector<8x128xf32> to vector<1x8x128xf32>
    tpu.vector_store %arg10[%81, %c0_36, %c0_37], %84 {strides = array<i32>} : memref<8x8x128xf32, #tpu.memory_space<vmem>>, vector<1x8x128xf32>,
    %c2_i32 = arith.constant 2 : i32
    %85 = arith.index_cast %c2_i32 : i32 to index
    %c0_38 = arith.constant 0 : index
    %c0_39 = arith.constant 0 : index
    %86 = vector.load %arg11[%85, %c0_38, %c0_39] : memref<8x8x512xf32, #tpu.memory_space<vmem>>, vector<1x8x512xf32>
    %87 = vector.shape_cast %86 : vector<1x8x512xf32> to vector<8x512xf32>
    %cst_40 = arith.constant dense<0.000000e+00> : vector<8x512xf32>
    %88 = tpu.matmul %80, %14, %cst_40 {dimension_numbers = #tpu.dot_dimension_numbers<[1], [0], [0], [1], [0, 0, 1, 1], [], []>} : vector<8x128xf32>, vector<128x512xf32>, vector<8x512xf32> -> vector<8x512xf32>
    %89 = arith.addf %87, %88 : vector<8x512xf32>
    %90 = vector.extract_strided_slice %89 {offsets = [0, 0], sizes = [8, 128], strides = [1, 1]} : vector<8x512xf32> to vector<8x128xf32>
    %91 = arith.negf %90 : vector<8x128xf32>
    %92 = math.exp %91 : vector<8x128xf32>
    %cst_41 = arith.constant 1.000000e+00 : f32
    %93 = vector.broadcast %cst_41 : f32 to vector<8x128xf32>
    %94 = arith.addf %93, %92 : vector<8x128xf32>
    %95 = arith.divf %93, %94 : vector<8x128xf32>
    %96 = vector.extract_strided_slice %89 {offsets = [0, 128], sizes = [8, 128], strides = [1, 1]} : vector<8x512xf32> to vector<8x128xf32>
    %97 = arith.negf %96 : vector<8x128xf32>
    %98 = math.exp %97 : vector<8x128xf32>
    %cst_42 = arith.constant 1.000000e+00 : f32
    %99 = vector.broadcast %cst_42 : f32 to vector<8x128xf32>
    %100 = arith.addf %99, %98 : vector<8x128xf32>
    %101 = arith.divf %99, %100 : vector<8x128xf32>
    %102 = vector.extract_strided_slice %89 {offsets = [0, 256], sizes = [8, 128], strides = [1, 1]} : vector<8x512xf32> to vector<8x128xf32>
    %103 = math.tanh %102 : vector<8x128xf32>
    %104 = vector.extract_strided_slice %89 {offsets = [0, 384], sizes = [8, 128], strides = [1, 1]} : vector<8x512xf32> to vector<8x128xf32>
    %105 = arith.negf %104 : vector<8x128xf32>
    %106 = math.exp %105 : vector<8x128xf32>
    %cst_43 = arith.constant 1.000000e+00 : f32
    %107 = vector.broadcast %cst_43 : f32 to vector<8x128xf32>
    %108 = arith.addf %107, %106 : vector<8x128xf32>
    %109 = arith.divf %107, %108 : vector<8x128xf32>
    %110 = arith.mulf %101, %78 : vector<8x128xf32>
    %111 = arith.mulf %95, %103 : vector<8x128xf32>
    %112 = arith.addf %110, %111 : vector<8x128xf32>
    %113 = math.tanh %112 : vector<8x128xf32>
    %114 = arith.mulf %109, %113 : vector<8x128xf32>
    %115 = arith.index_cast %c2_i32 : i32 to index
    %c0_44 = arith.constant 0 : index
    %c0_45 = arith.constant 0 : index
    %116 = vector.load %arg10[%115, %c0_44, %c0_45] : memref<8x8x128xf32, #tpu.memory_space<vmem>>, vector<1x8x128xf32>
    %117 = vector.shape_cast %116 : vector<1x8x128xf32> to vector<8x128xf32>
    %118 = vector.shape_cast %114 : vector<8x128xf32> to vector<1x8x128xf32>
    tpu.vector_store %arg10[%115, %c0_44, %c0_45], %118 {strides = array<i32>} : memref<8x8x128xf32, #tpu.memory_space<vmem>>, vector<1x8x128xf32>,
    %c3_i32 = arith.constant 3 : i32
    %119 = arith.index_cast %c3_i32 : i32 to index
    %c0_46 = arith.constant 0 : index
    %c0_47 = arith.constant 0 : index
    %120 = vector.load %arg11[%119, %c0_46, %c0_47] : memref<8x8x512xf32, #tpu.memory_space<vmem>>, vector<1x8x512xf32>
    %121 = vector.shape_cast %120 : vector<1x8x512xf32> to vector<8x512xf32>
    %cst_48 = arith.constant dense<0.000000e+00> : vector<8x512xf32>
    %122 = tpu.matmul %114, %14, %cst_48 {dimension_numbers = #tpu.dot_dimension_numbers<[1], [0], [0], [1], [0, 0, 1, 1], [], []>} : vector<8x128xf32>, vector<128x512xf32>, vector<8x512xf32> -> vector<8x512xf32>
    %123 = arith.addf %121, %122 : vector<8x512xf32>
    %124 = vector.extract_strided_slice %123 {offsets = [0, 0], sizes = [8, 128], strides = [1, 1]} : vector<8x512xf32> to vector<8x128xf32>
    %125 = arith.negf %124 : vector<8x128xf32>
    %126 = math.exp %125 : vector<8x128xf32>
    %cst_49 = arith.constant 1.000000e+00 : f32
    %127 = vector.broadcast %cst_49 : f32 to vector<8x128xf32>
    %128 = arith.addf %127, %126 : vector<8x128xf32>
    %129 = arith.divf %127, %128 : vector<8x128xf32>
    %130 = vector.extract_strided_slice %123 {offsets = [0, 128], sizes = [8, 128], strides = [1, 1]} : vector<8x512xf32> to vector<8x128xf32>
    %131 = arith.negf %130 : vector<8x128xf32>
    %132 = math.exp %131 : vector<8x128xf32>
    %cst_50 = arith.constant 1.000000e+00 : f32
    %133 = vector.broadcast %cst_50 : f32 to vector<8x128xf32>
    %134 = arith.addf %133, %132 : vector<8x128xf32>
    %135 = arith.divf %133, %134 : vector<8x128xf32>
    %136 = vector.extract_strided_slice %123 {offsets = [0, 256], sizes = [8, 128], strides = [1, 1]} : vector<8x512xf32> to vector<8x128xf32>
    %137 = math.tanh %136 : vector<8x128xf32>
    %138 = vector.extract_strided_slice %123 {offsets = [0, 384], sizes = [8, 128], strides = [1, 1]} : vector<8x512xf32> to vector<8x128xf32>
    %139 = arith.negf %138 : vector<8x128xf32>
    %140 = math.exp %139 : vector<8x128xf32>
    %cst_51 = arith.constant 1.000000e+00 : f32
    %141 = vector.broadcast %cst_51 : f32 to vector<8x128xf32>
    %142 = arith.addf %141, %140 : vector<8x128xf32>
    %143 = arith.divf %141, %142 : vector<8x128xf32>
    %144 = arith.mulf %135, %112 : vector<8x128xf32>
    %145 = arith.mulf %129, %137 : vector<8x128xf32>
    %146 = arith.addf %144, %145 : vector<8x128xf32>
    %147 = math.tanh %146 : vector<8x128xf32>
    %148 = arith.mulf %143, %147 : vector<8x128xf32>
    %149 = arith.index_cast %c3_i32 : i32 to index
    %c0_52 = arith.constant 0 : index
    %c0_53 = arith.constant 0 : index
    %150 = vector.load %arg10[%149, %c0_52, %c0_53] : memref<8x8x128xf32, #tpu.memory_space<vmem>>, vector<1x8x128xf32>
    %151 = vector.shape_cast %150 : vector<1x8x128xf32> to vector<8x128xf32>
    %152 = vector.shape_cast %148 : vector<8x128xf32> to vector<1x8x128xf32>
    tpu.vector_store %arg10[%149, %c0_52, %c0_53], %152 {strides = array<i32>} : memref<8x8x128xf32, #tpu.memory_space<vmem>>, vector<1x8x128xf32>,
    %c4_i32 = arith.constant 4 : i32
    %153 = arith.index_cast %c4_i32 : i32 to index
    %c0_54 = arith.constant 0 : index
    %c0_55 = arith.constant 0 : index
    %154 = vector.load %arg11[%153, %c0_54, %c0_55] : memref<8x8x512xf32, #tpu.memory_space<vmem>>, vector<1x8x512xf32>
    %155 = vector.shape_cast %154 : vector<1x8x512xf32> to vector<8x512xf32>
    %cst_56 = arith.constant dense<0.000000e+00> : vector<8x512xf32>
    %156 = tpu.matmul %148, %14, %cst_56 {dimension_numbers = #tpu.dot_dimension_numbers<[1], [0], [0], [1], [0, 0, 1, 1], [], []>} : vector<8x128xf32>, vector<128x512xf32>, vector<8x512xf32> -> vector<8x512xf32>
    %157 = arith.addf %155, %156 : vector<8x512xf32>
    %158 = vector.extract_strided_slice %157 {offsets = [0, 0], sizes = [8, 128], strides = [1, 1]} : vector<8x512xf32> to vector<8x128xf32>
    %159 = arith.negf %158 : vector<8x128xf32>
    %160 = math.exp %159 : vector<8x128xf32>
    %cst_57 = arith.constant 1.000000e+00 : f32
    %161 = vector.broadcast %cst_57 : f32 to vector<8x128xf32>
    %162 = arith.addf %161, %160 : vector<8x128xf32>
    %163 = arith.divf %161, %162 : vector<8x128xf32>
    %164 = vector.extract_strided_slice %157 {offsets = [0, 128], sizes = [8, 128], strides = [1, 1]} : vector<8x512xf32> to vector<8x128xf32>
    %165 = arith.negf %164 : vector<8x128xf32>
    %166 = math.exp %165 : vector<8x128xf32>
    %cst_58 = arith.constant 1.000000e+00 : f32
    %167 = vector.broadcast %cst_58 : f32 to vector<8x128xf32>
    %168 = arith.addf %167, %166 : vector<8x128xf32>
    %169 = arith.divf %167, %168 : vector<8x128xf32>
    %170 = vector.extract_strided_slice %157 {offsets = [0, 256], sizes = [8, 128], strides = [1, 1]} : vector<8x512xf32> to vector<8x128xf32>
    %171 = math.tanh %170 : vector<8x128xf32>
    %172 = vector.extract_strided_slice %157 {offsets = [0, 384], sizes = [8, 128], strides = [1, 1]} : vector<8x512xf32> to vector<8x128xf32>
    %173 = arith.negf %172 : vector<8x128xf32>
    %174 = math.exp %173 : vector<8x128xf32>
    %cst_59 = arith.constant 1.000000e+00 : f32
    %175 = vector.broadcast %cst_59 : f32 to vector<8x128xf32>
    %176 = arith.addf %175, %174 : vector<8x128xf32>
    %177 = arith.divf %175, %176 : vector<8x128xf32>
    %178 = arith.mulf %169, %146 : vector<8x128xf32>
    %179 = arith.mulf %163, %171 : vector<8x128xf32>
    %180 = arith.addf %178, %179 : vector<8x128xf32>
    %181 = math.tanh %180 : vector<8x128xf32>
    %182 = arith.mulf %177, %181 : vector<8x128xf32>
    %183 = arith.index_cast %c4_i32 : i32 to index
    %c0_60 = arith.constant 0 : index
    %c0_61 = arith.constant 0 : index
    %184 = vector.load %arg10[%183, %c0_60, %c0_61] : memref<8x8x128xf32, #tpu.memory_space<vmem>>, vector<1x8x128xf32>
    %185 = vector.shape_cast %184 : vector<1x8x128xf32> to vector<8x128xf32>
    %186 = vector.shape_cast %182 : vector<8x128xf32> to vector<1x8x128xf32>
    tpu.vector_store %arg10[%183, %c0_60, %c0_61], %186 {strides = array<i32>} : memref<8x8x128xf32, #tpu.memory_space<vmem>>, vector<1x8x128xf32>,
    %c5_i32 = arith.constant 5 : i32
    %187 = arith.index_cast %c5_i32 : i32 to index
    %c0_62 = arith.constant 0 : index
    %c0_63 = arith.constant 0 : index
    %188 = vector.load %arg11[%187, %c0_62, %c0_63] : memref<8x8x512xf32, #tpu.memory_space<vmem>>, vector<1x8x512xf32>
    %189 = vector.shape_cast %188 : vector<1x8x512xf32> to vector<8x512xf32>
    %cst_64 = arith.constant dense<0.000000e+00> : vector<8x512xf32>
    %190 = tpu.matmul %182, %14, %cst_64 {dimension_numbers = #tpu.dot_dimension_numbers<[1], [0], [0], [1], [0, 0, 1, 1], [], []>} : vector<8x128xf32>, vector<128x512xf32>, vector<8x512xf32> -> vector<8x512xf32>
    %191 = arith.addf %189, %190 : vector<8x512xf32>
    %192 = vector.extract_strided_slice %191 {offsets = [0, 0], sizes = [8, 128], strides = [1, 1]} : vector<8x512xf32> to vector<8x128xf32>
    %193 = arith.negf %192 : vector<8x128xf32>
    %194 = math.exp %193 : vector<8x128xf32>
    %cst_65 = arith.constant 1.000000e+00 : f32
    %195 = vector.broadcast %cst_65 : f32 to vector<8x128xf32>
    %196 = arith.addf %195, %194 : vector<8x128xf32>
    %197 = arith.divf %195, %196 : vector<8x128xf32>
    %198 = vector.extract_strided_slice %191 {offsets = [0, 128], sizes = [8, 128], strides = [1, 1]} : vector<8x512xf32> to vector<8x128xf32>
    %199 = arith.negf %198 : vector<8x128xf32>
    %200 = math.exp %199 : vector<8x128xf32>
    %cst_66 = arith.constant 1.000000e+00 : f32
    %201 = vector.broadcast %cst_66 : f32 to vector<8x128xf32>
    %202 = arith.addf %201, %200 : vector<8x128xf32>
    %203 = arith.divf %201, %202 : vector<8x128xf32>
    %204 = vector.extract_strided_slice %191 {offsets = [0, 256], sizes = [8, 128], strides = [1, 1]} : vector<8x512xf32> to vector<8x128xf32>
    %205 = math.tanh %204 : vector<8x128xf32>
    %206 = vector.extract_strided_slice %191 {offsets = [0, 384], sizes = [8, 128], strides = [1, 1]} : vector<8x512xf32> to vector<8x128xf32>
    %207 = arith.negf %206 : vector<8x128xf32>
    %208 = math.exp %207 : vector<8x128xf32>
    %cst_67 = arith.constant 1.000000e+00 : f32
    %209 = vector.broadcast %cst_67 : f32 to vector<8x128xf32>
    %210 = arith.addf %209, %208 : vector<8x128xf32>
    %211 = arith.divf %209, %210 : vector<8x128xf32>
    %212 = arith.mulf %203, %180 : vector<8x128xf32>
    %213 = arith.mulf %197, %205 : vector<8x128xf32>
    %214 = arith.addf %212, %213 : vector<8x128xf32>
    %215 = math.tanh %214 : vector<8x128xf32>
    %216 = arith.mulf %211, %215 : vector<8x128xf32>
    %217 = arith.index_cast %c5_i32 : i32 to index
    %c0_68 = arith.constant 0 : index
    %c0_69 = arith.constant 0 : index
    %218 = vector.load %arg10[%217, %c0_68, %c0_69] : memref<8x8x128xf32, #tpu.memory_space<vmem>>, vector<1x8x128xf32>
    %219 = vector.shape_cast %218 : vector<1x8x128xf32> to vector<8x128xf32>
    %220 = vector.shape_cast %216 : vector<8x128xf32> to vector<1x8x128xf32>
    tpu.vector_store %arg10[%217, %c0_68, %c0_69], %220 {strides = array<i32>} : memref<8x8x128xf32, #tpu.memory_space<vmem>>, vector<1x8x128xf32>,
    %c6_i32 = arith.constant 6 : i32
    %221 = arith.index_cast %c6_i32 : i32 to index
    %c0_70 = arith.constant 0 : index
    %c0_71 = arith.constant 0 : index
    %222 = vector.load %arg11[%221, %c0_70, %c0_71] : memref<8x8x512xf32, #tpu.memory_space<vmem>>, vector<1x8x512xf32>
    %223 = vector.shape_cast %222 : vector<1x8x512xf32> to vector<8x512xf32>
    %cst_72 = arith.constant dense<0.000000e+00> : vector<8x512xf32>
    %224 = tpu.matmul %216, %14, %cst_72 {dimension_numbers = #tpu.dot_dimension_numbers<[1], [0], [0], [1], [0, 0, 1, 1], [], []>} : vector<8x128xf32>, vector<128x512xf32>, vector<8x512xf32> -> vector<8x512xf32>
    %225 = arith.addf %223, %224 : vector<8x512xf32>
    %226 = vector.extract_strided_slice %225 {offsets = [0, 0], sizes = [8, 128], strides = [1, 1]} : vector<8x512xf32> to vector<8x128xf32>
    %227 = arith.negf %226 : vector<8x128xf32>
    %228 = math.exp %227 : vector<8x128xf32>
    %cst_73 = arith.constant 1.000000e+00 : f32
    %229 = vector.broadcast %cst_73 : f32 to vector<8x128xf32>
    %230 = arith.addf %229, %228 : vector<8x128xf32>
    %231 = arith.divf %229, %230 : vector<8x128xf32>
    %232 = vector.extract_strided_slice %225 {offsets = [0, 128], sizes = [8, 128], strides = [1, 1]} : vector<8x512xf32> to vector<8x128xf32>
    %233 = arith.negf %232 : vector<8x128xf32>
    %234 = math.exp %233 : vector<8x128xf32>
    %cst_74 = arith.constant 1.000000e+00 : f32
    %235 = vector.broadcast %cst_74 : f32 to vector<8x128xf32>
    %236 = arith.addf %235, %234 : vector<8x128xf32>
    %237 = arith.divf %235, %236 : vector<8x128xf32>
    %238 = vector.extract_strided_slice %225 {offsets = [0, 256], sizes = [8, 128], strides = [1, 1]} : vector<8x512xf32> to vector<8x128xf32>
    %239 = math.tanh %238 : vector<8x128xf32>
    %240 = vector.extract_strided_slice %225 {offsets = [0, 384], sizes = [8, 128], strides = [1, 1]} : vector<8x512xf32> to vector<8x128xf32>
    %241 = arith.negf %240 : vector<8x128xf32>
    %242 = math.exp %241 : vector<8x128xf32>
    %cst_75 = arith.constant 1.000000e+00 : f32
    %243 = vector.broadcast %cst_75 : f32 to vector<8x128xf32>
    %244 = arith.addf %243, %242 : vector<8x128xf32>
    %245 = arith.divf %243, %244 : vector<8x128xf32>
    %246 = arith.mulf %237, %214 : vector<8x128xf32>
    %247 = arith.mulf %231, %239 : vector<8x128xf32>
    %248 = arith.addf %246, %247 : vector<8x128xf32>
    %249 = math.tanh %248 : vector<8x128xf32>
    %250 = arith.mulf %245, %249 : vector<8x128xf32>
    %251 = arith.index_cast %c6_i32 : i32 to index
    %c0_76 = arith.constant 0 : index
    %c0_77 = arith.constant 0 : index
    %252 = vector.load %arg10[%251, %c0_76, %c0_77] : memref<8x8x128xf32, #tpu.memory_space<vmem>>, vector<1x8x128xf32>
    %253 = vector.shape_cast %252 : vector<1x8x128xf32> to vector<8x128xf32>
    %254 = vector.shape_cast %250 : vector<8x128xf32> to vector<1x8x128xf32>
    tpu.vector_store %arg10[%251, %c0_76, %c0_77], %254 {strides = array<i32>} : memref<8x8x128xf32, #tpu.memory_space<vmem>>, vector<1x8x128xf32>,
    %c7_i32 = arith.constant 7 : i32
    %255 = arith.index_cast %c7_i32 : i32 to index
    %c0_78 = arith.constant 0 : index
    %c0_79 = arith.constant 0 : index
    %256 = vector.load %arg11[%255, %c0_78, %c0_79] : memref<8x8x512xf32, #tpu.memory_space<vmem>>, vector<1x8x512xf32>
    %257 = vector.shape_cast %256 : vector<1x8x512xf32> to vector<8x512xf32>
    %cst_80 = arith.constant dense<0.000000e+00> : vector<8x512xf32>
    %258 = tpu.matmul %250, %14, %cst_80 {dimension_numbers = #tpu.dot_dimension_numbers<[1], [0], [0], [1], [0, 0, 1, 1], [], []>} : vector<8x128xf32>, vector<128x512xf32>, vector<8x512xf32> -> vector<8x512xf32>
    %259 = arith.addf %257, %258 : vector<8x512xf32>
    %260 = vector.extract_strided_slice %259 {offsets = [0, 0], sizes = [8, 128], strides = [1, 1]} : vector<8x512xf32> to vector<8x128xf32>
    %261 = arith.negf %260 : vector<8x128xf32>
    %262 = math.exp %261 : vector<8x128xf32>
    %cst_81 = arith.constant 1.000000e+00 : f32
    %263 = vector.broadcast %cst_81 : f32 to vector<8x128xf32>
    %264 = arith.addf %263, %262 : vector<8x128xf32>
    %265 = arith.divf %263, %264 : vector<8x128xf32>
    %266 = vector.extract_strided_slice %259 {offsets = [0, 128], sizes = [8, 128], strides = [1, 1]} : vector<8x512xf32> to vector<8x128xf32>
    %267 = arith.negf %266 : vector<8x128xf32>
    %268 = math.exp %267 : vector<8x128xf32>
    %cst_82 = arith.constant 1.000000e+00 : f32
    %269 = vector.broadcast %cst_82 : f32 to vector<8x128xf32>
    %270 = arith.addf %269, %268 : vector<8x128xf32>
    %271 = arith.divf %269, %270 : vector<8x128xf32>
    %272 = vector.extract_strided_slice %259 {offsets = [0, 256], sizes = [8, 128], strides = [1, 1]} : vector<8x512xf32> to vector<8x128xf32>
    %273 = math.tanh %272 : vector<8x128xf32>
    %274 = vector.extract_strided_slice %259 {offsets = [0, 384], sizes = [8, 128], strides = [1, 1]} : vector<8x512xf32> to vector<8x128xf32>
    %275 = arith.negf %274 : vector<8x128xf32>
    %276 = math.exp %275 : vector<8x128xf32>
    %cst_83 = arith.constant 1.000000e+00 : f32
    %277 = vector.broadcast %cst_83 : f32 to vector<8x128xf32>
    %278 = arith.addf %277, %276 : vector<8x128xf32>
    %279 = arith.divf %277, %278 : vector<8x128xf32>
    %280 = arith.mulf %271, %248 : vector<8x128xf32>
    %281 = arith.mulf %265, %273 : vector<8x128xf32>
    %282 = arith.addf %280, %281 : vector<8x128xf32>
    %283 = math.tanh %282 : vector<8x128xf32>
    %284 = arith.mulf %279, %283 : vector<8x128xf32>
    %285 = arith.index_cast %c7_i32 : i32 to index
    %c0_84 = arith.constant 0 : index
    %c0_85 = arith.constant 0 : index
    %286 = vector.load %arg10[%285, %c0_84, %c0_85] : memref<8x8x128xf32, #tpu.memory_space<vmem>>, vector<1x8x128xf32>
    %287 = vector.shape_cast %286 : vector<1x8x128xf32> to vector<8x128xf32>
    %288 = vector.shape_cast %284 : vector<8x128xf32> to vector<1x8x128xf32>
    tpu.vector_store %arg10[%285, %c0_84, %c0_85], %288 {strides = array<i32>} : memref<8x8x128xf32, #tpu.memory_space<vmem>>, vector<1x8x128xf32>,
    %c8_i32 = arith.constant 8 : i32
    %c0_86 = arith.constant 0 : index
    %c0_87 = arith.constant 0 : index
    %c0_88 = arith.constant 0 : index
    %289 = vector.load %arg8[%c0_86, %c0_87, %c0_88] : memref<2x8x128xf32, #tpu.memory_space<vmem>>, vector<1x8x128xf32>
    %290 = vector.shape_cast %289 : vector<1x8x128xf32> to vector<8x128xf32>
    %291 = vector.shape_cast %284 : vector<8x128xf32> to vector<1x8x128xf32>
    tpu.vector_store %arg8[%c0_86, %c0_87, %c0_88], %291 {strides = array<i32>} : memref<2x8x128xf32, #tpu.memory_space<vmem>>, vector<1x8x128xf32>,
    %c0_89 = arith.constant 0 : index
    %c0_90 = arith.constant 0 : index
    %c0_91 = arith.constant 0 : index
    %292 = vector.load %arg9[%c0_89, %c0_90, %c0_91] : memref<2x8x128xf32, #tpu.memory_space<vmem>>, vector<1x8x128xf32>
    %293 = vector.shape_cast %292 : vector<1x8x128xf32> to vector<8x128xf32>
    %294 = vector.shape_cast %282 : vector<8x128xf32> to vector<1x8x128xf32>
    tpu.vector_store %arg9[%c0_89, %c0_90, %c0_91], %294 {strides = array<i32>} : memref<2x8x128xf32, #tpu.memory_space<vmem>>, vector<1x8x128xf32>,
    %c0_92 = arith.constant 0 : index
    %c0_93 = arith.constant 0 : index
    %c0_94 = arith.constant 0 : index
    %295 = vector.load %arg10[%c0_92, %c0_93, %c0_94] : memref<8x8x128xf32, #tpu.memory_space<vmem>>, vector<8x8x128xf32>
    %296 = vector.shape_cast %295 : vector<8x8x128xf32> to vector<64x128xf32>
    %c1 = arith.constant 1 : index
    %c0_95 = arith.constant 0 : index
    %c0_96 = arith.constant 0 : index
    %297 = vector.load %arg2[%c1, %c0_95, %c0_96] : memref<2x128x512xf32, #tpu.memory_space<vmem>>, vector<1x128x512xf32>
    %298 = vector.shape_cast %297 : vector<1x128x512xf32> to vector<128x512xf32>
    %cst_97 = arith.constant dense<0.000000e+00> : vector<64x512xf32>
    %299 = tpu.matmul %296, %298, %cst_97 {dimension_numbers = #tpu.dot_dimension_numbers<[1], [0], [0], [1], [0, 0, 1, 1], [], []>} : vector<64x128xf32>, vector<128x512xf32>, vector<64x512xf32> -> vector<64x512xf32>
    %c1_98 = arith.constant 1 : index
    %c0_99 = arith.constant 0 : index
    %c0_100 = arith.constant 0 : index
    %300 = vector.load %arg4[%c1_98, %c0_99, %c0_100] : memref<2x1x512xf32, #tpu.memory_space<vmem>>, vector<1x1x512xf32>
    %301 = vector.shape_cast %300 : vector<1x1x512xf32> to vector<1x512xf32>
    %302 = vector.broadcast %301 : vector<1x512xf32> to vector<64x512xf32>
    %303 = arith.addf %299, %302 : vector<64x512xf32>
    %304 = vector.shape_cast %303 : vector<64x512xf32> to vector<8x8x512xf32>
    %c0_101 = arith.constant 0 : index
    %c0_102 = arith.constant 0 : index
    %c0_103 = arith.constant 0 : index
    %305 = vector.load %arg11[%c0_101, %c0_102, %c0_103] : memref<8x8x512xf32, #tpu.memory_space<vmem>>, vector<8x8x512xf32>
    tpu.vector_store %arg11[%c0_101, %c0_102, %c0_103], %304 {strides = array<i32>} : memref<8x8x512xf32, #tpu.memory_space<vmem>>, vector<8x8x512xf32>,
    %c1_104 = arith.constant 1 : index
    %c0_105 = arith.constant 0 : index
    %c0_106 = arith.constant 0 : index
    %306 = vector.load %arg3[%c1_104, %c0_105, %c0_106] : memref<2x128x512xf32, #tpu.memory_space<vmem>>, vector<1x128x512xf32>
    %307 = vector.shape_cast %306 : vector<1x128x512xf32> to vector<128x512xf32>
    %cst_107 = arith.constant 0.000000e+00 : f32
    %308 = vector.broadcast %cst_107 : f32 to vector<8x128xf32>
    %cst_108 = arith.constant 0.000000e+00 : f32
    %309 = vector.broadcast %cst_108 : f32 to vector<8x128xf32>
    %c0_i32_109 = arith.constant 0 : i32
    %310 = arith.index_cast %c0_i32_109 : i32 to index
    %c0_110 = arith.constant 0 : index
    %c0_111 = arith.constant 0 : index
    %311 = vector.load %arg11[%310, %c0_110, %c0_111] : memref<8x8x512xf32, #tpu.memory_space<vmem>>, vector<1x8x512xf32>
    %312 = vector.shape_cast %311 : vector<1x8x512xf32> to vector<8x512xf32>
    %cst_112 = arith.constant dense<0.000000e+00> : vector<8x512xf32>
    %313 = tpu.matmul %308, %307, %cst_112 {dimension_numbers = #tpu.dot_dimension_numbers<[1], [0], [0], [1], [0, 0, 1, 1], [], []>} : vector<8x128xf32>, vector<128x512xf32>, vector<8x512xf32> -> vector<8x512xf32>
    %314 = arith.addf %312, %313 : vector<8x512xf32>
    %315 = vector.extract_strided_slice %314 {offsets = [0, 0], sizes = [8, 128], strides = [1, 1]} : vector<8x512xf32> to vector<8x128xf32>
    %316 = arith.negf %315 : vector<8x128xf32>
    %317 = math.exp %316 : vector<8x128xf32>
    %cst_113 = arith.constant 1.000000e+00 : f32
    %318 = vector.broadcast %cst_113 : f32 to vector<8x128xf32>
    %319 = arith.addf %318, %317 : vector<8x128xf32>
    %320 = arith.divf %318, %319 : vector<8x128xf32>
    %321 = vector.extract_strided_slice %314 {offsets = [0, 128], sizes = [8, 128], strides = [1, 1]} : vector<8x512xf32> to vector<8x128xf32>
    %322 = arith.negf %321 : vector<8x128xf32>
    %323 = math.exp %322 : vector<8x128xf32>
    %cst_114 = arith.constant 1.000000e+00 : f32
    %324 = vector.broadcast %cst_114 : f32 to vector<8x128xf32>
    %325 = arith.addf %324, %323 : vector<8x128xf32>
    %326 = arith.divf %324, %325 : vector<8x128xf32>
    %327 = vector.extract_strided_slice %314 {offsets = [0, 256], sizes = [8, 128], strides = [1, 1]} : vector<8x512xf32> to vector<8x128xf32>
    %328 = math.tanh %327 : vector<8x128xf32>
    %329 = vector.extract_strided_slice %314 {offsets = [0, 384], sizes = [8, 128], strides = [1, 1]} : vector<8x512xf32> to vector<8x128xf32>
    %330 = arith.negf %329 : vector<8x128xf32>
    %331 = math.exp %330 : vector<8x128xf32>
    %cst_115 = arith.constant 1.000000e+00 : f32
    %332 = vector.broadcast %cst_115 : f32 to vector<8x128xf32>
    %333 = arith.addf %332, %331 : vector<8x128xf32>
    %334 = arith.divf %332, %333 : vector<8x128xf32>
    %335 = arith.mulf %326, %309 : vector<8x128xf32>
    %336 = arith.mulf %320, %328 : vector<8x128xf32>
    %337 = arith.addf %335, %336 : vector<8x128xf32>
    %338 = math.tanh %337 : vector<8x128xf32>
    %339 = arith.mulf %334, %338 : vector<8x128xf32>
    %340 = arith.index_cast %c0_i32_109 : i32 to index
    %c0_116 = arith.constant 0 : index
    %c0_117 = arith.constant 0 : index
    %341 = vector.load %arg10[%340, %c0_116, %c0_117] : memref<8x8x128xf32, #tpu.memory_space<vmem>>, vector<1x8x128xf32>
    %342 = vector.shape_cast %341 : vector<1x8x128xf32> to vector<8x128xf32>
    %343 = vector.shape_cast %339 : vector<8x128xf32> to vector<1x8x128xf32>
    tpu.vector_store %arg10[%340, %c0_116, %c0_117], %343 {strides = array<i32>} : memref<8x8x128xf32, #tpu.memory_space<vmem>>, vector<1x8x128xf32>,
    %c1_i32_118 = arith.constant 1 : i32
    %344 = arith.index_cast %c1_i32_118 : i32 to index
    %c0_119 = arith.constant 0 : index
    %c0_120 = arith.constant 0 : index
    %345 = vector.load %arg11[%344, %c0_119, %c0_120] : memref<8x8x512xf32, #tpu.memory_space<vmem>>, vector<1x8x512xf32>
    %346 = vector.shape_cast %345 : vector<1x8x512xf32> to vector<8x512xf32>
    %cst_121 = arith.constant dense<0.000000e+00> : vector<8x512xf32>
    %347 = tpu.matmul %339, %307, %cst_121 {dimension_numbers = #tpu.dot_dimension_numbers<[1], [0], [0], [1], [0, 0, 1, 1], [], []>} : vector<8x128xf32>, vector<128x512xf32>, vector<8x512xf32> -> vector<8x512xf32>
    %348 = arith.addf %346, %347 : vector<8x512xf32>
    %349 = vector.extract_strided_slice %348 {offsets = [0, 0], sizes = [8, 128], strides = [1, 1]} : vector<8x512xf32> to vector<8x128xf32>
    %350 = arith.negf %349 : vector<8x128xf32>
    %351 = math.exp %350 : vector<8x128xf32>
    %cst_122 = arith.constant 1.000000e+00 : f32
    %352 = vector.broadcast %cst_122 : f32 to vector<8x128xf32>
    %353 = arith.addf %352, %351 : vector<8x128xf32>
    %354 = arith.divf %352, %353 : vector<8x128xf32>
    %355 = vector.extract_strided_slice %348 {offsets = [0, 128], sizes = [8, 128], strides = [1, 1]} : vector<8x512xf32> to vector<8x128xf32>
    %356 = arith.negf %355 : vector<8x128xf32>
    %357 = math.exp %356 : vector<8x128xf32>
    %cst_123 = arith.constant 1.000000e+00 : f32
    %358 = vector.broadcast %cst_123 : f32 to vector<8x128xf32>
    %359 = arith.addf %358, %357 : vector<8x128xf32>
    %360 = arith.divf %358, %359 : vector<8x128xf32>
    %361 = vector.extract_strided_slice %348 {offsets = [0, 256], sizes = [8, 128], strides = [1, 1]} : vector<8x512xf32> to vector<8x128xf32>
    %362 = math.tanh %361 : vector<8x128xf32>
    %363 = vector.extract_strided_slice %348 {offsets = [0, 384], sizes = [8, 128], strides = [1, 1]} : vector<8x512xf32> to vector<8x128xf32>
    %364 = arith.negf %363 : vector<8x128xf32>
    %365 = math.exp %364 : vector<8x128xf32>
    %cst_124 = arith.constant 1.000000e+00 : f32
    %366 = vector.broadcast %cst_124 : f32 to vector<8x128xf32>
    %367 = arith.addf %366, %365 : vector<8x128xf32>
    %368 = arith.divf %366, %367 : vector<8x128xf32>
    %369 = arith.mulf %360, %337 : vector<8x128xf32>
    %370 = arith.mulf %354, %362 : vector<8x128xf32>
    %371 = arith.addf %369, %370 : vector<8x128xf32>
    %372 = math.tanh %371 : vector<8x128xf32>
    %373 = arith.mulf %368, %372 : vector<8x128xf32>
    %374 = arith.index_cast %c1_i32_118 : i32 to index
    %c0_125 = arith.constant 0 : index
    %c0_126 = arith.constant 0 : index
    %375 = vector.load %arg10[%374, %c0_125, %c0_126] : memref<8x8x128xf32, #tpu.memory_space<vmem>>, vector<1x8x128xf32>
    %376 = vector.shape_cast %375 : vector<1x8x128xf32> to vector<8x128xf32>
    %377 = vector.shape_cast %373 : vector<8x128xf32> to vector<1x8x128xf32>
    tpu.vector_store %arg10[%374, %c0_125, %c0_126], %377 {strides = array<i32>} : memref<8x8x128xf32, #tpu.memory_space<vmem>>, vector<1x8x128xf32>,
    %c2_i32_127 = arith.constant 2 : i32
    %378 = arith.index_cast %c2_i32_127 : i32 to index
    %c0_128 = arith.constant 0 : index
    %c0_129 = arith.constant 0 : index
    %379 = vector.load %arg11[%378, %c0_128, %c0_129] : memref<8x8x512xf32, #tpu.memory_space<vmem>>, vector<1x8x512xf32>
    %380 = vector.shape_cast %379 : vector<1x8x512xf32> to vector<8x512xf32>
    %cst_130 = arith.constant dense<0.000000e+00> : vector<8x512xf32>
    %381 = tpu.matmul %373, %307, %cst_130 {dimension_numbers = #tpu.dot_dimension_numbers<[1], [0], [0], [1], [0, 0, 1, 1], [], []>} : vector<8x128xf32>, vector<128x512xf32>, vector<8x512xf32> -> vector<8x512xf32>
    %382 = arith.addf %380, %381 : vector<8x512xf32>
    %383 = vector.extract_strided_slice %382 {offsets = [0, 0], sizes = [8, 128], strides = [1, 1]} : vector<8x512xf32> to vector<8x128xf32>
    %384 = arith.negf %383 : vector<8x128xf32>
    %385 = math.exp %384 : vector<8x128xf32>
    %cst_131 = arith.constant 1.000000e+00 : f32
    %386 = vector.broadcast %cst_131 : f32 to vector<8x128xf32>
    %387 = arith.addf %386, %385 : vector<8x128xf32>
    %388 = arith.divf %386, %387 : vector<8x128xf32>
    %389 = vector.extract_strided_slice %382 {offsets = [0, 128], sizes = [8, 128], strides = [1, 1]} : vector<8x512xf32> to vector<8x128xf32>
    %390 = arith.negf %389 : vector<8x128xf32>
    %391 = math.exp %390 : vector<8x128xf32>
    %cst_132 = arith.constant 1.000000e+00 : f32
    %392 = vector.broadcast %cst_132 : f32 to vector<8x128xf32>
    %393 = arith.addf %392, %391 : vector<8x128xf32>
    %394 = arith.divf %392, %393 : vector<8x128xf32>
    %395 = vector.extract_strided_slice %382 {offsets = [0, 256], sizes = [8, 128], strides = [1, 1]} : vector<8x512xf32> to vector<8x128xf32>
    %396 = math.tanh %395 : vector<8x128xf32>
    %397 = vector.extract_strided_slice %382 {offsets = [0, 384], sizes = [8, 128], strides = [1, 1]} : vector<8x512xf32> to vector<8x128xf32>
    %398 = arith.negf %397 : vector<8x128xf32>
    %399 = math.exp %398 : vector<8x128xf32>
    %cst_133 = arith.constant 1.000000e+00 : f32
    %400 = vector.broadcast %cst_133 : f32 to vector<8x128xf32>
    %401 = arith.addf %400, %399 : vector<8x128xf32>
    %402 = arith.divf %400, %401 : vector<8x128xf32>
    %403 = arith.mulf %394, %371 : vector<8x128xf32>
    %404 = arith.mulf %388, %396 : vector<8x128xf32>
    %405 = arith.addf %403, %404 : vector<8x128xf32>
    %406 = math.tanh %405 : vector<8x128xf32>
    %407 = arith.mulf %402, %406 : vector<8x128xf32>
    %408 = arith.index_cast %c2_i32_127 : i32 to index
    %c0_134 = arith.constant 0 : index
    %c0_135 = arith.constant 0 : index
    %409 = vector.load %arg10[%408, %c0_134, %c0_135] : memref<8x8x128xf32, #tpu.memory_space<vmem>>, vector<1x8x128xf32>
    %410 = vector.shape_cast %409 : vector<1x8x128xf32> to vector<8x128xf32>
    %411 = vector.shape_cast %407 : vector<8x128xf32> to vector<1x8x128xf32>
    tpu.vector_store %arg10[%408, %c0_134, %c0_135], %411 {strides = array<i32>} : memref<8x8x128xf32, #tpu.memory_space<vmem>>, vector<1x8x128xf32>,
    %c3_i32_136 = arith.constant 3 : i32
    %412 = arith.index_cast %c3_i32_136 : i32 to index
    %c0_137 = arith.constant 0 : index
    %c0_138 = arith.constant 0 : index
    %413 = vector.load %arg11[%412, %c0_137, %c0_138] : memref<8x8x512xf32, #tpu.memory_space<vmem>>, vector<1x8x512xf32>
    %414 = vector.shape_cast %413 : vector<1x8x512xf32> to vector<8x512xf32>
    %cst_139 = arith.constant dense<0.000000e+00> : vector<8x512xf32>
    %415 = tpu.matmul %407, %307, %cst_139 {dimension_numbers = #tpu.dot_dimension_numbers<[1], [0], [0], [1], [0, 0, 1, 1], [], []>} : vector<8x128xf32>, vector<128x512xf32>, vector<8x512xf32> -> vector<8x512xf32>
    %416 = arith.addf %414, %415 : vector<8x512xf32>
    %417 = vector.extract_strided_slice %416 {offsets = [0, 0], sizes = [8, 128], strides = [1, 1]} : vector<8x512xf32> to vector<8x128xf32>
    %418 = arith.negf %417 : vector<8x128xf32>
    %419 = math.exp %418 : vector<8x128xf32>
    %cst_140 = arith.constant 1.000000e+00 : f32
    %420 = vector.broadcast %cst_140 : f32 to vector<8x128xf32>
    %421 = arith.addf %420, %419 : vector<8x128xf32>
    %422 = arith.divf %420, %421 : vector<8x128xf32>
    %423 = vector.extract_strided_slice %416 {offsets = [0, 128], sizes = [8, 128], strides = [1, 1]} : vector<8x512xf32> to vector<8x128xf32>
    %424 = arith.negf %423 : vector<8x128xf32>
    %425 = math.exp %424 : vector<8x128xf32>
    %cst_141 = arith.constant 1.000000e+00 : f32
    %426 = vector.broadcast %cst_141 : f32 to vector<8x128xf32>
    %427 = arith.addf %426, %425 : vector<8x128xf32>
    %428 = arith.divf %426, %427 : vector<8x128xf32>
    %429 = vector.extract_strided_slice %416 {offsets = [0, 256], sizes = [8, 128], strides = [1, 1]} : vector<8x512xf32> to vector<8x128xf32>
    %430 = math.tanh %429 : vector<8x128xf32>
    %431 = vector.extract_strided_slice %416 {offsets = [0, 384], sizes = [8, 128], strides = [1, 1]} : vector<8x512xf32> to vector<8x128xf32>
    %432 = arith.negf %431 : vector<8x128xf32>
    %433 = math.exp %432 : vector<8x128xf32>
    %cst_142 = arith.constant 1.000000e+00 : f32
    %434 = vector.broadcast %cst_142 : f32 to vector<8x128xf32>
    %435 = arith.addf %434, %433 : vector<8x128xf32>
    %436 = arith.divf %434, %435 : vector<8x128xf32>
    %437 = arith.mulf %428, %405 : vector<8x128xf32>
    %438 = arith.mulf %422, %430 : vector<8x128xf32>
    %439 = arith.addf %437, %438 : vector<8x128xf32>
    %440 = math.tanh %439 : vector<8x128xf32>
    %441 = arith.mulf %436, %440 : vector<8x128xf32>
    %442 = arith.index_cast %c3_i32_136 : i32 to index
    %c0_143 = arith.constant 0 : index
    %c0_144 = arith.constant 0 : index
    %443 = vector.load %arg10[%442, %c0_143, %c0_144] : memref<8x8x128xf32, #tpu.memory_space<vmem>>, vector<1x8x128xf32>
    %444 = vector.shape_cast %443 : vector<1x8x128xf32> to vector<8x128xf32>
    %445 = vector.shape_cast %441 : vector<8x128xf32> to vector<1x8x128xf32>
    tpu.vector_store %arg10[%442, %c0_143, %c0_144], %445 {strides = array<i32>} : memref<8x8x128xf32, #tpu.memory_space<vmem>>, vector<1x8x128xf32>,
    %c4_i32_145 = arith.constant 4 : i32
    %446 = arith.index_cast %c4_i32_145 : i32 to index
    %c0_146 = arith.constant 0 : index
    %c0_147 = arith.constant 0 : index
    %447 = vector.load %arg11[%446, %c0_146, %c0_147] : memref<8x8x512xf32, #tpu.memory_space<vmem>>, vector<1x8x512xf32>
    %448 = vector.shape_cast %447 : vector<1x8x512xf32> to vector<8x512xf32>
    %cst_148 = arith.constant dense<0.000000e+00> : vector<8x512xf32>
    %449 = tpu.matmul %441, %307, %cst_148 {dimension_numbers = #tpu.dot_dimension_numbers<[1], [0], [0], [1], [0, 0, 1, 1], [], []>} : vector<8x128xf32>, vector<128x512xf32>, vector<8x512xf32> -> vector<8x512xf32>
    %450 = arith.addf %448, %449 : vector<8x512xf32>
    %451 = vector.extract_strided_slice %450 {offsets = [0, 0], sizes = [8, 128], strides = [1, 1]} : vector<8x512xf32> to vector<8x128xf32>
    %452 = arith.negf %451 : vector<8x128xf32>
    %453 = math.exp %452 : vector<8x128xf32>
    %cst_149 = arith.constant 1.000000e+00 : f32
    %454 = vector.broadcast %cst_149 : f32 to vector<8x128xf32>
    %455 = arith.addf %454, %453 : vector<8x128xf32>
    %456 = arith.divf %454, %455 : vector<8x128xf32>
    %457 = vector.extract_strided_slice %450 {offsets = [0, 128], sizes = [8, 128], strides = [1, 1]} : vector<8x512xf32> to vector<8x128xf32>
    %458 = arith.negf %457 : vector<8x128xf32>
    %459 = math.exp %458 : vector<8x128xf32>
    %cst_150 = arith.constant 1.000000e+00 : f32
    %460 = vector.broadcast %cst_150 : f32 to vector<8x128xf32>
    %461 = arith.addf %460, %459 : vector<8x128xf32>
    %462 = arith.divf %460, %461 : vector<8x128xf32>
    %463 = vector.extract_strided_slice %450 {offsets = [0, 256], sizes = [8, 128], strides = [1, 1]} : vector<8x512xf32> to vector<8x128xf32>
    %464 = math.tanh %463 : vector<8x128xf32>
    %465 = vector.extract_strided_slice %450 {offsets = [0, 384], sizes = [8, 128], strides = [1, 1]} : vector<8x512xf32> to vector<8x128xf32>
    %466 = arith.negf %465 : vector<8x128xf32>
    %467 = math.exp %466 : vector<8x128xf32>
    %cst_151 = arith.constant 1.000000e+00 : f32
    %468 = vector.broadcast %cst_151 : f32 to vector<8x128xf32>
    %469 = arith.addf %468, %467 : vector<8x128xf32>
    %470 = arith.divf %468, %469 : vector<8x128xf32>
    %471 = arith.mulf %462, %439 : vector<8x128xf32>
    %472 = arith.mulf %456, %464 : vector<8x128xf32>
    %473 = arith.addf %471, %472 : vector<8x128xf32>
    %474 = math.tanh %473 : vector<8x128xf32>
    %475 = arith.mulf %470, %474 : vector<8x128xf32>
    %476 = arith.index_cast %c4_i32_145 : i32 to index
    %c0_152 = arith.constant 0 : index
    %c0_153 = arith.constant 0 : index
    %477 = vector.load %arg10[%476, %c0_152, %c0_153] : memref<8x8x128xf32, #tpu.memory_space<vmem>>, vector<1x8x128xf32>
    %478 = vector.shape_cast %477 : vector<1x8x128xf32> to vector<8x128xf32>
    %479 = vector.shape_cast %475 : vector<8x128xf32> to vector<1x8x128xf32>
    tpu.vector_store %arg10[%476, %c0_152, %c0_153], %479 {strides = array<i32>} : memref<8x8x128xf32, #tpu.memory_space<vmem>>, vector<1x8x128xf32>,
    %c5_i32_154 = arith.constant 5 : i32
    %480 = arith.index_cast %c5_i32_154 : i32 to index
    %c0_155 = arith.constant 0 : index
    %c0_156 = arith.constant 0 : index
    %481 = vector.load %arg11[%480, %c0_155, %c0_156] : memref<8x8x512xf32, #tpu.memory_space<vmem>>, vector<1x8x512xf32>
    %482 = vector.shape_cast %481 : vector<1x8x512xf32> to vector<8x512xf32>
    %cst_157 = arith.constant dense<0.000000e+00> : vector<8x512xf32>
    %483 = tpu.matmul %475, %307, %cst_157 {dimension_numbers = #tpu.dot_dimension_numbers<[1], [0], [0], [1], [0, 0, 1, 1], [], []>} : vector<8x128xf32>, vector<128x512xf32>, vector<8x512xf32> -> vector<8x512xf32>
    %484 = arith.addf %482, %483 : vector<8x512xf32>
    %485 = vector.extract_strided_slice %484 {offsets = [0, 0], sizes = [8, 128], strides = [1, 1]} : vector<8x512xf32> to vector<8x128xf32>
    %486 = arith.negf %485 : vector<8x128xf32>
    %487 = math.exp %486 : vector<8x128xf32>
    %cst_158 = arith.constant 1.000000e+00 : f32
    %488 = vector.broadcast %cst_158 : f32 to vector<8x128xf32>
    %489 = arith.addf %488, %487 : vector<8x128xf32>
    %490 = arith.divf %488, %489 : vector<8x128xf32>
    %491 = vector.extract_strided_slice %484 {offsets = [0, 128], sizes = [8, 128], strides = [1, 1]} : vector<8x512xf32> to vector<8x128xf32>
    %492 = arith.negf %491 : vector<8x128xf32>
    %493 = math.exp %492 : vector<8x128xf32>
    %cst_159 = arith.constant 1.000000e+00 : f32
    %494 = vector.broadcast %cst_159 : f32 to vector<8x128xf32>
    %495 = arith.addf %494, %493 : vector<8x128xf32>
    %496 = arith.divf %494, %495 : vector<8x128xf32>
    %497 = vector.extract_strided_slice %484 {offsets = [0, 256], sizes = [8, 128], strides = [1, 1]} : vector<8x512xf32> to vector<8x128xf32>
    %498 = math.tanh %497 : vector<8x128xf32>
    %499 = vector.extract_strided_slice %484 {offsets = [0, 384], sizes = [8, 128], strides = [1, 1]} : vector<8x512xf32> to vector<8x128xf32>
    %500 = arith.negf %499 : vector<8x128xf32>
    %501 = math.exp %500 : vector<8x128xf32>
    %cst_160 = arith.constant 1.000000e+00 : f32
    %502 = vector.broadcast %cst_160 : f32 to vector<8x128xf32>
    %503 = arith.addf %502, %501 : vector<8x128xf32>
    %504 = arith.divf %502, %503 : vector<8x128xf32>
    %505 = arith.mulf %496, %473 : vector<8x128xf32>
    %506 = arith.mulf %490, %498 : vector<8x128xf32>
    %507 = arith.addf %505, %506 : vector<8x128xf32>
    %508 = math.tanh %507 : vector<8x128xf32>
    %509 = arith.mulf %504, %508 : vector<8x128xf32>
    %510 = arith.index_cast %c5_i32_154 : i32 to index
    %c0_161 = arith.constant 0 : index
    %c0_162 = arith.constant 0 : index
    %511 = vector.load %arg10[%510, %c0_161, %c0_162] : memref<8x8x128xf32, #tpu.memory_space<vmem>>, vector<1x8x128xf32>
    %512 = vector.shape_cast %511 : vector<1x8x128xf32> to vector<8x128xf32>
    %513 = vector.shape_cast %509 : vector<8x128xf32> to vector<1x8x128xf32>
    tpu.vector_store %arg10[%510, %c0_161, %c0_162], %513 {strides = array<i32>} : memref<8x8x128xf32, #tpu.memory_space<vmem>>, vector<1x8x128xf32>,
    %c6_i32_163 = arith.constant 6 : i32
    %514 = arith.index_cast %c6_i32_163 : i32 to index
    %c0_164 = arith.constant 0 : index
    %c0_165 = arith.constant 0 : index
    %515 = vector.load %arg11[%514, %c0_164, %c0_165] : memref<8x8x512xf32, #tpu.memory_space<vmem>>, vector<1x8x512xf32>
    %516 = vector.shape_cast %515 : vector<1x8x512xf32> to vector<8x512xf32>
    %cst_166 = arith.constant dense<0.000000e+00> : vector<8x512xf32>
    %517 = tpu.matmul %509, %307, %cst_166 {dimension_numbers = #tpu.dot_dimension_numbers<[1], [0], [0], [1], [0, 0, 1, 1], [], []>} : vector<8x128xf32>, vector<128x512xf32>, vector<8x512xf32> -> vector<8x512xf32>
    %518 = arith.addf %516, %517 : vector<8x512xf32>
    %519 = vector.extract_strided_slice %518 {offsets = [0, 0], sizes = [8, 128], strides = [1, 1]} : vector<8x512xf32> to vector<8x128xf32>
    %520 = arith.negf %519 : vector<8x128xf32>
    %521 = math.exp %520 : vector<8x128xf32>
    %cst_167 = arith.constant 1.000000e+00 : f32
    %522 = vector.broadcast %cst_167 : f32 to vector<8x128xf32>
    %523 = arith.addf %522, %521 : vector<8x128xf32>
    %524 = arith.divf %522, %523 : vector<8x128xf32>
    %525 = vector.extract_strided_slice %518 {offsets = [0, 128], sizes = [8, 128], strides = [1, 1]} : vector<8x512xf32> to vector<8x128xf32>
    %526 = arith.negf %525 : vector<8x128xf32>
    %527 = math.exp %526 : vector<8x128xf32>
    %cst_168 = arith.constant 1.000000e+00 : f32
    %528 = vector.broadcast %cst_168 : f32 to vector<8x128xf32>
    %529 = arith.addf %528, %527 : vector<8x128xf32>
    %530 = arith.divf %528, %529 : vector<8x128xf32>
    %531 = vector.extract_strided_slice %518 {offsets = [0, 256], sizes = [8, 128], strides = [1, 1]} : vector<8x512xf32> to vector<8x128xf32>
    %532 = math.tanh %531 : vector<8x128xf32>
    %533 = vector.extract_strided_slice %518 {offsets = [0, 384], sizes = [8, 128], strides = [1, 1]} : vector<8x512xf32> to vector<8x128xf32>
    %534 = arith.negf %533 : vector<8x128xf32>
    %535 = math.exp %534 : vector<8x128xf32>
    %cst_169 = arith.constant 1.000000e+00 : f32
    %536 = vector.broadcast %cst_169 : f32 to vector<8x128xf32>
    %537 = arith.addf %536, %535 : vector<8x128xf32>
    %538 = arith.divf %536, %537 : vector<8x128xf32>
    %539 = arith.mulf %530, %507 : vector<8x128xf32>
    %540 = arith.mulf %524, %532 : vector<8x128xf32>
    %541 = arith.addf %539, %540 : vector<8x128xf32>
    %542 = math.tanh %541 : vector<8x128xf32>
    %543 = arith.mulf %538, %542 : vector<8x128xf32>
    %544 = arith.index_cast %c6_i32_163 : i32 to index
    %c0_170 = arith.constant 0 : index
    %c0_171 = arith.constant 0 : index
    %545 = vector.load %arg10[%544, %c0_170, %c0_171] : memref<8x8x128xf32, #tpu.memory_space<vmem>>, vector<1x8x128xf32>
    %546 = vector.shape_cast %545 : vector<1x8x128xf32> to vector<8x128xf32>
    %547 = vector.shape_cast %543 : vector<8x128xf32> to vector<1x8x128xf32>
    tpu.vector_store %arg10[%544, %c0_170, %c0_171], %547 {strides = array<i32>} : memref<8x8x128xf32, #tpu.memory_space<vmem>>, vector<1x8x128xf32>,
    %c7_i32_172 = arith.constant 7 : i32
    %548 = arith.index_cast %c7_i32_172 : i32 to index
    %c0_173 = arith.constant 0 : index
    %c0_174 = arith.constant 0 : index
    %549 = vector.load %arg11[%548, %c0_173, %c0_174] : memref<8x8x512xf32, #tpu.memory_space<vmem>>, vector<1x8x512xf32>
    %550 = vector.shape_cast %549 : vector<1x8x512xf32> to vector<8x512xf32>
    %cst_175 = arith.constant dense<0.000000e+00> : vector<8x512xf32>
    %551 = tpu.matmul %543, %307, %cst_175 {dimension_numbers = #tpu.dot_dimension_numbers<[1], [0], [0], [1], [0, 0, 1, 1], [], []>} : vector<8x128xf32>, vector<128x512xf32>, vector<8x512xf32> -> vector<8x512xf32>
    %552 = arith.addf %550, %551 : vector<8x512xf32>
    %553 = vector.extract_strided_slice %552 {offsets = [0, 0], sizes = [8, 128], strides = [1, 1]} : vector<8x512xf32> to vector<8x128xf32>
    %554 = arith.negf %553 : vector<8x128xf32>
    %555 = math.exp %554 : vector<8x128xf32>
    %cst_176 = arith.constant 1.000000e+00 : f32
    %556 = vector.broadcast %cst_176 : f32 to vector<8x128xf32>
    %557 = arith.addf %556, %555 : vector<8x128xf32>
    %558 = arith.divf %556, %557 : vector<8x128xf32>
    %559 = vector.extract_strided_slice %552 {offsets = [0, 128], sizes = [8, 128], strides = [1, 1]} : vector<8x512xf32> to vector<8x128xf32>
    %560 = arith.negf %559 : vector<8x128xf32>
    %561 = math.exp %560 : vector<8x128xf32>
    %cst_177 = arith.constant 1.000000e+00 : f32
    %562 = vector.broadcast %cst_177 : f32 to vector<8x128xf32>
    %563 = arith.addf %562, %561 : vector<8x128xf32>
    %564 = arith.divf %562, %563 : vector<8x128xf32>
    %565 = vector.extract_strided_slice %552 {offsets = [0, 256], sizes = [8, 128], strides = [1, 1]} : vector<8x512xf32> to vector<8x128xf32>
    %566 = math.tanh %565 : vector<8x128xf32>
    %567 = vector.extract_strided_slice %552 {offsets = [0, 384], sizes = [8, 128], strides = [1, 1]} : vector<8x512xf32> to vector<8x128xf32>
    %568 = arith.negf %567 : vector<8x128xf32>
    %569 = math.exp %568 : vector<8x128xf32>
    %cst_178 = arith.constant 1.000000e+00 : f32
    %570 = vector.broadcast %cst_178 : f32 to vector<8x128xf32>
    %571 = arith.addf %570, %569 : vector<8x128xf32>
    %572 = arith.divf %570, %571 : vector<8x128xf32>
    %573 = arith.mulf %564, %541 : vector<8x128xf32>
    %574 = arith.mulf %558, %566 : vector<8x128xf32>
    %575 = arith.addf %573, %574 : vector<8x128xf32>
    %576 = math.tanh %575 : vector<8x128xf32>
    %577 = arith.mulf %572, %576 : vector<8x128xf32>
    %578 = arith.index_cast %c7_i32_172 : i32 to index
    %c0_179 = arith.constant 0 : index
    %c0_180 = arith.constant 0 : index
    %579 = vector.load %arg10[%578, %c0_179, %c0_180] : memref<8x8x128xf32, #tpu.memory_space<vmem>>, vector<1x8x128xf32>
    %580 = vector.shape_cast %579 : vector<1x8x128xf32> to vector<8x128xf32>
    %581 = vector.shape_cast %577 : vector<8x128xf32> to vector<1x8x128xf32>
    tpu.vector_store %arg10[%578, %c0_179, %c0_180], %581 {strides = array<i32>} : memref<8x8x128xf32, #tpu.memory_space<vmem>>, vector<1x8x128xf32>,
    %c8_i32_181 = arith.constant 8 : i32
    %c1_182 = arith.constant 1 : index
    %c0_183 = arith.constant 0 : index
    %c0_184 = arith.constant 0 : index
    %582 = vector.load %arg8[%c1_182, %c0_183, %c0_184] : memref<2x8x128xf32, #tpu.memory_space<vmem>>, vector<1x8x128xf32>
    %583 = vector.shape_cast %582 : vector<1x8x128xf32> to vector<8x128xf32>
    %584 = vector.shape_cast %577 : vector<8x128xf32> to vector<1x8x128xf32>
    tpu.vector_store %arg8[%c1_182, %c0_183, %c0_184], %584 {strides = array<i32>} : memref<2x8x128xf32, #tpu.memory_space<vmem>>, vector<1x8x128xf32>,
    %c1_185 = arith.constant 1 : index
    %c0_186 = arith.constant 0 : index
    %c0_187 = arith.constant 0 : index
    %585 = vector.load %arg9[%c1_185, %c0_186, %c0_187] : memref<2x8x128xf32, #tpu.memory_space<vmem>>, vector<1x8x128xf32>
    %586 = vector.shape_cast %585 : vector<1x8x128xf32> to vector<8x128xf32>
    %587 = vector.shape_cast %575 : vector<8x128xf32> to vector<1x8x128xf32>
    tpu.vector_store %arg9[%c1_185, %c0_186, %c0_187], %587 {strides = array<i32>} : memref<2x8x128xf32, #tpu.memory_space<vmem>>, vector<1x8x128xf32>,
    %c0_188 = arith.constant 0 : index
    %c0_189 = arith.constant 0 : index
    %c0_190 = arith.constant 0 : index
    %588 = vector.load %arg10[%c0_188, %c0_189, %c0_190] : memref<8x8x128xf32, #tpu.memory_space<vmem>>, vector<8x8x128xf32>
    %589 = vector.shape_cast %588 : vector<8x8x128xf32> to vector<64x128xf32>
    %c0_191 = arith.constant 0 : index
    %c0_192 = arith.constant 0 : index
    %590 = vector.load %arg5[%c0_191, %c0_192] : memref<128x128xf32, #tpu.memory_space<vmem>>, vector<128x128xf32>
    %cst_193 = arith.constant dense<0.000000e+00> : vector<64x128xf32>
    %591 = tpu.matmul %589, %590, %cst_193 {dimension_numbers = #tpu.dot_dimension_numbers<[1], [0], [0], [1], [0, 0, 1, 1], [], []>} : vector<64x128xf32>, vector<128x128xf32>, vector<64x128xf32> -> vector<64x128xf32>
    %c0_194 = arith.constant 0 : index
    %c0_195 = arith.constant 0 : index
    %592 = vector.load %arg6[%c0_194, %c0_195] : memref<1x128xf32, #tpu.memory_space<vmem>>, vector<1x128xf32>
    %593 = vector.broadcast %592 : vector<1x128xf32> to vector<64x128xf32>
    %594 = arith.addf %591, %593 : vector<64x128xf32>
    %595 = vector.shape_cast %594 : vector<64x128xf32> to vector<8x8x128xf32>
    %c0_196 = arith.constant 0 : index
    %c0_197 = arith.constant 0 : index
    %c0_198 = arith.constant 0 : index
    %596 = vector.load %arg7[%c0_196, %c0_197, %c0_198] : memref<8x8x128xf32, #tpu.memory_space<vmem>>, vector<8x8x128xf32>
    tpu.vector_store %arg7[%c0_196, %c0_197, %c0_198], %595 {strides = array<i32>} : memref<8x8x128xf32, #tpu.memory_space<vmem>>, vector<8x8x128xf32>,
    return
  }
  func.func @transform_0(%arg0: i32) -> (i32, i32, i32) {
    %c0_i32 = arith.constant 0 : i32
    %c0_i32_0 = arith.constant 0 : i32
    %c0_i32_1 = arith.constant 0 : i32
    return %c0_i32, %arg0, %c0_i32_0 : i32, i32, i32
  }
  func.func @transform_1(%arg0: i32) -> (i32, i32, i32) {
    %c0_i32 = arith.constant 0 : i32
    %c0_i32_0 = arith.constant 0 : i32
    %c0_i32_1 = arith.constant 0 : i32
    %c0_i32_2 = arith.constant 0 : i32
    return %c0_i32, %c0_i32_0, %c0_i32_1 : i32, i32, i32
  }
  func.func @transform_2(%arg0: i32) -> (i32, i32, i32) {
    %c0_i32 = arith.constant 0 : i32
    %c0_i32_0 = arith.constant 0 : i32
    %c0_i32_1 = arith.constant 0 : i32
    %c0_i32_2 = arith.constant 0 : i32
    return %c0_i32, %c0_i32_0, %c0_i32_1 : i32, i32, i32
  }
  func.func @transform_3(%arg0: i32) -> (i32, i32, i32) {
    %c0_i32 = arith.constant 0 : i32
    %c0_i32_0 = arith.constant 0 : i32
    %c0_i32_1 = arith.constant 0 : i32
    %c0_i32_2 = arith.constant 0 : i32
    return %c0_i32, %c0_i32_0, %c0_i32_1 : i32, i32, i32
  }
  func.func @transform_4(%arg0: i32) -> (i32, i32) {
    %c0_i32 = arith.constant 0 : i32
    %c0_i32_0 = arith.constant 0 : i32
    %c0_i32_1 = arith.constant 0 : i32
    return %c0_i32, %c0_i32_0 : i32, i32
  }
  func.func @transform_5(%arg0: i32) -> (i32, i32) {
    %c0_i32 = arith.constant 0 : i32
    %c0_i32_0 = arith.constant 0 : i32
    %c0_i32_1 = arith.constant 0 : i32
    return %c0_i32, %c0_i32_0 : i32, i32
  }
  func.func @transform_6(%arg0: i32) -> (i32, i32, i32) {
    %c0_i32 = arith.constant 0 : i32
    %c0_i32_0 = arith.constant 0 : i32
    %c0_i32_1 = arith.constant 0 : i32
    return %c0_i32, %arg0, %c0_i32_0 : i32, i32, i32
  }
  func.func @transform_7(%arg0: i32) -> (i32, i32, i32) {
    %c0_i32 = arith.constant 0 : i32
    %c0_i32_0 = arith.constant 0 : i32
    %c0_i32_1 = arith.constant 0 : i32
    return %c0_i32, %arg0, %c0_i32_0 : i32, i32, i32
  }
  func.func @transform_8(%arg0: i32) -> (i32, i32, i32) {
    %c0_i32 = arith.constant 0 : i32
    %c0_i32_0 = arith.constant 0 : i32
    %c0_i32_1 = arith.constant 0 : i32
    return %c0_i32, %arg0, %c0_i32_0 : i32, i32, i32
  }
}

</mosaic_0001>

<bundles_post_ra>
// kernel: tpu_custom_call.1
= control target key start
LH: loop header
LB: loop body
LE: loop exit
PB: predicated region body
PF: predicated region fallthrough
CT: control target
= control target key end

     0   :  { %14 = vsyncpa [#allocation5], 0  ;;  %s6990_s0 = inlined_call_operand.hbm [shape: f32[8,8,128], index: 0, kind: input, shape index: {}]   ;;  %s6991_s1 = inlined_call_operand.hbm [shape: f32[2,128,512], index: 1, kind: input, shape index: {}]   ;;  %s6992_s2 = inlined_call_operand.hbm [shape: f32[2,128,512], index: 2, kind: input, shape index: {}]   ;;  %s6993_s3 = inlined_call_operand.vmem [shape: f32[2,1,512], index: 3, kind: input, shape index: {}]   ;;  %s6994_s4 = inlined_call_operand.hbm [shape: f32[128,128], index: 4, kind: input, shape index: {}]   ;;  %s6995_s5 = inlined_call_operand.vmem [shape: f32[1,128], index: 5, kind: input, shape index: {}]   ;;  %s6996_s6 = inlined_call_operand.hbm [shape: f32[8,8,128], index: 6, kind: output, shape index: {0}]   ;;  %s6997_s7 = inlined_call_operand.hbm [shape: f32[2,8,128], index: 7, kind: output, shape index: {1}]   ;;  %s6998_s8 = inlined_call_operand.hbm [shape: f32[2,8,128], index: 8, kind: output, shape index: {2}]  }
   0x1   :  { %15 = vsyncpa [#allocation8], 0 }
   0x2   :  { %16 = vsyncpa [#allocation11], 0 }
   0x3   :  { %17 = vsyncpa [#allocation6], 0 }
   0x4   :  { %18 = vsyncpa [#allocation14], 0  ;;  %s5810_s27 = smov [#allocation7]   ;;  %s5646_s9 = scalar_lea.hbm %s6991_s1, 16384 }
   0x5   :  { %s36_s28 = sshll.u32 %s5810_s27, 4  ;;  %p5647_p0 = scmp.ne.s32.totalorder %s6991_s1, %s5646_s9  ;;  %s37_s28 = int_to_ptr.vmem [resolvable:$true] %s36_s28 }
   0x6   :  { %p5650_p1 = scmp.lt.u32.totalorder %s5646_s9, %s6991_s1 }
   0x8   :  { %p5652_p2 = pnand %p5650_p1, %p5647_p0 }
   0xa   :  { %5655 = shalt.err (!%p5652_p2)
}
   0xb   :  { %s5656_s14 = scalar_lea.vmem %s37_s28, 16384  ;;  %p5661_p4 = scmp.lt.s32.totalorder %s37_s28, %s37_s28 }
   0xc   :  { %p5657_p3 = scmp.ne.s32.totalorder %s37_s28, %s5656_s14  ;;  %p5662_p5 = scmp.lt.s32.totalorder %s5656_s14, %s5656_s14 }
   0xe   :  { %p5663_p6 = por %p5662_p5, %p5661_p4 }
  0x10   :  { %p5664_p7 = pnand %p5663_p6, %p5657_p3 }
  0x12   :  { %5667 = shalt.err (!%p5664_p7)
}
  0x13   :  { %s5811_s15 = smov 512   ;;  %s5812_s16 = smov 32  }
  0x14   :  { %42 = dma.hbm_to_vmem [thread:$0]  %s6991_s1, 16384, %s37_s28, [#allocation8], %s5811_s15, %s5811_s15, %s5812_s16  }
  0x15   :  { %s5813_s19 = smov [#allocation4]   ;;  %s5668_s23 = scalar_lea.hbm %s6990_s0, 1024 }
  0x16   :  { %s24_s20 = sshll.u32 %s5813_s19, 4  ;;  %p5669_p8 = scmp.ne.s32.totalorder %s6990_s0, %s5668_s23  ;;  %s25_s20 = int_to_ptr.vmem [resolvable:$true] %s24_s20 }
  0x17   :  { %p5672_p9 = scmp.lt.u32.totalorder %s5668_s23, %s6990_s0 }
  0x19   :  { %p5674_p10 = pnand %p5672_p9, %p5669_p8 }
  0x1b   :  { %5677 = shalt.err (!%p5674_p10)
}
  0x1c   :  { %s5678_s29 = scalar_lea.vmem %s25_s20, 1024  ;;  %p5683_p12 = scmp.lt.s32.totalorder %s25_s20, %s25_s20 }
  0x1d   :  { %p5679_p11 = scmp.ne.s32.totalorder %s25_s20, %s5678_s29  ;;  %p5684_p13 = scmp.lt.s32.totalorder %s5678_s29, %s5678_s29 }
  0x1f   :  { %p5685_p0 = por %p5684_p13, %p5683_p12 }
  0x21   :  { %p5686_p1 = pnand %p5685_p0, %p5679_p11 }
  0x23   :  { %5689 = shalt.err (!%p5686_p1)
}
  0x24   :  { %s5814_s1 = smov 128   ;;  %s5815_s28 = smov 8  }
  0x25   :  { %30 = dma.hbm_to_vmem [thread:$0]  %s6990_s0, 1024, %s25_s20, [#allocation5], %s5814_s1, %s5814_s1, %s5815_s28  }
  0x26   :  { %s5816_s10 = smov [#allocation9]   ;;  %s5817_s12 = smov [#allocation10]  }
  0x27   :  { %s48_s11 = sshll.u32 %s5816_s10, 4  ;;  %s62_s13 = sshll.u32 %s5817_s12, 4  ;;  %s49_s11 = int_to_ptr.vmem [resolvable:$true] %s48_s11  ;;  %s5897_s13 = int_to_ptr.vmem [resolvable:$true] %s62_s13 }
  0x28   :  { %s5690_s18 = scalar_lea.hbm %s6992_s2, 16384 }
  0x29   :  { %p5691_p2 = scmp.ne.s32.totalorder %s6992_s2, %s5690_s18  ;;  %p5694_p3 = scmp.lt.u32.totalorder %s5690_s18, %s6992_s2 }
  0x2b   :  { %p5696_p4 = pnand %p5694_p3, %p5691_p2 }
  0x2d   :  { %5699 = shalt.err (!%p5696_p4)
}
  0x2e   :  { %s5700_s0 = scalar_lea.vmem %s49_s11, 16384  ;;  %p5705_p6 = scmp.lt.s32.totalorder %s49_s11, %s49_s11 }
  0x2f   :  { %p5701_p5 = scmp.ne.s32.totalorder %s49_s11, %s5700_s0  ;;  %p5706_p7 = scmp.lt.s32.totalorder %s5700_s0, %s5700_s0 }
  0x31   :  { %p5707_p8 = por %p5706_p7, %p5705_p6 }
  0x33   :  { %p5708_p9 = pnand %p5707_p8, %p5701_p5 }
  0x35   :  { %5711 = shalt.err (!%p5708_p9)
}
  0x36   :  { %54 = dma.hbm_to_vmem [thread:$0]  %s6992_s2, 16384, %s49_s11, [#allocation8], %s5811_s15, %s5811_s15, %s5812_s16  }
  0x37   :  { %s5712_s27 = scalar_lea.hbm %s6994_s4, 2048 }
  0x38   :  { %p5713_p10 = scmp.ne.s32.totalorder %s6994_s4, %s5712_s27  ;;  %p5716_p11 = scmp.lt.u32.totalorder %s5712_s27, %s6994_s4 }
  0x3a   :  { %p5718_p12 = pnand %p5716_p11, %p5713_p10 }
  0x3c   :  { %5721 = shalt.err (!%p5718_p12)
}
  0x3d   :  { %s5722_s12 = scalar_lea.vmem %s5897_s13, 2048  ;;  %p5727_p0 = scmp.lt.s32.totalorder %s5897_s13, %s5897_s13 }
  0x3e   :  { %p5723_p13 = scmp.ne.s32.totalorder %s5897_s13, %s5722_s12  ;;  %p5728_p1 = scmp.lt.s32.totalorder %s5722_s12, %s5722_s12 }
  0x40   :  { %p5729_p2 = por %p5728_p1, %p5727_p0 }
  0x42   :  { %p5730_p3 = pnand %p5729_p2, %p5723_p13 }
  0x44   :  { %5733 = shalt.err (!%p5730_p3)
}
  0x45   :  { %68 = dma.hbm_to_vmem [thread:$0]  %s6994_s4, 2048, %s5897_s13, [#allocation11], %s5814_s1, %s5814_s1, %s5815_s28  }
  0x46   :  { %5800 = dma.done.wait [#allocation5], 1024  }
  0x47   :  { %5801 = vsyncadd [#allocation5], 4294966272 }
  0x48   :  { %5802 = dma.done.wait [#allocation8], 32768  }
  0x49   :  { %5803 = vsyncadd [#allocation8], 4294934528 }
  0x4a   :  { %5804 = dma.done.wait [#allocation11], 2048  }
  0x4b   :  { %5805 = vsyncadd [#allocation11], 4294965248  ;;  %v7002_v0 = vmov 0.0   ;;  %v108_v1 = vld [vmem:[#allocation7 + $0x8] sm:$0xff]  ;;  %v107_v3 = vld [vmem:[#allocation7] sm:$0xff] }
  0x4c   :  { %257 = vmatprep.mubr.f32.mxu1 %v7002_v0  ;;  %583 = vmatprep.mubr.f32.mxu0 %v7002_v0  ;;  %v112_v2 = vld [vmem:[#allocation7 + $0x28] sm:$0xff]  ;;  %v111_v5 = vld [vmem:[#allocation7 + $0x20] sm:$0xff] }
  0x4d   :  { %v4066_v4 = vpack.c.bf16 %v112_v2, %v108_v1  ;;  %v452_v6 = vld [vmem:[#allocation9 + $0x8] sm:$0xff]  ;;  %v4068_v8 = vpack.c.bf16 %v111_v5, %v107_v3  ;;  %v451_v10 = vld [vmem:[#allocation9] sm:$0xff] }
  0x4e   :  { %v456_v7 = vld [vmem:[#allocation9 + $0x28] sm:$0xff]  ;;  %v455_v11 = vld [vmem:[#allocation9 + $0x20] sm:$0xff] }
  0x4f   :  { %v5936_v9 = vpack.c.bf16 %v456_v7, %v452_v6  ;;  %v116_v12 = vld [vmem:[#allocation7 + $0x48] sm:$0xff]  ;;  %4067 = vmatprep.subr.bf16.mxu1 %v4066_v4  ;;  %v5938_v13 = vpack.c.bf16 %v455_v11, %v451_v10  ;;  %v115_v15 = vld [vmem:[#allocation7 + $0x40] sm:$0xff] }
  0x50   :  { %v120_v14 = vld [vmem:[#allocation7 + $0x68] sm:$0xff]  ;;  %v119_v16 = vld [vmem:[#allocation7 + $0x60] sm:$0xff]  ;;  %4069 = vmatpush1.bf16.msra.mxu1 %v4068_v8 }
  0x51   :  { %4131 = vmatprep.subr.bf16.mxu0 %v5936_v9  ;;  %v4070_v17 = vpack.c.bf16 %v120_v14, %v116_v12  ;;  %v4072_v18 = vpack.c.bf16 %v119_v16, %v115_v15  ;;  %v460_v19 = vld [vmem:[#allocation9 + $0x48] sm:$0xff]  ;;  %v459_v21 = vld [vmem:[#allocation9 + $0x40] sm:$0xff] }
  0x52   :  { %v464_v20 = vld [vmem:[#allocation9 + $0x68] sm:$0xff]  ;;  %4133 = vmatpush1.bf16.msra.mxu0 %v5938_v13  ;;  %v463_v23 = vld [vmem:[#allocation9 + $0x60] sm:$0xff] }
  0x53   :  { %v5942_v22 = vpack.c.bf16 %v464_v20, %v460_v19  ;;  %v124_v24 = vld [vmem:[#allocation7 + $0x88] sm:$0xff]  ;;  %4071 = vmatprep.subr.bf16.mxu1 %v4070_v17  ;;  %v5944_v26 = vpack.c.bf16 %v463_v23, %v459_v21  ;;  %v123_v28 = vld [vmem:[#allocation7 + $0x80] sm:$0xff] }
  0x54   :  { %v128_v25 = vld [vmem:[#allocation7 + $0xa8] sm:$0xff]  ;;  %v127_v29 = vld [vmem:[#allocation7 + $0xa0] sm:$0xff]  ;;  %4073 = vmatpush1.bf16.msra.mxu1 %v4072_v18 }
  0x55   :  { %v4074_v27 = vpack.c.bf16 %v128_v25, %v124_v24  ;;  %v468_v30 = vld [vmem:[#allocation9 + $0x88] sm:$0xff]  ;;  %4135 = vmatprep.subr.bf16.mxu0 %v5942_v22  ;;  %v467_v32 = vld [vmem:[#allocation9 + $0x80] sm:$0xff]  ;;  %v4076_v34 = vpack.c.bf16 %v127_v29, %v123_v28 }
  0x56   :  { %v472_v31 = vld [vmem:[#allocation9 + $0xa8] sm:$0xff]  ;;  %v471_v33 = vld [vmem:[#allocation9 + $0xa0] sm:$0xff]  ;;  %4137 = vmatpush1.bf16.msra.mxu0 %v5944_v26 }
  0x57   :  { %v5947_v35 = vpack.c.bf16 %v472_v31, %v468_v30  ;;  %v132_v36 = vld [vmem:[#allocation7 + $0xc8] sm:$0xff]  ;;  %v131_v38 = vld [vmem:[#allocation7 + $0xc0] sm:$0xff]  ;;  %4075 = vmatprep.subr.bf16.mxu1 %v4074_v27  ;;  %v5950_v39 = vpack.c.bf16 %v471_v33, %v467_v32 }
  0x58   :  { %v136_v37 = vld [vmem:[#allocation7 + $0xe8] sm:$0xff]  ;;  %v135_v41 = vld [vmem:[#allocation7 + $0xe0] sm:$0xff]  ;;  %4077 = vmatpush1.bf16.msra.mxu1 %v4076_v34 }
  0x59   :  { %v4078_v40 = vpack.c.bf16 %v136_v37, %v132_v36  ;;  %v476_v42 = vld [vmem:[#allocation9 + $0xc8] sm:$0xff]  ;;  %4139 = vmatprep.subr.bf16.mxu0 %v5947_v35  ;;  %v475_v45 = vld [vmem:[#allocation9 + $0xc0] sm:$0xff]  ;;  %v4080_v49 = vpack.c.bf16 %v135_v41, %v131_v38  ;;  %v110_v37 = vld [vmem:[#allocation7 + $0x18] sm:$0xff] }
  0x5a   :  { %v480_v43 = vld [vmem:[#allocation9 + $0xe8] sm:$0xff]  ;;  %v479_v46 = vld [vmem:[#allocation9 + $0xe0] sm:$0xff]  ;;  %4141 = vmatpush1.bf16.msra.mxu0 %v5950_v39  ;;  %v114_v38 = vld [vmem:[#allocation7 + $0x38] sm:$0xff] }
  0x5b   :  { %v5953_v44 = vpack.c.bf16 %v480_v43, %v476_v42  ;;  %v140_v47 = vld [vmem:[#allocation7 + $0x108] sm:$0xff]  ;;  %4079 = vmatprep.subr.bf16.mxu1 %v4078_v40  ;;  %v5956_v52 = vpack.c.bf16 %v479_v46, %v475_v45  ;;  %v139_v54 = vld [vmem:[#allocation7 + $0x100] sm:$0xff]  ;;  %v4098_v42 = vpack.c.bf16 %v114_v38, %v110_v37  ;;  %v109_v43 = vld [vmem:[#allocation7 + $0x10] sm:$0xff] }
  0x5c   :  { %v144_v48 = vld [vmem:[#allocation7 + $0x128] sm:$0xff]  ;;  %v143_v55 = vld [vmem:[#allocation7 + $0x120] sm:$0xff]  ;;  %4081 = vmatpush1.bf16.msra.mxu1 %v4080_v49  ;;  %v113_v45 = vld [vmem:[#allocation7 + $0x30] sm:$0xff] }
  0x5d   :  { %v484_v50 = vld [vmem:[#allocation9 + $0x108] sm:$0xff]  ;;  %v4082_v53 = vpack.c.bf16 %v144_v48, %v140_v47  ;;  %v483_v56 = vld [vmem:[#allocation9 + $0x100] sm:$0xff]  ;;  %4143 = vmatprep.subr.bf16.mxu0 %v5953_v44  ;;  %v4084_v63 = vpack.c.bf16 %v143_v55, %v139_v54  ;;  %v118_v46 = vld [vmem:[#allocation7 + $0x58] sm:$0xff]  ;;  %v4100_v49 = vpack.c.bf16 %v113_v45, %v109_v43 }
  0x5e   :  { %v488_v51 = vld [vmem:[#allocation9 + $0x128] sm:$0xff]  ;;  %v487_v58 = vld [vmem:[#allocation9 + $0x120] sm:$0xff]  ;;  %4145 = vmatpush1.bf16.msra.mxu0 %v5956_v52  ;;  %v122_v47 = vld [vmem:[#allocation7 + $0x78] sm:$0xff] }
  0x5f   :  { %v5959_v57 = vpack.c.bf16 %v488_v51, %v484_v50  ;;  %v148_v59 = vld [vmem:[#allocation7 + $0x148] sm:$0xff]  ;;  %4083 = vmatprep.subr.bf16.mxu1 %v4082_v53  ;;  %v5962_v1 = vpack.c.bf16 %v487_v58, %v483_v56  ;;  %v147_v3 = vld [vmem:[#allocation7 + $0x140] sm:$0xff]  ;;  %v4102_v50 = vpack.c.bf16 %v122_v47, %v118_v46  ;;  %v117_v51 = vld [vmem:[#allocation7 + $0x50] sm:$0xff] }
  0x60   :  { %v152_v60 = vld [vmem:[#allocation7 + $0x168] sm:$0xff]  ;;  %v151_v4 = vld [vmem:[#allocation7 + $0x160] sm:$0xff]  ;;  %4085 = vmatpush1.bf16.msra.mxu1 %v4084_v63  ;;  %v121_v53 = vld [vmem:[#allocation7 + $0x70] sm:$0xff] }
  0x61   :  { %v492_v61 = vld [vmem:[#allocation9 + $0x148] sm:$0xff]  ;;  %v4086_v2 = vpack.c.bf16 %v152_v60, %v148_v59  ;;  %v491_v5 = vld [vmem:[#allocation9 + $0x140] sm:$0xff]  ;;  %4147 = vmatprep.subr.bf16.mxu0 %v5959_v57  ;;  %v4088_v14 = vpack.c.bf16 %v151_v4, %v147_v3  ;;  %v126_v54 = vld [vmem:[#allocation7 + $0x98] sm:$0xff]  ;;  %v4104_v58 = vpack.c.bf16 %v121_v53, %v117_v51 }
  0x62   :  { %v496_v62 = vld [vmem:[#allocation9 + $0x168] sm:$0xff]  ;;  %v495_v7 = vld [vmem:[#allocation9 + $0x160] sm:$0xff]  ;;  %4149 = vmatpush1.bf16.msra.mxu0 %v5962_v1  ;;  %v130_v55 = vld [vmem:[#allocation7 + $0xb8] sm:$0xff] }
  0x63   :  { %v5965_v6 = vpack.c.bf16 %v496_v62, %v492_v61  ;;  %v156_v8 = vld [vmem:[#allocation7 + $0x188] sm:$0xff]  ;;  %4087 = vmatprep.subr.bf16.mxu1 %v4086_v2  ;;  %v5968_v15 = vpack.c.bf16 %v495_v7, %v491_v5  ;;  %v155_v17 = vld [vmem:[#allocation7 + $0x180] sm:$0xff]  ;;  %v4106_v59 = vpack.c.bf16 %v130_v55, %v126_v54  ;;  %v125_v60 = vld [vmem:[#allocation7 + $0x90] sm:$0xff] }
  0x64   :  { %v160_v10 = vld [vmem:[#allocation7 + $0x1a8] sm:$0xff]  ;;  %v159_v18 = vld [vmem:[#allocation7 + $0x1a0] sm:$0xff]  ;;  %4089 = vmatpush1.bf16.msra.mxu1 %v4088_v14  ;;  %v129_v61 = vld [vmem:[#allocation7 + $0xb0] sm:$0xff] }
  0x65   :  { %v500_v11 = vld [vmem:[#allocation9 + $0x188] sm:$0xff]  ;;  %v4090_v16 = vpack.c.bf16 %v160_v10, %v156_v8  ;;  %v499_v19 = vld [vmem:[#allocation9 + $0x180] sm:$0xff]  ;;  %4151 = vmatprep.subr.bf16.mxu0 %v5965_v6  ;;  %v4092_v28 = vpack.c.bf16 %v159_v18, %v155_v17  ;;  %v134_v62 = vld [vmem:[#allocation7 + $0xd8] sm:$0xff]  ;;  %v4108_v3 = vpack.c.bf16 %v129_v61, %v125_v60 }
  0x66   :  { %v504_v12 = vld [vmem:[#allocation9 + $0x1a8] sm:$0xff]  ;;  %v503_v21 = vld [vmem:[#allocation9 + $0x1a0] sm:$0xff]  ;;  %4153 = vmatpush1.bf16.msra.mxu0 %v5968_v15  ;;  %v138_v63 = vld [vmem:[#allocation7 + $0xf8] sm:$0xff] }
  0x67   :  { %v5971_v20 = vpack.c.bf16 %v504_v12, %v500_v11  ;;  %v164_v23 = vld [vmem:[#allocation7 + $0x1c8] sm:$0xff]  ;;  %4091 = vmatprep.subr.bf16.mxu1 %v4090_v16  ;;  %v5974_v29 = vpack.c.bf16 %v503_v21, %v499_v19  ;;  %v163_v31 = vld [vmem:[#allocation7 + $0x1c0] sm:$0xff]  ;;  %v5997_v2 = vld [vmem:[#allocation4 + $0x10] sm:$0xff]  ;;  %v4110_v4 = vpack.c.bf16 %v138_v63, %v134_v62 }
  0x68   :  { %v168_v24 = vld [vmem:[#allocation7 + $0x1e8] sm:$0xff]  ;;  %v167_v32 = vld [vmem:[#allocation7 + $0x1e0] sm:$0xff]  ;;  %4093 = vmatpush1.bf16.msra.mxu1 %v4092_v28  ;;  %v133_v5 = vld [vmem:[#allocation7 + $0xd0] sm:$0xff] }
  0x69   :  { %v508_v25 = vld [vmem:[#allocation9 + $0x1c8] sm:$0xff]  ;;  %v4094_v30 = vpack.c.bf16 %v168_v24, %v164_v23  ;;  %v507_v33 = vld [vmem:[#allocation9 + $0x1c0] sm:$0xff]  ;;  %4155 = vmatprep.subr.bf16.mxu0 %v5971_v20  ;;  %v4096_v40 = vpack.c.bf16 %v167_v32, %v163_v31  ;;  %v137_v7 = vld [vmem:[#allocation7 + $0xf0] sm:$0xff] }
  0x6a   :  { %v512_v27 = vld [vmem:[#allocation9 + $0x1e8] sm:$0xff]  ;;  %v511_v36 = vld [vmem:[#allocation9 + $0x1e0] sm:$0xff]  ;;  %4157 = vmatpush1.bf16.msra.mxu0 %v5974_v29  ;;  %v142_v8 = vld [vmem:[#allocation7 + $0x118] sm:$0xff]  ;;  %v4112_v12 = vpack.c.bf16 %v137_v7, %v133_v5 }
  0x6b   :  { %v5977_v34 = vpack.c.bf16 %v512_v27, %v508_v25  ;;  %4095 = vmatprep.subr.bf16.mxu1 %v4094_v30  ;;  %v5980_v41 = vpack.c.bf16 %v511_v36, %v507_v33  ;;  %v5983_v48 = vld [vmem:[#allocation4] sm:$0xff]  ;;  %v5989_v56 = vld [vmem:[#allocation4 + $0x8] sm:$0xff]  ;;  %v146_v10 = vld [vmem:[#allocation7 + $0x138] sm:$0xff] }
  0x6c   :  { %4097 = vmatpush1.bf16.msra.mxu1 %v4096_v40  ;;  %v6003_v11 = vld [vmem:[#allocation4 + $0x18] sm:$0xff]  ;;  %v4114_v14 = vpack.c.bf16 %v146_v10, %v142_v8  ;;  %v141_v16 = vld [vmem:[#allocation7 + $0x110] sm:$0xff]  ;;  %v6009_v21 = vld [vmem:[#allocation4 + $0x20] sm:$0xff] }
  0x6d   :  { %4159 = vmatprep.subr.bf16.mxu0 %v5977_v34  ;;  %4099 = vmatprep.subr.bf16.mxu1 %v4098_v42  ;;  %v145_v17 = vld [vmem:[#allocation7 + $0x130] sm:$0xff]  ;;  %v150_v18 = vld [vmem:[#allocation7 + $0x158] sm:$0xff]  ;;  %v6015_v31 = vld [vmem:[#allocation4 + $0x28] sm:$0xff] }
  0x6e   :  { %4161 = vmatpush1.bf16.msra.mxu0 %v5980_v41  ;;  %v154_v19 = vld [vmem:[#allocation7 + $0x178] sm:$0xff]  ;;  %v4116_v23 = vpack.c.bf16 %v145_v17, %v141_v16  ;;  %v149_v25 = vld [vmem:[#allocation7 + $0x150] sm:$0xff] }
  0x6f   :  { %4195 = vmatprep.subr.bf16.mxu0 %v5936_v9  ;;  %258 = vmatmul.mubr.f32.vlgmr.msra.gmra.mrb[0].mxu1 %v5983_v48  ;;  %v4118_v24 = vpack.c.bf16 %v154_v19, %v150_v18  ;;  %v153_v27 = vld [vmem:[#allocation7 + $0x170] sm:$0xff]  ;;  %v158_v28 = vld [vmem:[#allocation7 + $0x198] sm:$0xff] }
  0x70   :  { %4101 = vmatpush1.bf16.msra.mxu1 %v4100_v49  ;;  %263 = vmatprep.mubr.f32.mxu1 %v7002_v0  ;;  %v162_v30 = vld [vmem:[#allocation7 + $0x1b8] sm:$0xff]  ;;  %v4120_v32 = vpack.c.bf16 %v153_v27, %v149_v25  ;;  %v157_v36 = vld [vmem:[#allocation7 + $0x190] sm:$0xff] }
  0x71   :  { %584 = vmatmul.mubr.f32.vlgmr.msra.gmra.mrb[0].mxu0 %v7002_v0  ;;  %4103 = vmatprep.subr.bf16.mxu1 %v4102_v50  ;;  %v4122_v33 = vpack.c.bf16 %v162_v30, %v158_v28  ;;  %v161_v37 = vld [vmem:[#allocation7 + $0x1b0] sm:$0xff]  ;;  %v166_v38 = vld [vmem:[#allocation7 + $0x1d8] sm:$0xff] }
  0x72   :  { %4197 = vmatpush1.bf16.msra.mxu0 %v5938_v13  ;;  %759 = vmatprep.mubr.f32.mxu0 %v7002_v0  ;;  %v170_v40 = vld [vmem:[#allocation7 + $0x1f8] sm:$0xff]  ;;  %v6021_v42 = vld [vmem:[#allocation4 + $0x30] sm:$0xff]  ;;  %v4124_v43 = vpack.c.bf16 %v161_v37, %v157_v36 }
  0x73   :  { %264 = vmatmul.mubr.f32.gmra.mrb[2].mxu1 %v5989_v56  ;;  %4199 = vmatprep.subr.bf16.mxu0 %v5942_v22  ;;  %v4126_v45 = vpack.c.bf16 %v170_v40, %v166_v38  ;;  %v165_v46 = vld [vmem:[#allocation7 + $0x1d0] sm:$0xff]  ;;  %v454_v49 = vld [vmem:[#allocation9 + $0x18] sm:$0xff] }
  0x74   :  { %4105 = vmatpush1.bf16.msra.mxu1 %v4104_v58  ;;  %269 = vmatprep.mubr.f32.mxu1 %v7002_v0  ;;  %v169_v47 = vld [vmem:[#allocation7 + $0x1f0] sm:$0xff]  ;;  %v458_v50 = vld [vmem:[#allocation9 + $0x38] sm:$0xff] }
  0x75   :  { %4107 = vmatprep.subr.bf16.mxu1 %v4106_v59  ;;  %v6027_v51 = vld [vmem:[#allocation4 + $0x38] sm:$0xff]  ;;  %v4128_v53 = vpack.c.bf16 %v169_v47, %v165_v46  ;;  %v6029_v54 = vpack.c.bf16 %v458_v50, %v454_v49  ;;  %v453_v55 = vld [vmem:[#allocation9 + $0x10] sm:$0xff] }
  0x76   :  { %4201 = vmatpush1.bf16.msra.mxu0 %v5944_v26  ;;  %v457_v58 = vld [vmem:[#allocation9 + $0x30] sm:$0xff]  ;;  %v462_v59 = vld [vmem:[#allocation9 + $0x58] sm:$0xff] }
  0x77   :  { %270 = vmatmul.mubr.f32.gmra.mrb[4].mxu1 %v5997_v2  ;;  %4203 = vmatprep.subr.bf16.mxu0 %v5947_v35  ;;  %v466_v60 = vld [vmem:[#allocation9 + $0x78] sm:$0xff]  ;;  %v6035_v61 = vpack.c.bf16 %v457_v58, %v453_v55  ;;  %v461_v63 = vld [vmem:[#allocation9 + $0x50] sm:$0xff] }
  0x78   :  { %4109 = vmatpush1.bf16.msra.mxu1 %v4108_v3  ;;  %275 = vmatprep.mubr.f32.mxu1 %v7002_v0  ;;  %v6038_v62 = vpack.c.bf16 %v466_v60, %v462_v59  ;;  %v465_v3 = vld [vmem:[#allocation9 + $0x70] sm:$0xff]  ;;  %v474_v5 = vld [vmem:[#allocation9 + $0xb8] sm:$0xff]  ;;  %v171_v59 = vld [vmem:[%s6993_s3] sm:$0xf] }
  0x79   :  { %4111 = vmatprep.subr.bf16.mxu1 %v4110_v4  ;;  %v470_v4 = vld [vmem:[#allocation9 + $0x98] sm:$0xff]  ;;  %v6045_v7 = vpack.c.bf16 %v465_v3, %v461_v63  ;;  %v469_v10 = vld [vmem:[#allocation9 + $0x90] sm:$0xff] }
  0x7a   :  { %4205 = vmatpush1.bf16.msra.mxu0 %v5950_v39  ;;  %v6048_v8 = vpack.c.bf16 %v474_v5, %v470_v4  ;;  %v482_v16 = vld [vmem:[#allocation9 + $0xf8] sm:$0xff]  ;;  %v477_v18 = vld [vmem:[#allocation9 + $0xd0] sm:$0xff] }
  0x7b   :  { %276 = vmatmul.mubr.f32.gmra.mrb[6].mxu1 %v6003_v11  ;;  %4207 = vmatprep.subr.bf16.mxu0 %v5953_v44  ;;  %v481_v19 = vld [vmem:[#allocation9 + $0xf0] sm:$0xff]  ;;  %v494_v30 = vld [vmem:[#allocation9 + $0x158] sm:$0xff] }
  0x7c   :  { %4113 = vmatpush1.bf16.msra.mxu1 %v4112_v12  ;;  %281 = vmatprep.mubr.f32.mxu1 %v7002_v0  ;;  %v473_v12 = vld [vmem:[#allocation9 + $0xb0] sm:$0xff]  ;;  %v502_v38 = vld [vmem:[#allocation9 + $0x198] sm:$0xff] }
  0x7d   :  { %4115 = vmatprep.subr.bf16.mxu1 %v4114_v14  ;;  %v478_v14 = vld [vmem:[#allocation9 + $0xd8] sm:$0xff]  ;;  %v485_v27 = vld [vmem:[#allocation9 + $0x110] sm:$0xff] }
  0x7e   :  { %4209 = vmatpush1.bf16.msra.mxu0 %v5956_v52  ;;  %v6056_v17 = vpack.c.bf16 %v482_v16, %v478_v14  ;;  %v489_v28 = vld [vmem:[#allocation9 + $0x130] sm:$0xff]  ;;  %v506_v40 = vld [vmem:[#allocation9 + $0x1b8] sm:$0xff] }
  0x7f   :  { %282 = vmatmul.mubr.f32.gmra.mrb[8].mxu1 %v6009_v21  ;;  %4211 = vmatprep.subr.bf16.mxu0 %v5959_v57  ;;  %v493_v36 = vld [vmem:[#allocation9 + $0x150] sm:$0xff]  ;;  %v510_v47 = vld [vmem:[#allocation9 + $0x1d8] sm:$0xff] }
  0x80   :  { %4117 = vmatpush1.bf16.msra.mxu1 %v4116_v23  ;;  %287 = vmatprep.mubr.f32.mxu1 %v7002_v0  ;;  %v486_v23 = vld [vmem:[#allocation9 + $0x118] sm:$0xff]  ;;  %v497_v37 = vld [vmem:[#allocation9 + $0x170] sm:$0xff] }
  0x81   :  { %4119 = vmatprep.subr.bf16.mxu1 %v4118_v24  ;;  %v490_v24 = vld [vmem:[#allocation9 + $0x138] sm:$0xff]  ;;  %v505_v46 = vld [vmem:[#allocation9 + $0x1b0] sm:$0xff] }
  0x82   :  { %4213 = vmatpush1.bf16.msra.mxu0 %v5962_v1  ;;  %v6064_v25 = vpack.c.bf16 %v490_v24, %v486_v23  ;;  %v514_v49 = vld [vmem:[#allocation9 + $0x1f8] sm:$0xff]  ;;  %v513_v55 = vld [vmem:[#allocation9 + $0x1f0] sm:$0xff] }
  0x83   :  { %288 = vmatmul.mubr.f32.gmra.mrb[10].mxu1 %v6015_v31  ;;  %4215 = vmatprep.subr.bf16.mxu0 %v5965_v6  ;;  %v6088_v50 = vpack.c.bf16 %v514_v49, %v510_v47 }
  0x84   :  { %4121 = vmatpush1.bf16.msra.mxu1 %v4120_v32  ;;  %293 = vmatprep.mubr.f32.mxu1 %v7002_v0  ;;  %v498_v32 = vld [vmem:[#allocation9 + $0x178] sm:$0xff] }
  0x85   :  { %4123 = vmatprep.subr.bf16.mxu1 %v4122_v33  ;;  %v6072_v33 = vpack.c.bf16 %v498_v32, %v494_v30 }
  0x86   :  { %4217 = vmatpush1.bf16.msra.mxu0 %v5968_v15 }
  0x87   :  { %294 = vmatmul.mubr.f32.gmra.mrb[12].mxu1 %v6021_v42  ;;  %4219 = vmatprep.subr.bf16.mxu0 %v5971_v20 }
  0x88   :  { %4125 = vmatpush1.bf16.msra.mxu1 %v4124_v43  ;;  %299 = vmatprep.mubr.f32.mxu1 %v7002_v0  ;;  %v6080_v43 = vpack.c.bf16 %v506_v40, %v502_v38 }
  0x89   :  { %4127 = vmatprep.subr.bf16.mxu1 %v4126_v45  ;;  %v501_v45 = vld [vmem:[#allocation9 + $0x190] sm:$0xff] }
  0x8a   :  { %4221 = vmatpush1.bf16.msra.mxu0 %v5974_v29 }
  0x8b   :  { %300 = vmatmul.mubr.f32.gmra.mrb[14].mxu1 %v6027_v51  ;;  %4223 = vmatprep.subr.bf16.mxu0 %v5977_v34 }
  0x8c   :  { %4129 = vmatpush1.bf16.msra.mxu1 %v4128_v53  ;;  %370 = vmatprep.mubr.f32.mxu1 %v7002_v0  ;;  %v509_v53 = vld [vmem:[#allocation9 + $0x1d0] sm:$0xff] }
  0x8d   :  { %4163 = vmatprep.subr.bf16.mxu1 %v6029_v54  ;;  %v6093_v58 = vpack.c.bf16 %v513_v55, %v509_v53 }
  0x8e   :  { %4225 = vmatpush1.bf16.msra.mxu0 %v5980_v41 }
  0x8f   :  { %371 = vmatmul.mubr.f32.vlgmr.msra.gmra.mrb[16].mxu1 %v5983_v48  ;;  %4259 = vmatprep.subr.bf16.mxu0 %v5936_v9  ;;  %v6053_v48 = vpack.c.bf16 %v473_v12, %v469_v10 }
  0x90   :  { %4165 = vmatpush1.bf16.msra.mxu1 %v6035_v61  ;;  %376 = vmatprep.mubr.f32.mxu1 %v7002_v0 }
  0x91   :  { %4167 = vmatprep.subr.bf16.mxu1 %v6038_v62 }
  0x93   :  { %377 = vmatmul.mubr.f32.gmra.mrb[18].mxu1 %v5989_v56  ;;  %v6061_v56 = vpack.c.bf16 %v481_v19, %v477_v18 }
  0x94   :  { %4169 = vmatpush1.bf16.msra.mxu1 %v6045_v7  ;;  %382 = vmatprep.mubr.f32.mxu1 %v7002_v0 }
  0x95   :  { %4171 = vmatprep.subr.bf16.mxu1 %v6048_v8 }
  0x97   :  { %383 = vmatmul.mubr.f32.gmra.mrb[20].mxu1 %v5997_v2  ;;  %v6069_v2 = vpack.c.bf16 %v489_v28, %v485_v27 }
  0x98   :  { %4173 = vmatpush1.bf16.msra.mxu1 %v6053_v48  ;;  %388 = vmatprep.mubr.f32.mxu1 %v7002_v0 }
  0x99   :  { %4175 = vmatprep.subr.bf16.mxu1 %v6056_v17 }
  0x9b   :  { %389 = vmatmul.mubr.f32.gmra.mrb[22].mxu1 %v6003_v11  ;;  %v6077_v11 = vpack.c.bf16 %v497_v37, %v493_v36 }
  0x9c   :  { %4177 = vmatpush1.bf16.msra.mxu1 %v6061_v56  ;;  %394 = vmatprep.mubr.f32.mxu1 %v7002_v0 }
  0x9d   :  { %4179 = vmatprep.subr.bf16.mxu1 %v6064_v25 }
  0x9f   :  { %395 = vmatmul.mubr.f32.gmra.mrb[24].mxu1 %v6009_v21  ;;  %v6085_v21 = vpack.c.bf16 %v505_v46, %v501_v45 }
  0xa0   :  { %4181 = vmatpush1.bf16.msra.mxu1 %v6069_v2  ;;  %400 = vmatprep.mubr.f32.mxu1 %v7002_v0 }
  0xa1   :  { %4183 = vmatprep.subr.bf16.mxu1 %v6072_v33 }
  0xa3   :  { %401 = vmatmul.mubr.f32.gmra.mrb[26].mxu1 %v6015_v31  ;;  %v173_v31 = vlaneseq }
  0xa4   :  { %4185 = vmatpush1.bf16.msra.mxu1 %v6077_v11  ;;  %406 = vmatprep.mubr.f32.mxu1 %v7002_v0 }
  0xa5   :  { %4187 = vmatprep.subr.bf16.mxu1 %v6080_v43 }
  0xa7   :  { %407 = vmatmul.mubr.f32.gmra.mrb[28].mxu1 %v6021_v42  ;;  %v6118_v42 = vshrl.u32 %v173_v31, 7 }
  0xa8   :  { %4189 = vmatpush1.bf16.msra.mxu1 %v6085_v21  ;;  %412 = vmatprep.mubr.f32.mxu1 %v7002_v0 }
  0xa9   :  { %4191 = vmatprep.subr.bf16.mxu1 %v6088_v50  ;;  %7007 = vst [vmem:[#allocation21_spill] sm:$0xff] %v6118_v42  ;;  %v6999_v60 = vsub.s32 1, %v6118_v42 }
  0xab   :  { %413 = vmatmul.mubr.f32.gmra.mrb[30].mxu1 %v6027_v51  ;;  %v7001_v51 = vsub.s32 0, %v6118_v42  ;;  %v180_v3 = vrot.slane %v171_v59, %v6999_v60 }
  0xac   :  { %4193 = vmatpush1.bf16.msra.mxu1 %v6093_v58  ;;  %654 = vmatprep.mubr.f32.mxu1 %v7002_v0 }
  0xad   :  { %4227 = vmatprep.subr.bf16.mxu1 %v6029_v54  ;;  %v176_v63 = vrot.slane %v171_v59, %v7001_v51 }
  0xaf   :  { %655 = vmatmul.mubr.f32.vlgmr.msra.gmra.mrb[16].mxu1 %v7002_v0 }
  0xb0   :  { %4229 = vmatpush1.bf16.msra.mxu1 %v6035_v61  ;;  %830 = vmatprep.mubr.f32.mxu1 %v7002_v0 }
  0xb1   :  { %4231 = vmatprep.subr.bf16.mxu1 %v6038_v62 }
  0xb4   :  { %4233 = vmatpush1.bf16.msra.mxu1 %v6045_v7 }
  0xb5   :  { %4235 = vmatprep.subr.bf16.mxu1 %v6048_v8 }
  0xb8   :  { %4237 = vmatpush1.bf16.msra.mxu1 %v6053_v48 }
  0xb9   :  { %4239 = vmatprep.subr.bf16.mxu1 %v6056_v17 }
  0xbc   :  { %4241 = vmatpush1.bf16.msra.mxu1 %v6061_v56 }
  0xbd   :  { %4243 = vmatprep.subr.bf16.mxu1 %v6064_v25 }
  0xc0   :  { %4245 = vmatpush1.bf16.msra.mxu1 %v6069_v2 }
  0xc1   :  { %4247 = vmatprep.subr.bf16.mxu1 %v6072_v33 }
  0xc4   :  { %4249 = vmatpush1.bf16.msra.mxu1 %v6077_v11 }
  0xc5   :  { %4251 = vmatprep.subr.bf16.mxu1 %v6080_v43 }
  0xc8   :  { %4253 = vmatpush1.bf16.msra.mxu1 %v6085_v21 }
  0xc9   :  { %4255 = vmatprep.subr.bf16.mxu1 %v6088_v50 }
  0xcc   :  { %4257 = vmatpush1.bf16.msra.mxu1 %v6093_v58 }
  0xcd   :  { %4291 = vmatprep.subr.bf16.mxu1 %v6029_v54 }
 0x142   :  { %v259_v4 = vpop.f32.mrb[0].mxu1 }
 0x143   :  { %v260_v5 = vadd.f32 %v259_v4, %v176_v63  ;;  %v261_v10 = vpop.f32.mrb[1].mxu1 }
 0x144   :  { %v585_v12 = vpop.f32.mrb[0].mxu0  ;;  %v262_v14 = vadd.f32 %v261_v10, %v180_v3 }
 0x145   :  { %v587_v16 = vpop.f32.mrb[1].mxu0  ;;  %v661_v18 = vadd.f32 %v585_v12, %v260_v5 }
 0x146   :  { %v662_v19 = vadd.f32 %v587_v16, %v262_v14  ;;  %v265_v23 = vpop.f32.mrb[2].mxu1 }
 0x147   :  { %v6129_v24 = vadd.f32 %v265_v23, %v176_v63  ;;  %v267_v27 = vpop.f32.mrb[3].mxu1 }
 0x148   :  { %v6131_v28 = vadd.f32 %v267_v27, %v180_v3 }
 0x14a   :  { %v271_v30 = vpop.f32.mrb[4].mxu1 }
 0x14b   :  { %v6133_v32 = vadd.f32 %v271_v30, %v176_v63  ;;  %v273_v36 = vpop.f32.mrb[5].mxu1 }
 0x14c   :  { %v6135_v37 = vadd.f32 %v273_v36, %v180_v3 }
 0x14e   :  { %v277_v38 = vpop.f32.mrb[6].mxu1 }
 0x14f   :  { %v6137_v40 = vadd.f32 %v277_v38, %v176_v63  ;;  %v279_v45 = vpop.f32.mrb[7].mxu1 }
 0x150   :  { %v6139_v46 = vadd.f32 %v279_v45, %v180_v3  ;;  %v3949_v45 = vmul.f32 -1.442695, %v662_v19 }
 0x152   :  { %v283_v47 = vpop.f32.mrb[8].mxu1  ;;  %5390 = vpow2.f32 %v3949_v45 }
 0x153   :  { %v6141_v49 = vadd.f32 %v283_v47, %v176_v63  ;;  %v285_v53 = vpop.f32.mrb[9].mxu1  ;;  %v3948_v47 = vmul.f32 -1.442695, %v661_v18 }
 0x154   :  { %v6143_v55 = vadd.f32 %v285_v53, %v180_v3  ;;  %v7000_v53 = vsub.s32 2, %v6118_v42 }
 0x155   :  { %5392 = vpow2.f32 %v3948_v47 }
 0x156   :  { %v289_v31 = vpop.f32.mrb[10].mxu1 }
 0x157   :  { %v6145_v4 = vadd.f32 %v289_v31, %v176_v63  ;;  %v291_v5 = vpop.f32.mrb[11].mxu1 }
 0x158   :  { %v6147_v10 = vadd.f32 %v291_v5, %v180_v3  ;;  %v7006_v5 = vsub.s32 3, %v6118_v42 }
 0x15a   :  { %v295_v12 = vpop.f32.mrb[12].mxu1 }
 0x15b   :  { %v6149_v14 = vadd.f32 %v295_v12, %v176_v63  ;;  %v297_v16 = vpop.f32.mrb[13].mxu1 }
 0x15c   :  { %v6151_v23 = vadd.f32 %v297_v16, %v180_v3  ;;  %v5391_v31 = vpop.eup %5390  ;;  %v6161_v16 = vrot.slane %v171_v59, %v7000_v53 }
 0x15d   :  { %v674_v60 = vadd.f32 1.0, %v5391_v31 }
 0x15e   :  { %v301_v27 = vpop.f32.mrb[14].mxu1 }
 0x15f   :  { %v6153_v30 = vadd.f32 %v301_v27, %v176_v63  ;;  %v303_v36 = vpop.f32.mrb[15].mxu1  ;;  %v5393_v12 = vpop.eup %5392  ;;  %5394 = vrcp.f32 %v674_v60 }
 0x160   :  { %v6155_v38 = vadd.f32 %v303_v36, %v180_v3  ;;  %v668_v63 = vadd.f32 1.0, %v5393_v12  ;;  %v6165_v3 = vrot.slane %v171_v59, %v7006_v5 }
 0x161   :  { %7008 = vst [vmem:[#allocation22_spill] sm:$0xff] %v6153_v30 }
 0x162   :  { %7009 = vst [vmem:[#allocation23_spill] sm:$0xff] %v6155_v38  ;;  %5396 = vrcp.f32 %v668_v63 }
 0x169   :  { %v5395_v47 = vpop.eup %5394 }
 0x16a   :  { %v684_v51 = vmul.f32 0.0, %v5395_v47 }
 0x16c   :  { %v5397_v31 = vpop.eup %5396 }
 0x182   :  { %v656_v19 = vpop.f32.mrb[16].mxu1 }
 0x183   :  { %v5282_v18 = vadd.f32 %v656_v19, %v6161_v16  ;;  %v658_v27 = vpop.f32.mrb[17].mxu1 }
 0x184   :  { %v5283_v36 = vadd.f32 %v658_v27, %v6165_v3 }
 0x185   :  { %5398 = vtanh.f32 %v5282_v18 }
 0x186   :  { %v3950_v45 = vmul.f32 -1.442695, %v5283_v36 }
 0x188   :  { %5400 = vpow2.f32 %v3950_v45 }
 0x18f   :  { %v5399_v53 = vpop.eup %5398 }
 0x190   :  { %v685_v12 = vmul.f32 %v5399_v53, %v5397_v31 }
 0x192   :  { %v5401_v0 = vpop.eup %5400  ;;  %v6169_v42 = vadd.f32 %v685_v12, %v684_v51 }
 0x193   :  { %v681_v59 = vadd.f32 1.0, %v5401_v0  ;;  %v7010_v0 = vmov 0.0  }
 0x194   :  { %5402 = vtanh.f32 %v6169_v42 }
 0x195   :  { %5404 = vrcp.f32 %v681_v59 }
 0x19e   :  { %v5403_v60 = vpop.eup %5402 }
 0x19f   :  { %v5405_v19 = vpop.eup %5404 }
 0x1a0   :  { %v6172_v63 = vmul.f32 %v5405_v19, %v5403_v60 }
 0x1a2   :  { %760 = vmatmul.mubr.f32.vlgmr.msra.gmra.mrb[2].mxu0 %v6172_v63  ;;  %831 = vmatmul.mubr.f32.vlgmr.msra.gmra.mrb[18].mxu1 %v6172_v63 }
 0x1a3   :  { %4261 = vmatpush1.bf16.msra.mxu0 %v5938_v13  ;;  %4293 = vmatpush1.bf16.msra.mxu1 %v6035_v61 }
 0x1a4   :  { %4263 = vmatprep.subr.bf16.mxu0 %v5942_v22  ;;  %4295 = vmatprep.subr.bf16.mxu1 %v6038_v62 }
 0x1a5   :  { %936 = vmatprep.mubr.f32.mxu0 %v7010_v0  ;;  %1007 = vmatprep.mubr.f32.mxu1 %v7010_v0 }
 0x1a7   :  { %4265 = vmatpush1.bf16.msra.mxu0 %v5944_v26  ;;  %4297 = vmatpush1.bf16.msra.mxu1 %v6045_v7 }
 0x1a8   :  { %4267 = vmatprep.subr.bf16.mxu0 %v5947_v35  ;;  %4299 = vmatprep.subr.bf16.mxu1 %v6048_v8 }
 0x1ab   :  { %4269 = vmatpush1.bf16.msra.mxu0 %v5950_v39  ;;  %4301 = vmatpush1.bf16.msra.mxu1 %v6053_v48 }
 0x1ac   :  { %4271 = vmatprep.subr.bf16.mxu0 %v5953_v44  ;;  %4303 = vmatprep.subr.bf16.mxu1 %v6056_v17 }
 0x1af   :  { %4273 = vmatpush1.bf16.msra.mxu0 %v5956_v52  ;;  %4305 = vmatpush1.bf16.msra.mxu1 %v6061_v56 }
 0x1b0   :  { %4275 = vmatprep.subr.bf16.mxu0 %v5959_v57  ;;  %4307 = vmatprep.subr.bf16.mxu1 %v6064_v25 }
 0x1b3   :  { %4277 = vmatpush1.bf16.msra.mxu0 %v5962_v1  ;;  %4309 = vmatpush1.bf16.msra.mxu1 %v6069_v2 }
 0x1b4   :  { %4279 = vmatprep.subr.bf16.mxu0 %v5965_v6  ;;  %4311 = vmatprep.subr.bf16.mxu1 %v6072_v33 }
 0x1b7   :  { %4281 = vmatpush1.bf16.msra.mxu0 %v5968_v15  ;;  %4313 = vmatpush1.bf16.msra.mxu1 %v6077_v11 }
 0x1b8   :  { %4283 = vmatprep.subr.bf16.mxu0 %v5971_v20  ;;  %4315 = vmatprep.subr.bf16.mxu1 %v6080_v43 }
 0x1bb   :  { %4285 = vmatpush1.bf16.msra.mxu0 %v5974_v29  ;;  %4317 = vmatpush1.bf16.msra.mxu1 %v6085_v21 }
 0x1bc   :  { %4287 = vmatprep.subr.bf16.mxu0 %v5977_v34  ;;  %4319 = vmatprep.subr.bf16.mxu1 %v6088_v50 }
 0x1bf   :  { %4289 = vmatpush1.bf16.msra.mxu0 %v5980_v41  ;;  %4321 = vmatpush1.bf16.msra.mxu1 %v6093_v58 }
 0x1c0   :  { %4323 = vmatprep.subr.bf16.mxu0 %v5936_v9  ;;  %4355 = vmatprep.subr.bf16.mxu1 %v6029_v54 }
 0x275   :  { %v761_v51 = vpop.f32.mrb[2].mxu0  ;;  %v832_v53 = vpop.f32.mrb[18].mxu1 }
 0x276   :  { %v837_v18 = vadd.f32 %v761_v51, %v6129_v24  ;;  %v763_v27 = vpop.f32.mrb[3].mxu0  ;;  %v834_v36 = vpop.f32.mrb[19].mxu1  ;;  %v5284_v60 = vadd.f32 %v832_v53, %v6161_v16 }
 0x277   :  { %v838_v45 = vadd.f32 %v763_v27, %v6131_v28  ;;  %v5285_v12 = vadd.f32 %v834_v36, %v6165_v3 }
 0x278   :  { %v3951_v47 = vmul.f32 -1.442695, %v837_v18 }
 0x279   :  { %v3952_v31 = vmul.f32 -1.442695, %v838_v45  ;;  %v3953_v59 = vmul.f32 -1.442695, %v5285_v12 }
 0x27a   :  { %5406 = vpow2.f32 %v3951_v47 }
 0x27b   :  { %5408 = vpow2.f32 %v3952_v31 }
 0x27c   :  { %5410 = vpow2.f32 %v3953_v59 }
 0x27d   :  { %5412 = vtanh.f32 %v5284_v60 }
 0x284   :  { %v5407_v19 = vpop.eup %5406 }
 0x285   :  { %v5409_v5 = vpop.eup %5408  ;;  %v844_v38 = vadd.f32 1.0, %v5407_v19 }
 0x286   :  { %v850_v30 = vadd.f32 1.0, %v5409_v5  ;;  %v5411_v24 = vpop.eup %5410 }
 0x287   :  { %5414 = vrcp.f32 %v844_v38  ;;  %v5413_v51 = vpop.eup %5412  ;;  %v857_v45 = vadd.f32 1.0, %v5411_v24 }
 0x288   :  { %5416 = vrcp.f32 %v850_v30 }
 0x289   :  { %5418 = vrcp.f32 %v857_v45 }
 0x291   :  { %v5415_v28 = vpop.eup %5414 }
 0x292   :  { %v5417_v18 = vpop.eup %5416  ;;  %v861_v27 = vmul.f32 %v5415_v28, %v5413_v51 }
 0x293   :  { %v860_v47 = vmul.f32 %v5417_v18, %v6169_v42  ;;  %v5419_v53 = vpop.eup %5418 }
 0x295   :  { %v6215_v36 = vadd.f32 %v861_v27, %v860_v47 }
 0x297   :  { %5420 = vtanh.f32 %v6215_v36 }
 0x2a1   :  { %v5421_v31 = vpop.eup %5420 }
 0x2a2   :  { %v6218_v12 = vmul.f32 %v5421_v31, %v5419_v53 }
 0x2a4   :  { %937 = vmatmul.mubr.f32.vlgmr.msra.gmra.mrb[4].mxu0 %v6218_v12  ;;  %1008 = vmatmul.mubr.f32.vlgmr.msra.gmra.mrb[20].mxu1 %v6218_v12 }
 0x2a5   :  { %4325 = vmatpush1.bf16.msra.mxu0 %v5938_v13  ;;  %4357 = vmatpush1.bf16.msra.mxu1 %v6035_v61 }
 0x2a6   :  { %4327 = vmatprep.subr.bf16.mxu0 %v5942_v22  ;;  %4359 = vmatprep.subr.bf16.mxu1 %v6038_v62 }
 0x2a7   :  { %1113 = vmatprep.mubr.f32.mxu0 %v7010_v0  ;;  %1184 = vmatprep.mubr.f32.mxu1 %v7010_v0 }
 0x2a9   :  { %4329 = vmatpush1.bf16.msra.mxu0 %v5944_v26  ;;  %4361 = vmatpush1.bf16.msra.mxu1 %v6045_v7 }
 0x2aa   :  { %4331 = vmatprep.subr.bf16.mxu0 %v5947_v35  ;;  %4363 = vmatprep.subr.bf16.mxu1 %v6048_v8 }
 0x2ad   :  { %4333 = vmatpush1.bf16.msra.mxu0 %v5950_v39  ;;  %4365 = vmatpush1.bf16.msra.mxu1 %v6053_v48 }
 0x2ae   :  { %4335 = vmatprep.subr.bf16.mxu0 %v5953_v44  ;;  %4367 = vmatprep.subr.bf16.mxu1 %v6056_v17 }
 0x2b1   :  { %4337 = vmatpush1.bf16.msra.mxu0 %v5956_v52  ;;  %4369 = vmatpush1.bf16.msra.mxu1 %v6061_v56 }
 0x2b2   :  { %4339 = vmatprep.subr.bf16.mxu0 %v5959_v57  ;;  %4371 = vmatprep.subr.bf16.mxu1 %v6064_v25 }
 0x2b5   :  { %4341 = vmatpush1.bf16.msra.mxu0 %v5962_v1  ;;  %4373 = vmatpush1.bf16.msra.mxu1 %v6069_v2 }
 0x2b6   :  { %4343 = vmatprep.subr.bf16.mxu0 %v5965_v6  ;;  %4375 = vmatprep.subr.bf16.mxu1 %v6072_v33 }
 0x2b9   :  { %4345 = vmatpush1.bf16.msra.mxu0 %v5968_v15  ;;  %4377 = vmatpush1.bf16.msra.mxu1 %v6077_v11 }
 0x2ba   :  { %4347 = vmatprep.subr.bf16.mxu0 %v5971_v20  ;;  %4379 = vmatprep.subr.bf16.mxu1 %v6080_v43 }
 0x2bd   :  { %4349 = vmatpush1.bf16.msra.mxu0 %v5974_v29  ;;  %4381 = vmatpush1.bf16.msra.mxu1 %v6085_v21 }
 0x2be   :  { %4351 = vmatprep.subr.bf16.mxu0 %v5977_v34  ;;  %4383 = vmatprep.subr.bf16.mxu1 %v6088_v50 }
 0x2c1   :  { %4353 = vmatpush1.bf16.msra.mxu0 %v5980_v41  ;;  %4385 = vmatpush1.bf16.msra.mxu1 %v6093_v58 }
 0x2c2   :  { %4387 = vmatprep.subr.bf16.mxu0 %v5936_v9  ;;  %4419 = vmatprep.subr.bf16.mxu1 %v6029_v54 }
 0x377   :  { %v938_v42 = vpop.f32.mrb[4].mxu0  ;;  %v1009_v30 = vpop.f32.mrb[20].mxu1 }
 0x378   :  { %v1014_v38 = vadd.f32 %v938_v42, %v6133_v32  ;;  %v940_v5 = vpop.f32.mrb[5].mxu0  ;;  %v1011_v59 = vpop.f32.mrb[21].mxu1  ;;  %v5286_v18 = vadd.f32 %v1009_v30, %v6161_v16 }
 0x379   :  { %v1015_v60 = vadd.f32 %v940_v5, %v6135_v37  ;;  %v5287_v51 = vadd.f32 %v1011_v59, %v6165_v3 }
 0x37a   :  { %v3954_v19 = vmul.f32 -1.442695, %v1014_v38 }
 0x37b   :  { %v3955_v24 = vmul.f32 -1.442695, %v1015_v60  ;;  %v3956_v28 = vmul.f32 -1.442695, %v5287_v51 }
 0x37c   :  { %5422 = vpow2.f32 %v3954_v19 }
 0x37d   :  { %5424 = vpow2.f32 %v3955_v24 }
 0x37e   :  { %5426 = vpow2.f32 %v3956_v28 }
 0x37f   :  { %5428 = vtanh.f32 %v5286_v18 }
 0x386   :  { %v5423_v27 = vpop.eup %5422 }
 0x387   :  { %v5425_v45 = vpop.eup %5424  ;;  %v1021_v47 = vadd.f32 1.0, %v5423_v27 }
 0x388   :  { %v1027_v53 = vadd.f32 1.0, %v5425_v45  ;;  %v5427_v32 = vpop.eup %5426 }
 0x389   :  { %5430 = vrcp.f32 %v1021_v47  ;;  %v5429_v31 = vpop.eup %5428  ;;  %v1034_v5 = vadd.f32 1.0, %v5427_v32 }
 0x38a   :  { %5432 = vrcp.f32 %v1027_v53 }
 0x38b   :  { %5434 = vrcp.f32 %v1034_v5 }
 0x393   :  { %v5431_v37 = vpop.eup %5430 }
 0x394   :  { %v5433_v42 = vpop.eup %5432  ;;  %v1038_v38 = vmul.f32 %v5431_v37, %v5429_v31 }
 0x395   :  { %v1037_v60 = vmul.f32 %v5433_v42, %v6215_v36  ;;  %v5435_v30 = vpop.eup %5434 }
 0x397   :  { %v6261_v59 = vadd.f32 %v1038_v38, %v1037_v60 }
 0x399   :  { %5436 = vtanh.f32 %v6261_v59 }
 0x3a3   :  { %v5437_v19 = vpop.eup %5436 }
 0x3a4   :  { %v6264_v24 = vmul.f32 %v5437_v19, %v5435_v30 }
 0x3a6   :  { %1114 = vmatmul.mubr.f32.vlgmr.msra.gmra.mrb[6].mxu0 %v6264_v24  ;;  %1185 = vmatmul.mubr.f32.vlgmr.msra.gmra.mrb[22].mxu1 %v6264_v24 }
 0x3a7   :  { %4389 = vmatpush1.bf16.msra.mxu0 %v5938_v13  ;;  %4421 = vmatpush1.bf16.msra.mxu1 %v6035_v61 }
 0x3a8   :  { %4391 = vmatprep.subr.bf16.mxu0 %v5942_v22  ;;  %4423 = vmatprep.subr.bf16.mxu1 %v6038_v62 }
 0x3a9   :  { %1290 = vmatprep.mubr.f32.mxu0 %v7010_v0  ;;  %1361 = vmatprep.mubr.f32.mxu1 %v7010_v0 }
 0x3ab   :  { %4393 = vmatpush1.bf16.msra.mxu0 %v5944_v26  ;;  %4425 = vmatpush1.bf16.msra.mxu1 %v6045_v7 }
 0x3ac   :  { %4395 = vmatprep.subr.bf16.mxu0 %v5947_v35  ;;  %4427 = vmatprep.subr.bf16.mxu1 %v6048_v8 }
 0x3af   :  { %4397 = vmatpush1.bf16.msra.mxu0 %v5950_v39  ;;  %4429 = vmatpush1.bf16.msra.mxu1 %v6053_v48 }
 0x3b0   :  { %4399 = vmatprep.subr.bf16.mxu0 %v5953_v44  ;;  %4431 = vmatprep.subr.bf16.mxu1 %v6056_v17 }
 0x3b3   :  { %4401 = vmatpush1.bf16.msra.mxu0 %v5956_v52  ;;  %4433 = vmatpush1.bf16.msra.mxu1 %v6061_v56 }
 0x3b4   :  { %4403 = vmatprep.subr.bf16.mxu0 %v5959_v57  ;;  %4435 = vmatprep.subr.bf16.mxu1 %v6064_v25 }
 0x3b7   :  { %4405 = vmatpush1.bf16.msra.mxu0 %v5962_v1  ;;  %4437 = vmatpush1.bf16.msra.mxu1 %v6069_v2 }
 0x3b8   :  { %4407 = vmatprep.subr.bf16.mxu0 %v5965_v6  ;;  %4439 = vmatprep.subr.bf16.mxu1 %v6072_v33 }
 0x3bb   :  { %4409 = vmatpush1.bf16.msra.mxu0 %v5968_v15  ;;  %4441 = vmatpush1.bf16.msra.mxu1 %v6077_v11 }
 0x3bc   :  { %4411 = vmatprep.subr.bf16.mxu0 %v5971_v20  ;;  %4443 = vmatprep.subr.bf16.mxu1 %v6080_v43 }
 0x3bf   :  { %4413 = vmatpush1.bf16.msra.mxu0 %v5974_v29  ;;  %4445 = vmatpush1.bf16.msra.mxu1 %v6085_v21 }
 0x3c0   :  { %4415 = vmatprep.subr.bf16.mxu0 %v5977_v34  ;;  %4447 = vmatprep.subr.bf16.mxu1 %v6088_v50 }
 0x3c3   :  { %4417 = vmatpush1.bf16.msra.mxu0 %v5980_v41  ;;  %4449 = vmatpush1.bf16.msra.mxu1 %v6093_v58 }
 0x3c4   :  { %4451 = vmatprep.subr.bf16.mxu0 %v5936_v9  ;;  %4483 = vmatprep.subr.bf16.mxu1 %v6029_v54 }
 0x479   :  { %v1115_v36 = vpop.f32.mrb[6].mxu0  ;;  %v1186_v51 = vpop.f32.mrb[22].mxu1 }
 0x47a   :  { %v1191_v28 = vadd.f32 %v1115_v36, %v6137_v40  ;;  %v1117_v18 = vpop.f32.mrb[7].mxu0  ;;  %v1188_v27 = vpop.f32.mrb[23].mxu1  ;;  %v5288_v37 = vadd.f32 %v1186_v51, %v6161_v16 }
 0x47b   :  { %v1192_v45 = vadd.f32 %v1117_v18, %v6139_v46  ;;  %v5289_v32 = vadd.f32 %v1188_v27, %v6165_v3 }
 0x47c   :  { %v3957_v47 = vmul.f32 -1.442695, %v1191_v28 }
 0x47d   :  { %v3958_v53 = vmul.f32 -1.442695, %v1192_v45  ;;  %v3959_v31 = vmul.f32 -1.442695, %v5289_v32 }
 0x47e   :  { %5438 = vpow2.f32 %v3957_v47 }
 0x47f   :  { %5440 = vpow2.f32 %v3958_v53 }
 0x480   :  { %5442 = vpow2.f32 %v3959_v31 }
 0x481   :  { %5444 = vtanh.f32 %v5288_v37 }
 0x488   :  { %v5439_v42 = vpop.eup %5438 }
 0x489   :  { %v5441_v38 = vpop.eup %5440  ;;  %v1198_v5 = vadd.f32 1.0, %v5439_v42 }
 0x48a   :  { %v1204_v60 = vadd.f32 1.0, %v5441_v38  ;;  %v5443_v40 = vpop.eup %5442 }
 0x48b   :  { %5446 = vrcp.f32 %v1198_v5  ;;  %v5445_v30 = vpop.eup %5444  ;;  %v1211_v28 = vadd.f32 1.0, %v5443_v40 }
 0x48c   :  { %5448 = vrcp.f32 %v1204_v60 }
 0x48d   :  { %5450 = vrcp.f32 %v1211_v28 }
 0x495   :  { %v5447_v46 = vpop.eup %5446 }
 0x496   :  { %v5449_v19 = vpop.eup %5448  ;;  %v1215_v36 = vmul.f32 %v5447_v46, %v5445_v30 }
 0x497   :  { %v1214_v18 = vmul.f32 %v5449_v19, %v6261_v59  ;;  %v5451_v51 = vpop.eup %5450 }
 0x499   :  { %v6307_v27 = vadd.f32 %v1215_v36, %v1214_v18 }
 0x49b   :  { %5452 = vtanh.f32 %v6307_v27 }
 0x4a5   :  { %v5453_v45 = vpop.eup %5452 }
 0x4a6   :  { %v6310_v47 = vmul.f32 %v5453_v45, %v5451_v51 }
 0x4a8   :  { %1291 = vmatmul.mubr.f32.vlgmr.msra.gmra.mrb[8].mxu0 %v6310_v47  ;;  %1362 = vmatmul.mubr.f32.vlgmr.msra.gmra.mrb[24].mxu1 %v6310_v47 }
 0x4a9   :  { %4453 = vmatpush1.bf16.msra.mxu0 %v5938_v13  ;;  %4485 = vmatpush1.bf16.msra.mxu1 %v6035_v61 }
 0x4aa   :  { %4455 = vmatprep.subr.bf16.mxu0 %v5942_v22  ;;  %4487 = vmatprep.subr.bf16.mxu1 %v6038_v62 }
 0x4ab   :  { %1467 = vmatprep.mubr.f32.mxu0 %v7010_v0  ;;  %1538 = vmatprep.mubr.f32.mxu1 %v7010_v0 }
 0x4ad   :  { %4457 = vmatpush1.bf16.msra.mxu0 %v5944_v26  ;;  %4489 = vmatpush1.bf16.msra.mxu1 %v6045_v7 }
 0x4ae   :  { %4459 = vmatprep.subr.bf16.mxu0 %v5947_v35  ;;  %4491 = vmatprep.subr.bf16.mxu1 %v6048_v8 }
 0x4b1   :  { %4461 = vmatpush1.bf16.msra.mxu0 %v5950_v39  ;;  %4493 = vmatpush1.bf16.msra.mxu1 %v6053_v48 }
 0x4b2   :  { %4463 = vmatprep.subr.bf16.mxu0 %v5953_v44  ;;  %4495 = vmatprep.subr.bf16.mxu1 %v6056_v17 }
 0x4b5   :  { %4465 = vmatpush1.bf16.msra.mxu0 %v5956_v52  ;;  %4497 = vmatpush1.bf16.msra.mxu1 %v6061_v56 }
 0x4b6   :  { %4467 = vmatprep.subr.bf16.mxu0 %v5959_v57  ;;  %4499 = vmatprep.subr.bf16.mxu1 %v6064_v25 }
 0x4b9   :  { %4469 = vmatpush1.bf16.msra.mxu0 %v5962_v1  ;;  %4501 = vmatpush1.bf16.msra.mxu1 %v6069_v2 }
 0x4ba   :  { %4471 = vmatprep.subr.bf16.mxu0 %v5965_v6  ;;  %4503 = vmatprep.subr.bf16.mxu1 %v6072_v33 }
 0x4bd   :  { %4473 = vmatpush1.bf16.msra.mxu0 %v5968_v15  ;;  %4505 = vmatpush1.bf16.msra.mxu1 %v6077_v11 }
 0x4be   :  { %4475 = vmatprep.subr.bf16.mxu0 %v5971_v20  ;;  %4507 = vmatprep.subr.bf16.mxu1 %v6080_v43 }
 0x4c1   :  { %4477 = vmatpush1.bf16.msra.mxu0 %v5974_v29  ;;  %4509 = vmatpush1.bf16.msra.mxu1 %v6085_v21 }
 0x4c2   :  { %4479 = vmatprep.subr.bf16.mxu0 %v5977_v34  ;;  %4511 = vmatprep.subr.bf16.mxu1 %v6088_v50 }
 0x4c5   :  { %4481 = vmatpush1.bf16.msra.mxu0 %v5980_v41  ;;  %4513 = vmatpush1.bf16.msra.mxu1 %v6093_v58 }
 0x4c6   :  { %4515 = vmatprep.subr.bf16.mxu0 %v5936_v9  ;;  %4547 = vmatprep.subr.bf16.mxu1 %v6029_v54 }
 0x57b   :  { %v1292_v59 = vpop.f32.mrb[8].mxu0  ;;  %v1363_v53 = vpop.f32.mrb[24].mxu1 }
 0x57c   :  { %v1368_v32 = vadd.f32 %v1292_v59, %v6141_v49  ;;  %v1294_v31 = vpop.f32.mrb[9].mxu0  ;;  %v1365_v37 = vpop.f32.mrb[25].mxu1  ;;  %v5290_v30 = vadd.f32 %v1363_v53, %v6161_v16 }
 0x57d   :  { %v1369_v42 = vadd.f32 %v1294_v31, %v6143_v55  ;;  %v5291_v60 = vadd.f32 %v1365_v37, %v6165_v3 }
 0x57e   :  { %v3960_v38 = vmul.f32 -1.442695, %v1368_v32 }
 0x57f   :  { %v3961_v5 = vmul.f32 -1.442695, %v1369_v42  ;;  %v3962_v40 = vmul.f32 -1.442695, %v5291_v60 }
 0x580   :  { %5454 = vpow2.f32 %v3960_v38 }
 0x581   :  { %5456 = vpow2.f32 %v3961_v5 }
 0x582   :  { %5458 = vpow2.f32 %v3962_v40 }
 0x583   :  { %5460 = vtanh.f32 %v5290_v30 }
 0x58a   :  { %v5455_v46 = vpop.eup %5454 }
 0x58b   :  { %v5457_v19 = vpop.eup %5456  ;;  %v1375_v36 = vadd.f32 1.0, %v5455_v46 }
 0x58c   :  { %v1381_v28 = vadd.f32 1.0, %v5457_v19  ;;  %v5459_v49 = vpop.eup %5458 }
 0x58d   :  { %5462 = vrcp.f32 %v1375_v36  ;;  %v5461_v18 = vpop.eup %5460  ;;  %v1388_v59 = vadd.f32 1.0, %v5459_v49 }
 0x58e   :  { %5464 = vrcp.f32 %v1381_v28 }
 0x58f   :  { %5466 = vrcp.f32 %v1388_v59 }
 0x597   :  { %v5463_v55 = vpop.eup %5462 }
 0x598   :  { %v5465_v51 = vpop.eup %5464  ;;  %v1392_v45 = vmul.f32 %v5463_v55, %v5461_v18 }
 0x599   :  { %v1391_v32 = vmul.f32 %v5465_v51, %v6307_v27  ;;  %v5467_v53 = vpop.eup %5466 }
 0x59b   :  { %v6353_v31 = vadd.f32 %v1392_v45, %v1391_v32 }
 0x59d   :  { %5468 = vtanh.f32 %v6353_v31 }
 0x5a7   :  { %v5469_v37 = vpop.eup %5468 }
 0x5a8   :  { %v6356_v42 = vmul.f32 %v5469_v37, %v5467_v53 }
 0x5aa   :  { %1468 = vmatmul.mubr.f32.vlgmr.msra.gmra.mrb[10].mxu0 %v6356_v42  ;;  %1539 = vmatmul.mubr.f32.vlgmr.msra.gmra.mrb[26].mxu1 %v6356_v42 }
 0x5ab   :  { %4517 = vmatpush1.bf16.msra.mxu0 %v5938_v13  ;;  %4549 = vmatpush1.bf16.msra.mxu1 %v6035_v61 }
 0x5ac   :  { %4519 = vmatprep.subr.bf16.mxu0 %v5942_v22  ;;  %4551 = vmatprep.subr.bf16.mxu1 %v6038_v62 }
 0x5ad   :  { %1644 = vmatprep.mubr.f32.mxu0 %v7010_v0  ;;  %1715 = vmatprep.mubr.f32.mxu1 %v7010_v0 }
 0x5af   :  { %4521 = vmatpush1.bf16.msra.mxu0 %v5944_v26  ;;  %4553 = vmatpush1.bf16.msra.mxu1 %v6045_v7 }
 0x5b0   :  { %4523 = vmatprep.subr.bf16.mxu0 %v5947_v35  ;;  %4555 = vmatprep.subr.bf16.mxu1 %v6048_v8 }
 0x5b3   :  { %4525 = vmatpush1.bf16.msra.mxu0 %v5950_v39  ;;  %4557 = vmatpush1.bf16.msra.mxu1 %v6053_v48 }
 0x5b4   :  { %4527 = vmatprep.subr.bf16.mxu0 %v5953_v44  ;;  %4559 = vmatprep.subr.bf16.mxu1 %v6056_v17 }
 0x5b7   :  { %4529 = vmatpush1.bf16.msra.mxu0 %v5956_v52  ;;  %4561 = vmatpush1.bf16.msra.mxu1 %v6061_v56 }
 0x5b8   :  { %4531 = vmatprep.subr.bf16.mxu0 %v5959_v57  ;;  %4563 = vmatprep.subr.bf16.mxu1 %v6064_v25 }
 0x5bb   :  { %4533 = vmatpush1.bf16.msra.mxu0 %v5962_v1  ;;  %4565 = vmatpush1.bf16.msra.mxu1 %v6069_v2 }
 0x5bc   :  { %4535 = vmatprep.subr.bf16.mxu0 %v5965_v6  ;;  %4567 = vmatprep.subr.bf16.mxu1 %v6072_v33 }
 0x5bf   :  { %4537 = vmatpush1.bf16.msra.mxu0 %v5968_v15  ;;  %4569 = vmatpush1.bf16.msra.mxu1 %v6077_v11 }
 0x5c0   :  { %4539 = vmatprep.subr.bf16.mxu0 %v5971_v20  ;;  %4571 = vmatprep.subr.bf16.mxu1 %v6080_v43 }
 0x5c3   :  { %4541 = vmatpush1.bf16.msra.mxu0 %v5974_v29  ;;  %4573 = vmatpush1.bf16.msra.mxu1 %v6085_v21 }
 0x5c4   :  { %4543 = vmatprep.subr.bf16.mxu0 %v5977_v34  ;;  %4575 = vmatprep.subr.bf16.mxu1 %v6088_v50 }
 0x5c7   :  { %4545 = vmatpush1.bf16.msra.mxu0 %v5980_v41  ;;  %4577 = vmatpush1.bf16.msra.mxu1 %v6093_v58 }
 0x5c8   :  { %4579 = vmatprep.subr.bf16.mxu0 %v5936_v9  ;;  %4611 = vmatprep.subr.bf16.mxu1 %v6029_v54 }
 0x67d   :  { %v1469_v27 = vpop.f32.mrb[10].mxu0  ;;  %v1540_v38 = vpop.f32.mrb[26].mxu1 }
 0x67e   :  { %v1545_v5 = vadd.f32 %v1469_v27, %v6145_v4  ;;  %v1471_v60 = vpop.f32.mrb[11].mxu0  ;;  %v1542_v40 = vpop.f32.mrb[27].mxu1  ;;  %v5292_v49 = vadd.f32 %v1540_v38, %v6161_v16 }
 0x67f   :  { %v1546_v30 = vadd.f32 %v1471_v60, %v6147_v10  ;;  %v5293_v36 = vadd.f32 %v1542_v40, %v6165_v3  ;;  %v1949_v60 = vld [vmem:[#allocation7 + $0x248] sm:$0xff] }
 0x680   :  { %v3963_v46 = vmul.f32 -1.442695, %v1545_v5  ;;  %v1953_v40 = vld [vmem:[#allocation7 + $0x268] sm:$0xff] }
 0x681   :  { %v3964_v19 = vmul.f32 -1.442695, %v1546_v30  ;;  %v3965_v28 = vmul.f32 -1.442695, %v5293_v36  ;;  %v1951_v30 = vld [vmem:[#allocation7 + $0x258] sm:$0xff] }
 0x682   :  { %5470 = vpow2.f32 %v3963_v46  ;;  %v1955_v46 = vld [vmem:[#allocation7 + $0x278] sm:$0xff] }
 0x683   :  { %5472 = vpow2.f32 %v3964_v19 }
 0x684   :  { %5474 = vpow2.f32 %v3965_v28 }
 0x685   :  { %5476 = vtanh.f32 %v5292_v49 }
 0x68c   :  { %v5471_v9 = vpop.eup %5470 }
 0x68d   :  { %v5473_v18 = vpop.eup %5472  ;;  %v1552_v54 = vadd.f32 1.0, %v5471_v9  ;;  %v1948_v9 = vld [vmem:[#allocation7 + $0x240] sm:$0xff] }
 0x68e   :  { %v1558_v55 = vadd.f32 1.0, %v5473_v18  ;;  %v5475_v4 = vpop.eup %5474  ;;  %v1952_v18 = vld [vmem:[#allocation7 + $0x260] sm:$0xff] }
 0x68f   :  { %5478 = vrcp.f32 %v1552_v54  ;;  %v5477_v51 = vpop.eup %5476  ;;  %v1565_v32 = vadd.f32 1.0, %v5475_v4  ;;  %v4678_v4 = vpack.c.bf16 %v1955_v46, %v1951_v30  ;;  %v1980_v46 = vld [vmem:[#allocation7 + $0x340] sm:$0xff] }
 0x690   :  { %5480 = vrcp.f32 %v1558_v55  ;;  %v4646_v55 = vpack.c.bf16 %v1953_v40, %v1949_v60  ;;  %v1987_v60 = vld [vmem:[#allocation7 + $0x378] sm:$0xff] }
 0x691   :  { %5482 = vrcp.f32 %v1565_v32  ;;  %v1959_v32 = vld [vmem:[#allocation7 + $0x298] sm:$0xff] }
 0x699   :  { %v5479_v10 = vpop.eup %5478 }
 0x69a   :  { %v5481_v45 = vpop.eup %5480  ;;  %v1569_v59 = vmul.f32 %v5479_v10, %v5477_v51  ;;  %v1950_v51 = vld [vmem:[#allocation7 + $0x250] sm:$0xff] }
 0x69b   :  { %v1568_v53 = vmul.f32 %v5481_v45, %v6353_v31  ;;  %v5483_v27 = vpop.eup %5482  ;;  %v1946_v31 = vld [vmem:[#allocation7 + $0x230] sm:$0xff]  ;;  %v1957_v45 = vld [vmem:[#allocation7 + $0x288] sm:$0xff] }
 0x69c   :  { %v1954_v10 = vld [vmem:[#allocation7 + $0x270] sm:$0xff] }
 0x69d   :  { %v6399_v37 = vadd.f32 %v1569_v59, %v1568_v53  ;;  %v1961_v59 = vld [vmem:[#allocation7 + $0x2a8] sm:$0xff]  ;;  %v1963_v53 = vld [vmem:[#allocation7 + $0x2b8] sm:$0xff] }
 0x69f   :  { %5484 = vtanh.f32 %v6399_v37 }
 0x6a9   :  { %v5485_v38 = vpop.eup %5484 }
 0x6aa   :  { %v6402_v5 = vmul.f32 %v5485_v38, %v5483_v27  ;;  %v4680_v27 = vpack.c.bf16 %v1954_v10, %v1950_v51  ;;  %v1956_v38 = vld [vmem:[#allocation7 + $0x280] sm:$0xff]  ;;  %v1995_v51 = vld [vmem:[#allocation7 + $0x3b8] sm:$0xff] }
 0x6ac   :  { %1645 = vmatmul.mubr.f32.vlgmr.msra.gmra.mrb[12].mxu0 %v6402_v5  ;;  %1716 = vmatmul.mubr.f32.vlgmr.msra.gmra.mrb[28].mxu1 %v6402_v5 }
 0x6ad   :  { %4581 = vmatpush1.bf16.msra.mxu0 %v5938_v13  ;;  %4613 = vmatpush1.bf16.msra.mxu1 %v6035_v61  ;;  %v1941_v13 = vld [vmem:[#allocation7 + $0x208] sm:$0xff] }
 0x6ae   :  { %4583 = vmatprep.subr.bf16.mxu0 %v5942_v22  ;;  %4615 = vmatprep.subr.bf16.mxu1 %v6038_v62  ;;  %v1945_v22 = vld [vmem:[#allocation7 + $0x228] sm:$0xff] }
 0x6af   :  { %1821 = vmatprep.mubr.f32.mxu0 %v7010_v0  ;;  %1892 = vmatprep.mubr.f32.mxu1 %v7010_v0 }
 0x6b1   :  { %4585 = vmatpush1.bf16.msra.mxu0 %v5944_v26  ;;  %4617 = vmatpush1.bf16.msra.mxu1 %v6045_v7  ;;  %v1943_v26 = vld [vmem:[#allocation7 + $0x218] sm:$0xff] }
 0x6b2   :  { %4587 = vmatprep.subr.bf16.mxu0 %v5947_v35  ;;  %4619 = vmatprep.subr.bf16.mxu1 %v6048_v8  ;;  %v4642_v35 = vpack.c.bf16 %v1945_v22, %v1941_v13  ;;  %v1960_v13 = vld [vmem:[#allocation7 + $0x2a0] sm:$0xff]  ;;  %v4650_v22 = vpack.c.bf16 %v1961_v59, %v1957_v45 }
 0x6b3   :  { %v1988_v59 = vld [vmem:[#allocation7 + $0x380] sm:$0xff] }
 0x6b5   :  { %4589 = vmatpush1.bf16.msra.mxu0 %v5950_v39  ;;  %4621 = vmatpush1.bf16.msra.mxu1 %v6053_v48  ;;  %v1947_v39 = vld [vmem:[#allocation7 + $0x238] sm:$0xff] }
 0x6b6   :  { %4591 = vmatprep.subr.bf16.mxu0 %v5953_v44  ;;  %4623 = vmatprep.subr.bf16.mxu1 %v6056_v17  ;;  %v4674_v44 = vpack.c.bf16 %v1947_v39, %v1943_v26  ;;  %v4682_v26 = vpack.c.bf16 %v1963_v53, %v1959_v32  ;;  %v1962_v39 = vld [vmem:[#allocation7 + $0x2b0] sm:$0xff]  ;;  %v1992_v32 = vld [vmem:[#allocation7 + $0x3a0] sm:$0xff] }
 0x6b9   :  { %4593 = vmatpush1.bf16.msra.mxu0 %v5956_v52  ;;  %4625 = vmatpush1.bf16.msra.mxu1 %v6061_v56 }
 0x6ba   :  { %4595 = vmatprep.subr.bf16.mxu0 %v5959_v57  ;;  %4627 = vmatprep.subr.bf16.mxu1 %v6064_v25 }
 0x6bd   :  { %4597 = vmatpush1.bf16.msra.mxu0 %v5962_v1  ;;  %4629 = vmatpush1.bf16.msra.mxu1 %v6069_v2 }
 0x6be   :  { %4599 = vmatprep.subr.bf16.mxu0 %v5965_v6  ;;  %4631 = vmatprep.subr.bf16.mxu1 %v6072_v33 }
 0x6c1   :  { %4601 = vmatpush1.bf16.msra.mxu0 %v5968_v15  ;;  %4633 = vmatpush1.bf16.msra.mxu1 %v6077_v11 }
 0x6c2   :  { %4603 = vmatprep.subr.bf16.mxu0 %v5971_v20  ;;  %4635 = vmatprep.subr.bf16.mxu1 %v6080_v43 }
 0x6c5   :  { %4605 = vmatpush1.bf16.msra.mxu0 %v5974_v29  ;;  %4637 = vmatpush1.bf16.msra.mxu1 %v6085_v21 }
 0x6c6   :  { %4607 = vmatprep.subr.bf16.mxu0 %v5977_v34  ;;  %4639 = vmatprep.subr.bf16.mxu1 %v6088_v50 }
 0x6c9   :  { %4609 = vmatpush1.bf16.msra.mxu0 %v5980_v41  ;;  %4641 = vmatpush1.bf16.msra.mxu1 %v6093_v58  ;;  %v1940_v58 = vld [vmem:[#allocation7 + $0x200] sm:$0xff] }
 0x6ca   :  { %4643 = vmatprep.subr.bf16.mxu0 %v4642_v35  ;;  %4675 = vmatprep.subr.bf16.mxu1 %v4674_v44  ;;  %v1958_v35 = vld [vmem:[#allocation7 + $0x290] sm:$0xff]  ;;  %v1965_v44 = vld [vmem:[#allocation7 + $0x2c8] sm:$0xff] }
 0x77f   :  { %v1646_v52 = vpop.f32.mrb[12].mxu0  ;;  %v1717_v57 = vpop.f32.mrb[28].mxu1 }
 0x780   :  { %v1722_v1 = vadd.f32 %v1646_v52, %v6149_v14  ;;  %v1648_v6 = vpop.f32.mrb[13].mxu0  ;;  %v1719_v15 = vpop.f32.mrb[29].mxu1  ;;  %v5294_v62 = vadd.f32 %v1717_v57, %v6161_v16  ;;  %v1944_v14 = vld [vmem:[#allocation7 + $0x220] sm:$0xff]  ;;  %v1969_v52 = vld [vmem:[#allocation7 + $0x2e8] sm:$0xff]  ;;  %v1967_v57 = vld [vmem:[#allocation7 + $0x2d8] sm:$0xff] }
 0x781   :  { %v1723_v20 = vadd.f32 %v1648_v6, %v6151_v23  ;;  %v5295_v41 = vadd.f32 %v1719_v15, %v6165_v3  ;;  %v1942_v23 = vld [vmem:[#allocation7 + $0x210] sm:$0xff]  ;;  %v4644_v28 = vpack.c.bf16 %v1944_v14, %v1940_v58  ;;  %v4652_v6 = vpack.c.bf16 %v1960_v13, %v1956_v38  ;;  %v1981_v14 = vld [vmem:[#allocation7 + $0x348] sm:$0xff] }
 0x782   :  { %v3966_v29 = vmul.f32 -1.442695, %v1722_v1  ;;  %v4676_v49 = vpack.c.bf16 %v1946_v31, %v1942_v23  ;;  %v1971_v1 = vld [vmem:[#allocation7 + $0x2f8] sm:$0xff]  ;;  %v4684_v15 = vpack.c.bf16 %v1962_v39, %v1958_v35  ;;  %v1978_v58 = vld [vmem:[#allocation7 + $0x330] sm:$0xff]  ;;  %v1985_v23 = vld [vmem:[#allocation7 + $0x368] sm:$0xff]  ;;  %v4668_v39 = vpack.c.bf16 %v1992_v32, %v1988_v59 }
 0x783   :  { %v3967_v34 = vmul.f32 -1.442695, %v1723_v20  ;;  %v3968_v61 = vmul.f32 -1.442695, %v5295_v41  ;;  %v1964_v20 = vld [vmem:[#allocation7 + $0x2c0] sm:$0xff]  ;;  %v4686_v41 = vpack.c.bf16 %v1971_v1, %v1967_v57  ;;  %v1983_v31 = vld [vmem:[#allocation7 + $0x358] sm:$0xff] }
 0x784   :  { %5486 = vpow2.f32 %v3966_v29  ;;  %v1968_v29 = vld [vmem:[#allocation7 + $0x2e0] sm:$0xff]  ;;  %v1994_v38 = vld [vmem:[#allocation7 + $0x3b0] sm:$0xff]  ;;  %v1997_v13 = vld [vmem:[#allocation7 + $0x3c8] sm:$0xff] }
 0x785   :  { %5488 = vpow2.f32 %v3967_v34  ;;  %v4654_v34 = vpack.c.bf16 %v1969_v52, %v1965_v44  ;;  %v2003_v35 = vld [vmem:[#allocation7 + $0x3f8] sm:$0xff]  ;;  %v1996_v52 = vld [vmem:[#allocation7 + $0x3c0] sm:$0xff] }
 0x786   :  { %5490 = vpow2.f32 %v3968_v61  ;;  %v1966_v61 = vld [vmem:[#allocation7 + $0x2d0] sm:$0xff]  ;;  %v2317_v59 = vld [vmem:[#allocation9 + $0x2f8] sm:$0xff]  ;;  %v2310_v32 = vld [vmem:[#allocation9 + $0x2c0] sm:$0xff] }
 0x787   :  { %5492 = vtanh.f32 %v5294_v62  ;;  %v1970_v62 = vld [vmem:[#allocation7 + $0x2f0] sm:$0xff] }
 0x78e   :  { %v5487_v7 = vpop.eup %5486 }
 0x78f   :  { %v5489_v8 = vpop.eup %5488  ;;  %v1729_v48 = vadd.f32 1.0, %v5487_v7  ;;  %v1973_v7 = vld [vmem:[#allocation7 + $0x308] sm:$0xff] }
 0x790   :  { %v1735_v17 = vadd.f32 1.0, %v5489_v8  ;;  %v5491_v56 = vpop.eup %5490  ;;  %v1977_v8 = vld [vmem:[#allocation7 + $0x328] sm:$0xff] }
 0x791   :  { %5494 = vrcp.f32 %v1729_v48  ;;  %v5493_v25 = vpop.eup %5492  ;;  %v1742_v43 = vadd.f32 1.0, %v5491_v56  ;;  %v1975_v48 = vld [vmem:[#allocation7 + $0x318] sm:$0xff]  ;;  %v4656_v56 = vpack.c.bf16 %v1968_v29, %v1964_v20  ;;  %v2002_v20 = vld [vmem:[#allocation7 + $0x3f0] sm:$0xff] }
 0x792   :  { %5496 = vrcp.f32 %v1735_v17  ;;  %v1979_v17 = vld [vmem:[#allocation7 + $0x338] sm:$0xff] }
 0x793   :  { %5498 = vrcp.f32 %v1742_v43  ;;  %v4690_v43 = vpack.c.bf16 %v1979_v17, %v1975_v48  ;;  %v2295_v48 = vld [vmem:[#allocation9 + $0x248] sm:$0xff] }
 0x794   :  { %v2299_v17 = vld [vmem:[#allocation9 + $0x268] sm:$0xff] }
 0x79b   :  { %v5495_v2 = vpop.eup %5494 }
 0x79c   :  { %v5497_v33 = vpop.eup %5496  ;;  %v1746_v11 = vmul.f32 %v5495_v2, %v5493_v25  ;;  %v4688_v25 = vpack.c.bf16 %v1970_v62, %v1966_v61  ;;  %v1972_v2 = vld [vmem:[#allocation7 + $0x300] sm:$0xff] }
 0x79d   :  { %v1745_v21 = vmul.f32 %v5497_v33, %v6399_v37  ;;  %v5499_v19 = vpop.eup %5498  ;;  %v4648_v37 = vpack.c.bf16 %v1952_v18, %v1948_v9  ;;  %v1976_v33 = vld [vmem:[#allocation7 + $0x320] sm:$0xff]  ;;  %v1986_v9 = vld [vmem:[#allocation7 + $0x370] sm:$0xff]  ;;  %v1989_v18 = vld [vmem:[#allocation7 + $0x388] sm:$0xff] }
 0x79e   :  { %v4660_v40 = vpack.c.bf16 %v1976_v33, %v1972_v2  ;;  %v2301_v2 = vld [vmem:[#allocation9 + $0x278] sm:$0xff]  ;;  %v2294_v33 = vld [vmem:[#allocation9 + $0x240] sm:$0xff] }
 0x79f   :  { %v6443_v50 = vadd.f32 %v1746_v11, %v1745_v21  ;;  %v4658_v11 = vpack.c.bf16 %v1977_v8, %v1973_v7  ;;  %v1974_v21 = vld [vmem:[#allocation7 + $0x310] sm:$0xff] }
 0x7a0   :  { %v4692_v30 = vpack.c.bf16 %v1978_v58, %v1974_v21  ;;  %v2288_v7 = vld [vmem:[#allocation9 + $0x210] sm:$0xff] }
 0x7a1   :  { %5500 = vtanh.f32 %v6443_v50  ;;  %v2292_v8 = vld [vmem:[#allocation9 + $0x230] sm:$0xff] }
 0x7a2   :  { %v2296_v58 = vld [vmem:[#allocation9 + $0x250] sm:$0xff] }
 0x7ab   :  { %v5501_v36 = vpop.eup %5500 }
 0x7ac   :  { %v6446_v54 = vmul.f32 %v5501_v36, %v5499_v19  ;;  %v1984_v19 = vld [vmem:[#allocation7 + $0x360] sm:$0xff]  ;;  %v4662_v36 = vpack.c.bf16 %v1985_v23, %v1981_v14  ;;  %v2300_v14 = vld [vmem:[#allocation9 + $0x270] sm:$0xff] }
 0x7ad   :  { %v4664_v10 = vpack.c.bf16 %v1984_v19, %v1980_v46  ;;  %v6499_v23 = vpack.c.bf16 %v2300_v14, %v2296_v58  ;;  %v2309_v46 = vld [vmem:[#allocation9 + $0x2b8] sm:$0xff]  ;;  %v2302_v19 = vld [vmem:[#allocation9 + $0x280] sm:$0xff] }
 0x7ae   :  { %1822 = vmatmul.mubr.f32.vlgmr.msra.gmra.mrb[14].mxu0 %v6446_v54  ;;  %1893 = vmatmul.mubr.f32.vlgmr.msra.gmra.mrb[30].mxu1 %v6446_v54 }
 0x7af   :  { %4645 = vmatpush1.bf16.msra.mxu0 %v4644_v28  ;;  %4677 = vmatpush1.bf16.msra.mxu1 %v4676_v49  ;;  %v4694_v28 = vpack.c.bf16 %v1987_v60, %v1983_v31  ;;  %v1982_v49 = vld [vmem:[#allocation7 + $0x350] sm:$0xff]  ;;  %v2303_v31 = vld [vmem:[#allocation9 + $0x288] sm:$0xff] }
 0x7b0   :  { %4647 = vmatprep.subr.bf16.mxu0 %v4646_v55  ;;  %4679 = vmatprep.subr.bf16.mxu1 %v4678_v4  ;;  %v1993_v55 = vld [vmem:[#allocation7 + $0x3a8] sm:$0xff]  ;;  %v1991_v4 = vld [vmem:[#allocation7 + $0x398] sm:$0xff]  ;;  %v4696_v45 = vpack.c.bf16 %v1986_v9, %v1982_v49  ;;  %v2304_v9 = vld [vmem:[#allocation9 + $0x290] sm:$0xff] }
 0x7b1   :  { %2091 = vmatprep.mubr.f32.mxu0 %v7010_v0  ;;  %2204 = vmatprep.mubr.f32.mxu1 %v7010_v0  ;;  %v4666_v53 = vpack.c.bf16 %v1993_v55, %v1989_v18  ;;  %v2307_v60 = vld [vmem:[#allocation9 + $0x2a8] sm:$0xff]  ;;  %v2308_v18 = vld [vmem:[#allocation9 + $0x2b0] sm:$0xff] }
 0x7b2   :  { %v6511_v55 = vpack.c.bf16 %v2308_v18, %v2304_v9 }
 0x7b3   :  { %4649 = vmatpush1.bf16.msra.mxu0 %v4648_v37  ;;  %4681 = vmatpush1.bf16.msra.mxu1 %v4680_v27  ;;  %v4698_v37 = vpack.c.bf16 %v1995_v51, %v1991_v4  ;;  %v1990_v27 = vld [vmem:[#allocation7 + $0x390] sm:$0xff]  ;;  %v2311_v4 = vld [vmem:[#allocation9 + $0x2c8] sm:$0xff] }
 0x7b4   :  { %4651 = vmatprep.subr.bf16.mxu0 %v4650_v22  ;;  %4683 = vmatprep.subr.bf16.mxu1 %v4682_v26  ;;  %v2001_v22 = vld [vmem:[#allocation7 + $0x3e8] sm:$0xff]  ;;  %v1999_v26 = vld [vmem:[#allocation7 + $0x3d8] sm:$0xff]  ;;  %v4700_v44 = vpack.c.bf16 %v1994_v38, %v1990_v27  ;;  %v2312_v38 = vld [vmem:[#allocation9 + $0x2d0] sm:$0xff] }
 0x7b5   :  { %v4670_v57 = vpack.c.bf16 %v2001_v22, %v1997_v13  ;;  %v4702_v1 = vpack.c.bf16 %v2003_v35, %v1999_v26  ;;  %v2315_v51 = vld [vmem:[#allocation9 + $0x2e8] sm:$0xff]  ;;  %v2316_v13 = vld [vmem:[#allocation9 + $0x2f0] sm:$0xff] }
 0x7b6   :  { %v2319_v22 = vld [vmem:[#allocation9 + $0x308] sm:$0xff]  ;;  %v6523_v26 = vpack.c.bf16 %v2316_v13, %v2312_v38  ;;  %v2346_v38 = vld [vmem:[#allocation9 + $0x3e0] sm:$0xff] }
 0x7b7   :  { %4653 = vmatpush1.bf16.msra.mxu0 %v4652_v6  ;;  %4685 = vmatpush1.bf16.msra.mxu1 %v4684_v15  ;;  %v2000_v6 = vld [vmem:[#allocation7 + $0x3e0] sm:$0xff]  ;;  %v1998_v15 = vld [vmem:[#allocation7 + $0x3d0] sm:$0xff]  ;;  %v2323_v35 = vld [vmem:[#allocation9 + $0x328] sm:$0xff] }
 0x7b8   :  { %4655 = vmatprep.subr.bf16.mxu0 %v4654_v34  ;;  %4687 = vmatprep.subr.bf16.mxu1 %v4686_v41  ;;  %v4672_v29 = vpack.c.bf16 %v2000_v6, %v1996_v52  ;;  %v4704_v34 = vpack.c.bf16 %v2002_v20, %v1998_v15  ;;  %v2286_v41 = vld [vmem:[#allocation9 + $0x200] sm:$0xff]  ;;  %v6527_v52 = vpack.c.bf16 %v2323_v35, %v2319_v22  ;;  %v2320_v15 = vld [vmem:[#allocation9 + $0x310] sm:$0xff] }
 0x7b9   :  { %v2322_v6 = vld [vmem:[#allocation9 + $0x320] sm:$0xff]  ;;  %v2344_v35 = vld [vmem:[#allocation9 + $0x3d0] sm:$0xff] }
 0x7bb   :  { %4657 = vmatpush1.bf16.msra.mxu0 %v4656_v56  ;;  %4689 = vmatpush1.bf16.msra.mxu1 %v4688_v25  ;;  %v2297_v56 = vld [vmem:[#allocation9 + $0x258] sm:$0xff]  ;;  %v6492_v25 = vpack.c.bf16 %v2299_v17, %v2295_v48  ;;  %v2328_v48 = vld [vmem:[#allocation9 + $0x350] sm:$0xff] }
 0x7bc   :  { %4659 = vmatprep.subr.bf16.mxu0 %v4658_v11  ;;  %4691 = vmatprep.subr.bf16.mxu1 %v4690_v43  ;;  %v2298_v11 = vld [vmem:[#allocation9 + $0x260] sm:$0xff]  ;;  %v6494_v43 = vpack.c.bf16 %v2301_v2, %v2297_v56  ;;  %v2332_v17 = vld [vmem:[#allocation9 + $0x370] sm:$0xff]  ;;  %v2335_v2 = vld [vmem:[#allocation9 + $0x388] sm:$0xff] }
 0x7bd   :  { %v6496_v21 = vpack.c.bf16 %v2298_v11, %v2294_v33  ;;  %v2339_v33 = vld [vmem:[#allocation9 + $0x3a8] sm:$0xff]  ;;  %v2337_v11 = vld [vmem:[#allocation9 + $0x398] sm:$0xff]  ;;  %v6547_v58 = vpack.c.bf16 %v2332_v17, %v2328_v48 }
 0x7be   :  { %v6549_v14 = vpack.c.bf16 %v2339_v33, %v2335_v2 }
 0x7bf   :  { %4661 = vmatpush1.bf16.msra.mxu0 %v4660_v40  ;;  %4693 = vmatpush1.bf16.msra.mxu1 %v4692_v30  ;;  %v2305_v40 = vld [vmem:[#allocation9 + $0x298] sm:$0xff]  ;;  %v6504_v30 = vpack.c.bf16 %v2307_v60, %v2303_v31  ;;  %v2334_v60 = vld [vmem:[#allocation9 + $0x380] sm:$0xff] }
 0x7c0   :  { %4663 = vmatprep.subr.bf16.mxu0 %v4662_v36  ;;  %4695 = vmatprep.subr.bf16.mxu1 %v4694_v28  ;;  %v2306_v36 = vld [vmem:[#allocation9 + $0x2a0] sm:$0xff]  ;;  %v6506_v28 = vpack.c.bf16 %v2309_v46, %v2305_v40  ;;  %v2341_v31 = vld [vmem:[#allocation9 + $0x3b8] sm:$0xff] }
 0x7c1   :  { %v6508_v49 = vpack.c.bf16 %v2306_v36, %v2302_v19  ;;  %v2338_v40 = vld [vmem:[#allocation9 + $0x3a0] sm:$0xff]  ;;  %v6552_v46 = vpack.c.bf16 %v2341_v31, %v2337_v11  ;;  %v2336_v19 = vld [vmem:[#allocation9 + $0x390] sm:$0xff] }
 0x7c2   :  { %v2340_v36 = vld [vmem:[#allocation9 + $0x3b0] sm:$0xff]  ;;  %v6555_v9 = vpack.c.bf16 %v2338_v40, %v2334_v60 }
 0x7c3   :  { %4665 = vmatpush1.bf16.msra.mxu0 %v4664_v10  ;;  %4697 = vmatpush1.bf16.msra.mxu1 %v4696_v45  ;;  %v2313_v10 = vld [vmem:[#allocation9 + $0x2d8] sm:$0xff]  ;;  %v6516_v45 = vpack.c.bf16 %v2315_v51, %v2311_v4  ;;  %v6559_v18 = vpack.c.bf16 %v2340_v36, %v2336_v19  ;;  %v2343_v4 = vld [vmem:[#allocation9 + $0x3c8] sm:$0xff] }
 0x7c4   :  { %4667 = vmatprep.subr.bf16.mxu0 %v4666_v53  ;;  %4699 = vmatprep.subr.bf16.mxu1 %v4698_v37  ;;  %v2314_v53 = vld [vmem:[#allocation9 + $0x2e0] sm:$0xff]  ;;  %v6518_v37 = vpack.c.bf16 %v2317_v59, %v2313_v10  ;;  %v2347_v51 = vld [vmem:[#allocation9 + $0x3e8] sm:$0xff]  ;;  %v2345_v10 = vld [vmem:[#allocation9 + $0x3d8] sm:$0xff] }
 0x7c5   :  { %v6520_v27 = vpack.c.bf16 %v2314_v53, %v2310_v32  ;;  %v6564_v59 = vpack.c.bf16 %v2347_v51, %v2343_v4  ;;  %v2349_v32 = vld [vmem:[#allocation9 + $0x3f8] sm:$0xff]  ;;  %v2342_v53 = vld [vmem:[#allocation9 + $0x3c0] sm:$0xff] }
 0x7c6   :  { %v6566_v13 = vpack.c.bf16 %v2349_v32, %v2345_v10  ;;  %v6568_v22 = vpack.c.bf16 %v2346_v38, %v2342_v53 }
 0x7c7   :  { %4669 = vmatpush1.bf16.msra.mxu0 %v4668_v39  ;;  %4701 = vmatpush1.bf16.msra.mxu1 %v4700_v44  ;;  %v2321_v39 = vld [vmem:[#allocation9 + $0x318] sm:$0xff] }
 0x7c8   :  { %4671 = vmatprep.subr.bf16.mxu0 %v4670_v57  ;;  %4703 = vmatprep.subr.bf16.mxu1 %v4702_v1  ;;  %v2325_v44 = vld [vmem:[#allocation9 + $0x338] sm:$0xff]  ;;  %v2318_v1 = vld [vmem:[#allocation9 + $0x300] sm:$0xff] }
 0x7c9   :  { %v6529_v57 = vpack.c.bf16 %v2325_v44, %v2321_v39  ;;  %v6532_v20 = vpack.c.bf16 %v2322_v6, %v2318_v1  ;;  %v2348_v39 = vld [vmem:[#allocation9 + $0x3f0] sm:$0xff] }
 0x7ca   :  { %v6571_v44 = vpack.c.bf16 %v2348_v39, %v2344_v35  ;;  %v7013_v35 = vld [vmem:[#allocation21_spill] sm:$0xff] }
 0x7cb   :  { %4673 = vmatpush1.bf16.msra.mxu0 %v4672_v29  ;;  %4705 = vmatpush1.bf16.msra.mxu1 %v4704_v34  ;;  %v2324_v29 = vld [vmem:[#allocation9 + $0x330] sm:$0xff]  ;;  %v2327_v34 = vld [vmem:[#allocation9 + $0x348] sm:$0xff]  ;;  %v7014_v39 = vsub.s32 0, %v7013_v35 }
 0x7ce   :  { %2092 = vmatmul.mubr.f32.vlgmr.msra.gmra.mrb[16].mxu0 %v6172_v63  ;;  %2205 = vmatmul.mubr.f32.vlgmr.msra.gmra.mrb[32].mxu1 %v6172_v63  ;;  %v2287_v63 = vld [vmem:[#allocation9 + $0x208] sm:$0xff] }
 0x7cf   :  { %2097 = vmatprep.mubr.f32.mxu0 %v7010_v0  ;;  %2210 = vmatprep.mubr.f32.mxu1 %v7010_v0 }
 0x7d2   :  { %2098 = vmatmul.mubr.f32.gmra.mrb[18].mxu0 %v6218_v12  ;;  %2211 = vmatmul.mubr.f32.gmra.mrb[34].mxu1 %v6218_v12  ;;  %v2291_v12 = vld [vmem:[#allocation9 + $0x228] sm:$0xff] }
 0x7d3   :  { %2103 = vmatprep.mubr.f32.mxu0 %v7010_v0  ;;  %2216 = vmatprep.mubr.f32.mxu1 %v7010_v0 }
 0x7d6   :  { %2104 = vmatmul.mubr.f32.gmra.mrb[20].mxu0 %v6264_v24  ;;  %2217 = vmatmul.mubr.f32.gmra.mrb[36].mxu1 %v6264_v24  ;;  %v2289_v24 = vld [vmem:[#allocation9 + $0x218] sm:$0xff] }
 0x7d7   :  { %2109 = vmatprep.mubr.f32.mxu0 %v7010_v0  ;;  %2222 = vmatprep.mubr.f32.mxu1 %v7010_v0 }
 0x7da   :  { %2110 = vmatmul.mubr.f32.gmra.mrb[22].mxu0 %v6310_v47  ;;  %2223 = vmatmul.mubr.f32.gmra.mrb[38].mxu1 %v6310_v47  ;;  %v6480_v47 = vpack.c.bf16 %v2291_v12, %v2287_v63  ;;  %v2331_v63 = vld [vmem:[#allocation9 + $0x368] sm:$0xff]  ;;  %v6536_v12 = vpack.c.bf16 %v2324_v29, %v2320_v15 }
 0x7db   :  { %2115 = vmatprep.mubr.f32.mxu0 %v7010_v0  ;;  %2228 = vmatprep.mubr.f32.mxu1 %v7010_v0  ;;  %v7011_v15 = vld [vmem:[#allocation22_spill] sm:$0xff] }
 0x7dc   :  { %4707 = vmatprep.subr.bf16.mxu0 %v6480_v47 }
 0x7de   :  { %2116 = vmatmul.mubr.f32.gmra.mrb[24].mxu0 %v6356_v42  ;;  %2229 = vmatmul.mubr.f32.gmra.mrb[40].mxu1 %v6356_v42  ;;  %v2293_v42 = vld [vmem:[#allocation9 + $0x238] sm:$0xff] }
 0x7df   :  { %2121 = vmatprep.mubr.f32.mxu0 %v7010_v0  ;;  %2234 = vmatprep.mubr.f32.mxu1 %v7010_v0  ;;  %v6482_v61 = vpack.c.bf16 %v2293_v42, %v2289_v24  ;;  %v6538_v24 = vpack.c.bf16 %v2331_v63, %v2327_v34  ;;  %v2329_v42 = vld [vmem:[#allocation9 + $0x358] sm:$0xff] }
 0x7e1   :  { %4739 = vmatprep.subr.bf16.mxu1 %v6482_v61 }
 0x7e2   :  { %2122 = vmatmul.mubr.f32.gmra.mrb[26].mxu0 %v6402_v5  ;;  %2235 = vmatmul.mubr.f32.gmra.mrb[42].mxu1 %v6402_v5  ;;  %v2290_v5 = vld [vmem:[#allocation9 + $0x220] sm:$0xff] }
 0x7e3   :  { %2127 = vmatprep.mubr.f32.mxu0 %v7010_v0  ;;  %2240 = vmatprep.mubr.f32.mxu1 %v7010_v0  ;;  %v6484_v62 = vpack.c.bf16 %v2290_v5, %v2286_v41  ;;  %v2333_v41 = vld [vmem:[#allocation9 + $0x378] sm:$0xff]  ;;  %v2326_v5 = vld [vmem:[#allocation9 + $0x340] sm:$0xff] }
 0x7e5   :  { %4709 = vmatpush1.bf16.msra.mxu0 %v6484_v62 }
 0x7e6   :  { %2128 = vmatmul.mubr.f32.gmra.mrb[28].mxu0 %v6446_v54  ;;  %2241 = vmatmul.mubr.f32.gmra.mrb[44].mxu1 %v6446_v54  ;;  %v6487_v54 = vpack.c.bf16 %v2292_v8, %v2288_v7  ;;  %v6540_v7 = vpack.c.bf16 %v2333_v41, %v2329_v42  ;;  %v2330_v8 = vld [vmem:[#allocation9 + $0x360] sm:$0xff]  ;;  %v7012_v42 = vld [vmem:[#allocation23_spill] sm:$0xff] }
 0x7e7   :  { %2133 = vmatprep.mubr.f32.mxu0 %v7010_v0  ;;  %2246 = vmatprep.mubr.f32.mxu1 %v7010_v0  ;;  %v6543_v56 = vpack.c.bf16 %v2330_v8, %v2326_v5 }
 0x7e8   :  { %4741 = vmatpush1.bf16.msra.mxu1 %v6487_v54  ;;  %4711 = vmatprep.subr.bf16.mxu0 %v6492_v25 }
 0x7e9   :  { %4743 = vmatprep.subr.bf16.mxu1 %v6494_v43  ;;  %4713 = vmatpush1.bf16.msra.mxu0 %v6496_v21 }
 0x7ea   :  { %4715 = vmatprep.subr.bf16.mxu0 %v6504_v30 }
 0x7ec   :  { %4745 = vmatpush1.bf16.msra.mxu1 %v6499_v23 }
 0x7ed   :  { %4747 = vmatprep.subr.bf16.mxu1 %v6506_v28  ;;  %4717 = vmatpush1.bf16.msra.mxu0 %v6508_v49 }
 0x7ee   :  { %4719 = vmatprep.subr.bf16.mxu0 %v6516_v45 }
 0x7f0   :  { %4749 = vmatpush1.bf16.msra.mxu1 %v6511_v55 }
 0x7f1   :  { %4751 = vmatprep.subr.bf16.mxu1 %v6518_v37  ;;  %4721 = vmatpush1.bf16.msra.mxu0 %v6520_v27 }
 0x7f2   :  { %4723 = vmatprep.subr.bf16.mxu0 %v6527_v52 }
 0x7f4   :  { %4753 = vmatpush1.bf16.msra.mxu1 %v6523_v26 }
 0x7f5   :  { %4755 = vmatprep.subr.bf16.mxu1 %v6529_v57  ;;  %4725 = vmatpush1.bf16.msra.mxu0 %v6532_v20 }
 0x7f6   :  { %4727 = vmatprep.subr.bf16.mxu0 %v6538_v24 }
 0x7f8   :  { %4757 = vmatpush1.bf16.msra.mxu1 %v6536_v12 }
 0x7f9   :  { %4759 = vmatprep.subr.bf16.mxu1 %v6540_v7  ;;  %4729 = vmatpush1.bf16.msra.mxu0 %v6543_v56 }
 0x7fa   :  { %4731 = vmatprep.subr.bf16.mxu0 %v6549_v14 }
 0x7fc   :  { %4761 = vmatpush1.bf16.msra.mxu1 %v6547_v58 }
 0x7fd   :  { %4763 = vmatprep.subr.bf16.mxu1 %v6552_v46  ;;  %4733 = vmatpush1.bf16.msra.mxu0 %v6555_v9 }
 0x7fe   :  { %4735 = vmatprep.subr.bf16.mxu0 %v6564_v59 }
 0x800   :  { %4765 = vmatpush1.bf16.msra.mxu1 %v6559_v18 }
 0x801   :  { %4767 = vmatprep.subr.bf16.mxu1 %v6566_v13  ;;  %4737 = vmatpush1.bf16.msra.mxu0 %v6568_v22 }
 0x802   :  { %4771 = vmatprep.subr.bf16.mxu0 %v6480_v47 }
 0x804   :  { %4769 = vmatpush1.bf16.msra.mxu1 %v6571_v44 }
 0x805   :  { %4803 = vmatprep.subr.bf16.mxu1 %v6482_v61 }
 0x881   :  { %v1823_v1 = vpop.f32.mrb[14].mxu0  ;;  %v1894_v6 = vpop.f32.mrb[30].mxu1 }
 0x882   :  { %v1899_v29 = vadd.f32 %v1823_v1, %v7011_v15  ;;  %v1825_v34 = vpop.f32.mrb[15].mxu0  ;;  %v1896_v63 = vpop.f32.mrb[31].mxu1  ;;  %v5296_v2 = vadd.f32 %v1894_v6, %v6161_v16  ;;  %v7015_v6 = vsub.s32 1, %v7013_v35 }
 0x883   :  { %v1900_v41 = vadd.f32 %v1825_v34, %v7012_v42  ;;  %v5297_v48 = vadd.f32 %v1896_v63, %v6165_v3 }
 0x884   :  { %v3969_v5 = vmul.f32 -1.442695, %v1899_v29 }
 0x885   :  { %v3970_v8 = vmul.f32 -1.442695, %v1900_v41  ;;  %v3971_v17 = vmul.f32 -1.442695, %v5297_v48 }
 0x886   :  { %5502 = vpow2.f32 %v3969_v5 }
 0x887   :  { %5504 = vpow2.f32 %v3970_v8 }
 0x888   :  { %5506 = vpow2.f32 %v3971_v17  ;;  %v7016_v17 = vsub.s32 3, %v7013_v35 }
 0x889   :  { %5508 = vtanh.f32 %v5296_v2 }
 0x890   :  { %v5503_v33 = vpop.eup %5502 }
 0x891   :  { %v5505_v11 = vpop.eup %5504  ;;  %v1906_v31 = vadd.f32 1.0, %v5503_v33 }
 0x892   :  { %v1912_v60 = vadd.f32 1.0, %v5505_v11  ;;  %v5507_v40 = vpop.eup %5506  ;;  %v7017_v11 = vsub.s32 2, %v7013_v35 }
 0x893   :  { %5510 = vrcp.f32 %v1906_v31  ;;  %v5509_v19 = vpop.eup %5508  ;;  %v1919_v10 = vadd.f32 1.0, %v5507_v40 }
 0x894   :  { %5512 = vrcp.f32 %v1912_v60 }
 0x895   :  { %5514 = vrcp.f32 %v1919_v10 }
 0x89d   :  { %v5511_v36 = vpop.eup %5510 }
 0x89e   :  { %v5513_v4 = vpop.eup %5512  ;;  %v1923_v51 = vmul.f32 %v5511_v36, %v5509_v19 }
 0x89f   :  { %v1922_v32 = vmul.f32 %v5513_v4, %v6443_v50  ;;  %v5515_v16 = vpop.eup %5514  ;;  %v3972_v50 = vld [vmem:[%s6993_s3 + $0x4] sm:$0xf] }
 0x8a0   :  { %v6626_v1 = vrot.slane %v3972_v50, %v7014_v39  ;;  %v6630_v15 = vrot.slane %v3972_v50, %v7015_v6  ;;  %v6636_v2 = vrot.slane %v3972_v50, %v7016_v17  ;;  %v6641_v31 = vrot.slane %v3972_v50, %v7017_v11 }
 0x8a1   :  { %v1924_v3 = vadd.f32 %v1923_v51, %v1922_v32 }
 0x8a3   :  { %5516 = vtanh.f32 %v1924_v3  ;;  %1930 = vst [vmem:[#allocation15] sm:$0xff] %v1924_v3 }
 0x8ad   :  { %v5517_v53 = vpop.eup %5516 }
 0x8ae   :  { %v1926_v38 = vmul.f32 %v5517_v53, %v5515_v16 }
 0x8b0   :  { %2134 = vmatmul.mubr.f32.gmra.mrb[30].mxu0 %v1926_v38  ;;  %1929 = vst [vmem:[#allocation13] sm:$0xff] %v1926_v38  ;;  %2247 = vmatmul.mubr.f32.gmra.mrb[46].mxu1 %v1926_v38 }
 0x8b1   :  { %2418 = vmatprep.mubr.f32.mxu0 %v7010_v0  ;;  %2489 = vmatprep.mubr.f32.mxu1 %v7010_v0 }
 0x8b4   :  { %2419 = vmatmul.mubr.f32.vlgmr.msra.gmra.mrb[16].mxu0 %v7010_v0  ;;  %2490 = vmatmul.mubr.f32.vlgmr.msra.gmra.mrb[32].mxu1 %v7010_v0 }
 0x8b5   :  { %4773 = vmatpush1.bf16.msra.mxu0 %v6484_v62  ;;  %4805 = vmatpush1.bf16.msra.mxu1 %v6487_v54 }
 0x8b6   :  { %4775 = vmatprep.subr.bf16.mxu0 %v6492_v25  ;;  %4807 = vmatprep.subr.bf16.mxu1 %v6494_v43 }
 0x8b7   :  { %2593 = vmatprep.mubr.f32.mxu0 %v7010_v0  ;;  %2664 = vmatprep.mubr.f32.mxu1 %v7010_v0 }
 0x8b9   :  { %4777 = vmatpush1.bf16.msra.mxu0 %v6496_v21  ;;  %4809 = vmatpush1.bf16.msra.mxu1 %v6499_v23 }
 0x8ba   :  { %4779 = vmatprep.subr.bf16.mxu0 %v6504_v30  ;;  %4811 = vmatprep.subr.bf16.mxu1 %v6506_v28 }
 0x8bd   :  { %4781 = vmatpush1.bf16.msra.mxu0 %v6508_v49  ;;  %4813 = vmatpush1.bf16.msra.mxu1 %v6511_v55 }
 0x8be   :  { %4783 = vmatprep.subr.bf16.mxu0 %v6516_v45  ;;  %4815 = vmatprep.subr.bf16.mxu1 %v6518_v37 }
 0x8c1   :  { %4785 = vmatpush1.bf16.msra.mxu0 %v6520_v27  ;;  %4817 = vmatpush1.bf16.msra.mxu1 %v6523_v26 }
 0x8c2   :  { %4787 = vmatprep.subr.bf16.mxu0 %v6527_v52  ;;  %4819 = vmatprep.subr.bf16.mxu1 %v6529_v57 }
 0x8c5   :  { %4789 = vmatpush1.bf16.msra.mxu0 %v6532_v20  ;;  %4821 = vmatpush1.bf16.msra.mxu1 %v6536_v12 }
 0x8c6   :  { %4791 = vmatprep.subr.bf16.mxu0 %v6538_v24  ;;  %4823 = vmatprep.subr.bf16.mxu1 %v6540_v7 }
 0x8c9   :  { %4793 = vmatpush1.bf16.msra.mxu0 %v6543_v56  ;;  %4825 = vmatpush1.bf16.msra.mxu1 %v6547_v58 }
 0x8ca   :  { %4795 = vmatprep.subr.bf16.mxu0 %v6549_v14  ;;  %4827 = vmatprep.subr.bf16.mxu1 %v6552_v46 }
 0x8cd   :  { %4797 = vmatpush1.bf16.msra.mxu0 %v6555_v9  ;;  %4829 = vmatpush1.bf16.msra.mxu1 %v6559_v18 }
 0x8ce   :  { %4799 = vmatprep.subr.bf16.mxu0 %v6564_v59  ;;  %4831 = vmatprep.subr.bf16.mxu1 %v6566_v13 }
 0x8d1   :  { %4801 = vmatpush1.bf16.msra.mxu0 %v6568_v22  ;;  %4833 = vmatpush1.bf16.msra.mxu1 %v6571_v44 }
 0x8d2   :  { %4835 = vmatprep.subr.bf16.mxu0 %v6480_v47  ;;  %4867 = vmatprep.subr.bf16.mxu1 %v6482_v61 }
 0x987   :  { %v2420_v29 = vpop.f32.mrb[16].mxu0  ;;  %v2491_v34 = vpop.f32.mrb[32].mxu1 }
 0x988   :  { %v5298_v63 = vadd.f32 %v2420_v29, %v6626_v1  ;;  %v2422_v42 = vpop.f32.mrb[17].mxu0  ;;  %v2493_v41 = vpop.f32.mrb[33].mxu1  ;;  %v5314_v40 = vadd.f32 %v2491_v34, %v6641_v31 }
 0x989   :  { %v5299_v5 = vadd.f32 %v2422_v42, %v6630_v15  ;;  %v5315_v33 = vadd.f32 %v2493_v41, %v6636_v2 }
 0x98a   :  { %v3973_v8 = vmul.f32 -1.442695, %v5298_v63 }
 0x98b   :  { %v3974_v48 = vmul.f32 -1.442695, %v5299_v5  ;;  %v3975_v60 = vmul.f32 -1.442695, %v5315_v33 }
 0x98c   :  { %5518 = vpow2.f32 %v3973_v8 }
 0x98d   :  { %5520 = vpow2.f32 %v3974_v48 }
 0x98e   :  { %5522 = vpow2.f32 %v3975_v60 }
 0x98f   :  { %5524 = vtanh.f32 %v5314_v40 }
 0x996   :  { %v5519_v19 = vpop.eup %5518 }
 0x997   :  { %v5521_v36 = vpop.eup %5520  ;;  %v2503_v4 = vadd.f32 1.0, %v5519_v19 }
 0x998   :  { %v2509_v51 = vadd.f32 1.0, %v5521_v36  ;;  %v5523_v10 = vpop.eup %5522 }
 0x999   :  { %5526 = vrcp.f32 %v2503_v4  ;;  %v5525_v32 = vpop.eup %5524  ;;  %v2516_v38 = vadd.f32 1.0, %v5523_v10 }
 0x99a   :  { %5528 = vrcp.f32 %v2509_v51 }
 0x99b   :  { %5530 = vrcp.f32 %v2516_v38 }
 0x9a3   :  { %v5527_v3 = vpop.eup %5526 }
 0x9a4   :  { %v5529_v16 = vpop.eup %5528  ;;  %v2520_v53 = vmul.f32 %v5527_v3, %v5525_v32 }
 0x9a5   :  { %v2519_v35 = vmul.f32 0.0, %v5529_v16  ;;  %v5531_v39 = vpop.eup %5530 }
 0x9a7   :  { %v6644_v50 = vadd.f32 %v2520_v53, %v2519_v35 }
 0x9a9   :  { %5532 = vtanh.f32 %v6644_v50 }
 0x9b3   :  { %v5533_v6 = vpop.eup %5532 }
 0x9b4   :  { %v6647_v29 = vmul.f32 %v5533_v6, %v5531_v39 }
 0x9b6   :  { %2594 = vmatmul.mubr.f32.vlgmr.msra.gmra.mrb[18].mxu0 %v6647_v29  ;;  %2665 = vmatmul.mubr.f32.vlgmr.msra.gmra.mrb[34].mxu1 %v6647_v29 }
 0x9b7   :  { %4837 = vmatpush1.bf16.msra.mxu0 %v6484_v62  ;;  %4869 = vmatpush1.bf16.msra.mxu1 %v6487_v54 }
 0x9b8   :  { %4839 = vmatprep.subr.bf16.mxu0 %v6492_v25  ;;  %4871 = vmatprep.subr.bf16.mxu1 %v6494_v43 }
 0x9b9   :  { %2768 = vmatprep.mubr.f32.mxu0 %v7010_v0  ;;  %2839 = vmatprep.mubr.f32.mxu1 %v7010_v0 }
 0x9bb   :  { %4841 = vmatpush1.bf16.msra.mxu0 %v6496_v21  ;;  %4873 = vmatpush1.bf16.msra.mxu1 %v6499_v23 }
 0x9bc   :  { %4843 = vmatprep.subr.bf16.mxu0 %v6504_v30  ;;  %4875 = vmatprep.subr.bf16.mxu1 %v6506_v28 }
 0x9bf   :  { %4845 = vmatpush1.bf16.msra.mxu0 %v6508_v49  ;;  %4877 = vmatpush1.bf16.msra.mxu1 %v6511_v55 }
 0x9c0   :  { %4847 = vmatprep.subr.bf16.mxu0 %v6516_v45  ;;  %4879 = vmatprep.subr.bf16.mxu1 %v6518_v37 }
 0x9c3   :  { %4849 = vmatpush1.bf16.msra.mxu0 %v6520_v27  ;;  %4881 = vmatpush1.bf16.msra.mxu1 %v6523_v26 }
 0x9c4   :  { %4851 = vmatprep.subr.bf16.mxu0 %v6527_v52  ;;  %4883 = vmatprep.subr.bf16.mxu1 %v6529_v57 }
 0x9c7   :  { %4853 = vmatpush1.bf16.msra.mxu0 %v6532_v20  ;;  %4885 = vmatpush1.bf16.msra.mxu1 %v6536_v12 }
 0x9c8   :  { %4855 = vmatprep.subr.bf16.mxu0 %v6538_v24  ;;  %4887 = vmatprep.subr.bf16.mxu1 %v6540_v7 }
 0x9cb   :  { %4857 = vmatpush1.bf16.msra.mxu0 %v6543_v56  ;;  %4889 = vmatpush1.bf16.msra.mxu1 %v6547_v58 }
 0x9cc   :  { %4859 = vmatprep.subr.bf16.mxu0 %v6549_v14  ;;  %4891 = vmatprep.subr.bf16.mxu1 %v6552_v46 }
 0x9cf   :  { %4861 = vmatpush1.bf16.msra.mxu0 %v6555_v9  ;;  %4893 = vmatpush1.bf16.msra.mxu1 %v6559_v18 }
 0x9d0   :  { %4863 = vmatprep.subr.bf16.mxu0 %v6564_v59  ;;  %4895 = vmatprep.subr.bf16.mxu1 %v6566_v13 }
 0x9d3   :  { %4865 = vmatpush1.bf16.msra.mxu0 %v6568_v22  ;;  %4897 = vmatpush1.bf16.msra.mxu1 %v6571_v44 }
 0x9d4   :  { %4899 = vmatprep.subr.bf16.mxu0 %v6480_v47  ;;  %4931 = vmatprep.subr.bf16.mxu1 %v6482_v61 }
 0xa89   :  { %v2595_v34 = vpop.f32.mrb[18].mxu0  ;;  %v2666_v63 = vpop.f32.mrb[34].mxu1 }
 0xa8a   :  { %v5300_v42 = vadd.f32 %v2595_v34, %v6626_v1  ;;  %v2597_v41 = vpop.f32.mrb[19].mxu0  ;;  %v2668_v5 = vpop.f32.mrb[35].mxu1  ;;  %v5316_v60 = vadd.f32 %v2666_v63, %v6641_v31 }
 0xa8b   :  { %v5301_v8 = vadd.f32 %v2597_v41, %v6630_v15  ;;  %v5317_v33 = vadd.f32 %v2668_v5, %v6636_v2 }
 0xa8c   :  { %v3976_v48 = vmul.f32 -1.442695, %v5300_v42 }
 0xa8d   :  { %v3977_v17 = vmul.f32 -1.442695, %v5301_v8  ;;  %v3978_v11 = vmul.f32 -1.442695, %v5317_v33 }
 0xa8e   :  { %5534 = vpow2.f32 %v3976_v48 }
 0xa8f   :  { %5536 = vpow2.f32 %v3977_v17 }
 0xa90   :  { %5538 = vpow2.f32 %v3978_v11 }
 0xa91   :  { %5540 = vtanh.f32 %v5316_v60 }
 0xa98   :  { %v5535_v40 = vpop.eup %5534 }
 0xa99   :  { %v5537_v19 = vpop.eup %5536  ;;  %v2678_v36 = vadd.f32 1.0, %v5535_v40 }
 0xa9a   :  { %v2684_v4 = vadd.f32 1.0, %v5537_v19  ;;  %v5539_v51 = vpop.eup %5538 }
 0xa9b   :  { %5542 = vrcp.f32 %v2678_v36  ;;  %v5541_v10 = vpop.eup %5540  ;;  %v2691_v53 = vadd.f32 1.0, %v5539_v51 }
 0xa9c   :  { %5544 = vrcp.f32 %v2684_v4 }
 0xa9d   :  { %5546 = vrcp.f32 %v2691_v53 }
 0xaa5   :  { %v5543_v32 = vpop.eup %5542 }
 0xaa6   :  { %v5545_v3 = vpop.eup %5544  ;;  %v2695_v16 = vmul.f32 %v5543_v32, %v5541_v10 }
 0xaa7   :  { %v2694_v38 = vmul.f32 %v5545_v3, %v6644_v50  ;;  %v5547_v39 = vpop.eup %5546 }
 0xaa9   :  { %v6690_v35 = vadd.f32 %v2695_v16, %v2694_v38 }
 0xaab   :  { %5548 = vtanh.f32 %v6690_v35 }
 0xab5   :  { %v5549_v6 = vpop.eup %5548 }
 0xab6   :  { %v6693_v34 = vmul.f32 %v5549_v6, %v5547_v39 }
 0xab8   :  { %2769 = vmatmul.mubr.f32.vlgmr.msra.gmra.mrb[20].mxu0 %v6693_v34  ;;  %2840 = vmatmul.mubr.f32.vlgmr.msra.gmra.mrb[36].mxu1 %v6693_v34 }
 0xab9   :  { %4901 = vmatpush1.bf16.msra.mxu0 %v6484_v62  ;;  %4933 = vmatpush1.bf16.msra.mxu1 %v6487_v54 }
 0xaba   :  { %4903 = vmatprep.subr.bf16.mxu0 %v6492_v25  ;;  %4935 = vmatprep.subr.bf16.mxu1 %v6494_v43 }
 0xabb   :  { %2943 = vmatprep.mubr.f32.mxu0 %v7010_v0  ;;  %3014 = vmatprep.mubr.f32.mxu1 %v7010_v0 }
 0xabd   :  { %4905 = vmatpush1.bf16.msra.mxu0 %v6496_v21  ;;  %4937 = vmatpush1.bf16.msra.mxu1 %v6499_v23 }
 0xabe   :  { %4907 = vmatprep.subr.bf16.mxu0 %v6504_v30  ;;  %4939 = vmatprep.subr.bf16.mxu1 %v6506_v28 }
 0xac1   :  { %4909 = vmatpush1.bf16.msra.mxu0 %v6508_v49  ;;  %4941 = vmatpush1.bf16.msra.mxu1 %v6511_v55 }
 0xac2   :  { %4911 = vmatprep.subr.bf16.mxu0 %v6516_v45  ;;  %4943 = vmatprep.subr.bf16.mxu1 %v6518_v37 }
 0xac5   :  { %4913 = vmatpush1.bf16.msra.mxu0 %v6520_v27  ;;  %4945 = vmatpush1.bf16.msra.mxu1 %v6523_v26 }
 0xac6   :  { %4915 = vmatprep.subr.bf16.mxu0 %v6527_v52  ;;  %4947 = vmatprep.subr.bf16.mxu1 %v6529_v57 }
 0xac9   :  { %4917 = vmatpush1.bf16.msra.mxu0 %v6532_v20  ;;  %4949 = vmatpush1.bf16.msra.mxu1 %v6536_v12 }
 0xaca   :  { %4919 = vmatprep.subr.bf16.mxu0 %v6538_v24  ;;  %4951 = vmatprep.subr.bf16.mxu1 %v6540_v7 }
 0xacd   :  { %4921 = vmatpush1.bf16.msra.mxu0 %v6543_v56  ;;  %4953 = vmatpush1.bf16.msra.mxu1 %v6547_v58 }
 0xace   :  { %4923 = vmatprep.subr.bf16.mxu0 %v6549_v14  ;;  %4955 = vmatprep.subr.bf16.mxu1 %v6552_v46 }
 0xad1   :  { %4925 = vmatpush1.bf16.msra.mxu0 %v6555_v9  ;;  %4957 = vmatpush1.bf16.msra.mxu1 %v6559_v18 }
 0xad2   :  { %4927 = vmatprep.subr.bf16.mxu0 %v6564_v59  ;;  %4959 = vmatprep.subr.bf16.mxu1 %v6566_v13 }
 0xad5   :  { %4929 = vmatpush1.bf16.msra.mxu0 %v6568_v22  ;;  %4961 = vmatpush1.bf16.msra.mxu1 %v6571_v44 }
 0xad6   :  { %4963 = vmatprep.subr.bf16.mxu0 %v6480_v47  ;;  %4995 = vmatprep.subr.bf16.mxu1 %v6482_v61 }
 0xb8b   :  { %v2770_v50 = vpop.f32.mrb[20].mxu0  ;;  %v2841_v63 = vpop.f32.mrb[36].mxu1 }
 0xb8c   :  { %v5302_v42 = vadd.f32 %v2770_v50, %v6626_v1  ;;  %v2772_v41 = vpop.f32.mrb[21].mxu0  ;;  %v2843_v5 = vpop.f32.mrb[37].mxu1  ;;  %v5318_v60 = vadd.f32 %v2841_v63, %v6641_v31 }
 0xb8d   :  { %v5303_v8 = vadd.f32 %v2772_v41, %v6630_v15  ;;  %v5319_v33 = vadd.f32 %v2843_v5, %v6636_v2 }
 0xb8e   :  { %v3979_v48 = vmul.f32 -1.442695, %v5302_v42 }
 0xb8f   :  { %v3980_v17 = vmul.f32 -1.442695, %v5303_v8  ;;  %v3981_v11 = vmul.f32 -1.442695, %v5319_v33 }
 0xb90   :  { %5550 = vpow2.f32 %v3979_v48 }
 0xb91   :  { %5552 = vpow2.f32 %v3980_v17 }
 0xb92   :  { %5554 = vpow2.f32 %v3981_v11 }
 0xb93   :  { %5556 = vtanh.f32 %v5318_v60 }
 0xb9a   :  { %v5551_v40 = vpop.eup %5550 }
 0xb9b   :  { %v5553_v19 = vpop.eup %5552  ;;  %v2853_v36 = vadd.f32 1.0, %v5551_v40 }
 0xb9c   :  { %v2859_v4 = vadd.f32 1.0, %v5553_v19  ;;  %v5555_v51 = vpop.eup %5554 }
 0xb9d   :  { %5558 = vrcp.f32 %v2853_v36  ;;  %v5557_v10 = vpop.eup %5556  ;;  %v2866_v53 = vadd.f32 1.0, %v5555_v51 }
 0xb9e   :  { %5560 = vrcp.f32 %v2859_v4 }
 0xb9f   :  { %5562 = vrcp.f32 %v2866_v53 }
 0xba7   :  { %v5559_v32 = vpop.eup %5558 }
 0xba8   :  { %v5561_v3 = vpop.eup %5560  ;;  %v2870_v16 = vmul.f32 %v5559_v32, %v5557_v10 }
 0xba9   :  { %v2869_v38 = vmul.f32 %v5561_v3, %v6690_v35  ;;  %v5563_v6 = vpop.eup %5562 }
 0xbab   :  { %v6736_v39 = vadd.f32 %v2870_v16, %v2869_v38 }
 0xbad   :  { %5564 = vtanh.f32 %v6736_v39 }
 0xbb7   :  { %v5565_v50 = vpop.eup %5564 }
 0xbb8   :  { %v6739_v63 = vmul.f32 %v5565_v50, %v5563_v6 }
 0xbba   :  { %2944 = vmatmul.mubr.f32.vlgmr.msra.gmra.mrb[22].mxu0 %v6739_v63  ;;  %3015 = vmatmul.mubr.f32.vlgmr.msra.gmra.mrb[38].mxu1 %v6739_v63 }
 0xbbb   :  { %4965 = vmatpush1.bf16.msra.mxu0 %v6484_v62  ;;  %4997 = vmatpush1.bf16.msra.mxu1 %v6487_v54 }
 0xbbc   :  { %4967 = vmatprep.subr.bf16.mxu0 %v6492_v25  ;;  %4999 = vmatprep.subr.bf16.mxu1 %v6494_v43 }
 0xbbd   :  { %3118 = vmatprep.mubr.f32.mxu0 %v7010_v0  ;;  %3189 = vmatprep.mubr.f32.mxu1 %v7010_v0 }
 0xbbf   :  { %4969 = vmatpush1.bf16.msra.mxu0 %v6496_v21  ;;  %5001 = vmatpush1.bf16.msra.mxu1 %v6499_v23 }
 0xbc0   :  { %4971 = vmatprep.subr.bf16.mxu0 %v6504_v30  ;;  %5003 = vmatprep.subr.bf16.mxu1 %v6506_v28 }
 0xbc3   :  { %4973 = vmatpush1.bf16.msra.mxu0 %v6508_v49  ;;  %5005 = vmatpush1.bf16.msra.mxu1 %v6511_v55 }
 0xbc4   :  { %4975 = vmatprep.subr.bf16.mxu0 %v6516_v45  ;;  %5007 = vmatprep.subr.bf16.mxu1 %v6518_v37 }
 0xbc7   :  { %4977 = vmatpush1.bf16.msra.mxu0 %v6520_v27  ;;  %5009 = vmatpush1.bf16.msra.mxu1 %v6523_v26 }
 0xbc8   :  { %4979 = vmatprep.subr.bf16.mxu0 %v6527_v52  ;;  %5011 = vmatprep.subr.bf16.mxu1 %v6529_v57 }
 0xbcb   :  { %4981 = vmatpush1.bf16.msra.mxu0 %v6532_v20  ;;  %5013 = vmatpush1.bf16.msra.mxu1 %v6536_v12 }
 0xbcc   :  { %4983 = vmatprep.subr.bf16.mxu0 %v6538_v24  ;;  %5015 = vmatprep.subr.bf16.mxu1 %v6540_v7 }
 0xbcf   :  { %4985 = vmatpush1.bf16.msra.mxu0 %v6543_v56  ;;  %5017 = vmatpush1.bf16.msra.mxu1 %v6547_v58 }
 0xbd0   :  { %4987 = vmatprep.subr.bf16.mxu0 %v6549_v14  ;;  %5019 = vmatprep.subr.bf16.mxu1 %v6552_v46 }
 0xbd3   :  { %4989 = vmatpush1.bf16.msra.mxu0 %v6555_v9  ;;  %5021 = vmatpush1.bf16.msra.mxu1 %v6559_v18 }
 0xbd4   :  { %4991 = vmatprep.subr.bf16.mxu0 %v6564_v59  ;;  %5023 = vmatprep.subr.bf16.mxu1 %v6566_v13 }
 0xbd7   :  { %4993 = vmatpush1.bf16.msra.mxu0 %v6568_v22  ;;  %5025 = vmatpush1.bf16.msra.mxu1 %v6571_v44 }
 0xbd8   :  { %5027 = vmatprep.subr.bf16.mxu0 %v6480_v47  ;;  %5059 = vmatprep.subr.bf16.mxu1 %v6482_v61 }
 0xc8d   :  { %v2945_v35 = vpop.f32.mrb[22].mxu0  ;;  %v3016_v42 = vpop.f32.mrb[38].mxu1 }
 0xc8e   :  { %v5304_v41 = vadd.f32 %v2945_v35, %v6626_v1  ;;  %v2947_v5 = vpop.f32.mrb[23].mxu0  ;;  %v3018_v8 = vpop.f32.mrb[39].mxu1  ;;  %v5320_v40 = vadd.f32 %v3016_v42, %v6641_v31 }
 0xc8f   :  { %v5305_v48 = vadd.f32 %v2947_v5, %v6630_v15  ;;  %v5321_v11 = vadd.f32 %v3018_v8, %v6636_v2 }
 0xc90   :  { %v3982_v17 = vmul.f32 -1.442695, %v5304_v41 }
 0xc91   :  { %v3983_v33 = vmul.f32 -1.442695, %v5305_v48  ;;  %v3984_v60 = vmul.f32 -1.442695, %v5321_v11 }
 0xc92   :  { %5566 = vpow2.f32 %v3982_v17 }
 0xc93   :  { %5568 = vpow2.f32 %v3983_v33 }
 0xc94   :  { %5570 = vpow2.f32 %v3984_v60 }
 0xc95   :  { %5572 = vtanh.f32 %v5320_v40 }
 0xc9c   :  { %v5567_v19 = vpop.eup %5566 }
 0xc9d   :  { %v5569_v36 = vpop.eup %5568  ;;  %v3028_v4 = vadd.f32 1.0, %v5567_v19 }
 0xc9e   :  { %v3034_v51 = vadd.f32 1.0, %v5569_v36  ;;  %v5571_v10 = vpop.eup %5570 }
 0xc9f   :  { %5574 = vrcp.f32 %v3028_v4  ;;  %v5573_v32 = vpop.eup %5572  ;;  %v3041_v38 = vadd.f32 1.0, %v5571_v10 }
 0xca0   :  { %5576 = vrcp.f32 %v3034_v51 }
 0xca1   :  { %5578 = vrcp.f32 %v3041_v38 }
 0xca9   :  { %v5575_v3 = vpop.eup %5574 }
 0xcaa   :  { %v5577_v16 = vpop.eup %5576  ;;  %v3045_v53 = vmul.f32 %v5575_v3, %v5573_v32 }
 0xcab   :  { %v3044_v6 = vmul.f32 %v5577_v16, %v6736_v39  ;;  %v5579_v35 = vpop.eup %5578 }
 0xcad   :  { %v6782_v50 = vadd.f32 %v3045_v53, %v3044_v6 }
 0xcaf   :  { %5580 = vtanh.f32 %v6782_v50 }
 0xcb9   :  { %v5581_v42 = vpop.eup %5580 }
 0xcba   :  { %v6785_v41 = vmul.f32 %v5581_v42, %v5579_v35 }
 0xcbc   :  { %3119 = vmatmul.mubr.f32.vlgmr.msra.gmra.mrb[24].mxu0 %v6785_v41  ;;  %3190 = vmatmul.mubr.f32.vlgmr.msra.gmra.mrb[40].mxu1 %v6785_v41 }
 0xcbd   :  { %5029 = vmatpush1.bf16.msra.mxu0 %v6484_v62  ;;  %5061 = vmatpush1.bf16.msra.mxu1 %v6487_v54 }
 0xcbe   :  { %5031 = vmatprep.subr.bf16.mxu0 %v6492_v25  ;;  %5063 = vmatprep.subr.bf16.mxu1 %v6494_v43 }
 0xcbf   :  { %3293 = vmatprep.mubr.f32.mxu0 %v7010_v0  ;;  %3364 = vmatprep.mubr.f32.mxu1 %v7010_v0 }
 0xcc1   :  { %5033 = vmatpush1.bf16.msra.mxu0 %v6496_v21  ;;  %5065 = vmatpush1.bf16.msra.mxu1 %v6499_v23 }
 0xcc2   :  { %5035 = vmatprep.subr.bf16.mxu0 %v6504_v30  ;;  %5067 = vmatprep.subr.bf16.mxu1 %v6506_v28 }
 0xcc5   :  { %5037 = vmatpush1.bf16.msra.mxu0 %v6508_v49  ;;  %5069 = vmatpush1.bf16.msra.mxu1 %v6511_v55 }
 0xcc6   :  { %5039 = vmatprep.subr.bf16.mxu0 %v6516_v45  ;;  %5071 = vmatprep.subr.bf16.mxu1 %v6518_v37 }
 0xcc9   :  { %5041 = vmatpush1.bf16.msra.mxu0 %v6520_v27  ;;  %5073 = vmatpush1.bf16.msra.mxu1 %v6523_v26 }
 0xcca   :  { %5043 = vmatprep.subr.bf16.mxu0 %v6527_v52  ;;  %5075 = vmatprep.subr.bf16.mxu1 %v6529_v57 }
 0xccd   :  { %5045 = vmatpush1.bf16.msra.mxu0 %v6532_v20  ;;  %5077 = vmatpush1.bf16.msra.mxu1 %v6536_v12 }
 0xcce   :  { %5047 = vmatprep.subr.bf16.mxu0 %v6538_v24  ;;  %5079 = vmatprep.subr.bf16.mxu1 %v6540_v7 }
 0xcd1   :  { %5049 = vmatpush1.bf16.msra.mxu0 %v6543_v56  ;;  %5081 = vmatpush1.bf16.msra.mxu1 %v6547_v58 }
 0xcd2   :  { %5051 = vmatprep.subr.bf16.mxu0 %v6549_v14  ;;  %5083 = vmatprep.subr.bf16.mxu1 %v6552_v46 }
 0xcd5   :  { %5053 = vmatpush1.bf16.msra.mxu0 %v6555_v9  ;;  %5085 = vmatpush1.bf16.msra.mxu1 %v6559_v18 }
 0xcd6   :  { %5055 = vmatprep.subr.bf16.mxu0 %v6564_v59  ;;  %5087 = vmatprep.subr.bf16.mxu1 %v6566_v13 }
 0xcd9   :  { %5057 = vmatpush1.bf16.msra.mxu0 %v6568_v22  ;;  %5089 = vmatpush1.bf16.msra.mxu1 %v6571_v44 }
 0xcda   :  { %5091 = vmatprep.subr.bf16.mxu0 %v6480_v47  ;;  %5123 = vmatprep.subr.bf16.mxu1 %v6482_v61 }
 0xd8f   :  { %v3120_v39 = vpop.f32.mrb[24].mxu0  ;;  %v3191_v5 = vpop.f32.mrb[40].mxu1 }
 0xd90   :  { %v5306_v8 = vadd.f32 %v3120_v39, %v6626_v1  ;;  %v3122_v48 = vpop.f32.mrb[25].mxu0  ;;  %v3193_v17 = vpop.f32.mrb[41].mxu1  ;;  %v5322_v36 = vadd.f32 %v3191_v5, %v6641_v31 }
 0xd91   :  { %v5307_v33 = vadd.f32 %v3122_v48, %v6630_v15  ;;  %v5323_v40 = vadd.f32 %v3193_v17, %v6636_v2 }
 0xd92   :  { %v3985_v11 = vmul.f32 -1.442695, %v5306_v8 }
 0xd93   :  { %v3986_v60 = vmul.f32 -1.442695, %v5307_v33  ;;  %v3987_v19 = vmul.f32 -1.442695, %v5323_v40 }
 0xd94   :  { %5582 = vpow2.f32 %v3985_v11 }
 0xd95   :  { %5584 = vpow2.f32 %v3986_v60 }
 0xd96   :  { %5586 = vpow2.f32 %v3987_v19 }
 0xd97   :  { %5588 = vtanh.f32 %v5322_v36 }
 0xd9e   :  { %v5583_v4 = vpop.eup %5582 }
 0xd9f   :  { %v5585_v51 = vpop.eup %5584  ;;  %v3203_v10 = vadd.f32 1.0, %v5583_v4 }
 0xda0   :  { %v3209_v32 = vadd.f32 1.0, %v5585_v51  ;;  %v5587_v3 = vpop.eup %5586 }
 0xda1   :  { %5590 = vrcp.f32 %v3203_v10  ;;  %v5589_v16 = vpop.eup %5588  ;;  %v3216_v35 = vadd.f32 1.0, %v5587_v3 }
 0xda2   :  { %5592 = vrcp.f32 %v3209_v32 }
 0xda3   :  { %5594 = vrcp.f32 %v3216_v35 }
 0xdab   :  { %v5591_v53 = vpop.eup %5590 }
 0xdac   :  { %v5593_v38 = vpop.eup %5592  ;;  %v3220_v6 = vmul.f32 %v5591_v53, %v5589_v16 }
 0xdad   :  { %v3219_v42 = vmul.f32 %v5593_v38, %v6782_v50  ;;  %v5595_v5 = vpop.eup %5594 }
 0xdaf   :  { %v6828_v39 = vadd.f32 %v3220_v6, %v3219_v42 }
 0xdb1   :  { %5596 = vtanh.f32 %v6828_v39 }
 0xdbb   :  { %v5597_v8 = vpop.eup %5596 }
 0xdbc   :  { %v6831_v48 = vmul.f32 %v5597_v8, %v5595_v5 }
 0xdbe   :  { %3294 = vmatmul.mubr.f32.vlgmr.msra.gmra.mrb[26].mxu0 %v6831_v48  ;;  %3365 = vmatmul.mubr.f32.vlgmr.msra.gmra.mrb[42].mxu1 %v6831_v48 }
 0xdbf   :  { %5093 = vmatpush1.bf16.msra.mxu0 %v6484_v62  ;;  %5125 = vmatpush1.bf16.msra.mxu1 %v6487_v54 }
 0xdc0   :  { %5095 = vmatprep.subr.bf16.mxu0 %v6492_v25  ;;  %5127 = vmatprep.subr.bf16.mxu1 %v6494_v43 }
 0xdc1   :  { %3468 = vmatprep.mubr.f32.mxu0 %v7010_v0  ;;  %3539 = vmatprep.mubr.f32.mxu1 %v7010_v0 }
 0xdc3   :  { %5097 = vmatpush1.bf16.msra.mxu0 %v6496_v21  ;;  %5129 = vmatpush1.bf16.msra.mxu1 %v6499_v23 }
 0xdc4   :  { %5099 = vmatprep.subr.bf16.mxu0 %v6504_v30  ;;  %5131 = vmatprep.subr.bf16.mxu1 %v6506_v28 }
 0xdc7   :  { %5101 = vmatpush1.bf16.msra.mxu0 %v6508_v49  ;;  %5133 = vmatpush1.bf16.msra.mxu1 %v6511_v55 }
 0xdc8   :  { %5103 = vmatprep.subr.bf16.mxu0 %v6516_v45  ;;  %5135 = vmatprep.subr.bf16.mxu1 %v6518_v37 }
 0xdcb   :  { %5105 = vmatpush1.bf16.msra.mxu0 %v6520_v27  ;;  %5137 = vmatpush1.bf16.msra.mxu1 %v6523_v26 }
 0xdcc   :  { %5107 = vmatprep.subr.bf16.mxu0 %v6527_v52  ;;  %5139 = vmatprep.subr.bf16.mxu1 %v6529_v57 }
 0xdcf   :  { %5109 = vmatpush1.bf16.msra.mxu0 %v6532_v20  ;;  %5141 = vmatpush1.bf16.msra.mxu1 %v6536_v12 }
 0xdd0   :  { %5111 = vmatprep.subr.bf16.mxu0 %v6538_v24  ;;  %5143 = vmatprep.subr.bf16.mxu1 %v6540_v7 }
 0xdd3   :  { %5113 = vmatpush1.bf16.msra.mxu0 %v6543_v56  ;;  %5145 = vmatpush1.bf16.msra.mxu1 %v6547_v58 }
 0xdd4   :  { %5115 = vmatprep.subr.bf16.mxu0 %v6549_v14  ;;  %5147 = vmatprep.subr.bf16.mxu1 %v6552_v46 }
 0xdd7   :  { %5117 = vmatpush1.bf16.msra.mxu0 %v6555_v9  ;;  %5149 = vmatpush1.bf16.msra.mxu1 %v6559_v18 }
 0xdd8   :  { %5119 = vmatprep.subr.bf16.mxu0 %v6564_v59  ;;  %5151 = vmatprep.subr.bf16.mxu1 %v6566_v13 }
 0xddb   :  { %5121 = vmatpush1.bf16.msra.mxu0 %v6568_v22  ;;  %5153 = vmatpush1.bf16.msra.mxu1 %v6571_v44 }
 0xddc   :  { %5155 = vmatprep.subr.bf16.mxu0 %v6480_v47  ;;  %5187 = vmatprep.subr.bf16.mxu1 %v6482_v61 }
 0xe91   :  { %v3295_v50 = vpop.f32.mrb[26].mxu0  ;;  %v3366_v17 = vpop.f32.mrb[42].mxu1 }
 0xe92   :  { %v5308_v33 = vadd.f32 %v3295_v50, %v6626_v1  ;;  %v3297_v11 = vpop.f32.mrb[27].mxu0  ;;  %v3368_v60 = vpop.f32.mrb[43].mxu1  ;;  %v5324_v10 = vadd.f32 %v3366_v17, %v6641_v31 }
 0xe93   :  { %v5309_v40 = vadd.f32 %v3297_v11, %v6630_v15  ;;  %v5325_v4 = vadd.f32 %v3368_v60, %v6636_v2  ;;  %v3766_v11 = vld [vmem:[#allocation10 + $0x20] sm:$0xff]  ;;  %v3767_v60 = vld [vmem:[#allocation10 + $0x28] sm:$0xff] }
 0xe94   :  { %v3988_v19 = vmul.f32 -1.442695, %v5308_v33 }
 0xe95   :  { %v3989_v36 = vmul.f32 -1.442695, %v5309_v40  ;;  %v3990_v51 = vmul.f32 -1.442695, %v5325_v4  ;;  %v5226_v40 = vpack.c.bf16 %v3767_v60, %v3766_v11 }
 0xe96   :  { %5598 = vpow2.f32 %v3988_v19  ;;  %v3768_v19 = vld [vmem:[#allocation10 + $0x30] sm:$0xff] }
 0xe97   :  { %5600 = vpow2.f32 %v3989_v36  ;;  %v3769_v36 = vld [vmem:[#allocation10 + $0x38] sm:$0xff] }
 0xe98   :  { %5602 = vpow2.f32 %v3990_v51  ;;  %v5230_v4 = vpack.c.bf16 %v3769_v36, %v3768_v19  ;;  %v3770_v51 = vld [vmem:[#allocation10 + $0x40] sm:$0xff] }
 0xe99   :  { %5604 = vtanh.f32 %v5324_v10  ;;  %v3771_v10 = vld [vmem:[#allocation10 + $0x48] sm:$0xff] }
 0xea0   :  { %v5599_v47 = vpop.eup %5598 }
 0xea1   :  { %v5601_v32 = vpop.eup %5600  ;;  %v3378_v61 = vadd.f32 1.0, %v5599_v47  ;;  %v5234_v47 = vpack.c.bf16 %v3771_v10, %v3770_v51 }
 0xea2   :  { %v3384_v3 = vadd.f32 1.0, %v5601_v32  ;;  %v5603_v16 = vpop.eup %5602  ;;  %v3772_v32 = vld [vmem:[#allocation10 + $0x50] sm:$0xff] }
 0xea3   :  { %5606 = vrcp.f32 %v3378_v61  ;;  %v5605_v53 = vpop.eup %5604  ;;  %v3391_v42 = vadd.f32 1.0, %v5603_v16  ;;  %v3773_v61 = vld [vmem:[#allocation10 + $0x58] sm:$0xff]  ;;  %v3774_v16 = vld [vmem:[#allocation10 + $0x60] sm:$0xff] }
 0xea4   :  { %5608 = vrcp.f32 %v3384_v3  ;;  %v5238_v3 = vpack.c.bf16 %v3773_v61, %v3772_v32 }
 0xea5   :  { %5610 = vrcp.f32 %v3391_v42 }
 0xead   :  { %v5607_v38 = vpop.eup %5606 }
 0xeae   :  { %v5609_v6 = vpop.eup %5608  ;;  %v3395_v35 = vmul.f32 %v5607_v38, %v5605_v53  ;;  %v3775_v53 = vld [vmem:[#allocation10 + $0x68] sm:$0xff]  ;;  %v3776_v38 = vld [vmem:[#allocation10 + $0x70] sm:$0xff] }
 0xeaf   :  { %v3394_v5 = vmul.f32 %v5609_v6, %v6828_v39  ;;  %v5611_v50 = vpop.eup %5610  ;;  %v3777_v6 = vld [vmem:[#allocation10 + $0x78] sm:$0xff] }
 0xeb1   :  { %v6874_v8 = vadd.f32 %v3395_v35, %v3394_v5  ;;  %v5246_v35 = vpack.c.bf16 %v3777_v6, %v3776_v38 }
 0xeb3   :  { %5612 = vtanh.f32 %v6874_v8 }
 0xebd   :  { %v5613_v17 = vpop.eup %5612 }
 0xebe   :  { %v6877_v33 = vmul.f32 %v5613_v17, %v5611_v50 }
 0xec0   :  { %3469 = vmatmul.mubr.f32.vlgmr.msra.gmra.mrb[28].mxu0 %v6877_v33  ;;  %3540 = vmatmul.mubr.f32.vlgmr.msra.gmra.mrb[44].mxu1 %v6877_v33 }
 0xec1   :  { %5157 = vmatpush1.bf16.msra.mxu0 %v6484_v62  ;;  %5189 = vmatpush1.bf16.msra.mxu1 %v6487_v54  ;;  %v3763_v62 = vld [vmem:[#allocation10 + $0x8] sm:$0xff] }
 0xec2   :  { %5159 = vmatprep.subr.bf16.mxu0 %v6492_v25  ;;  %5191 = vmatprep.subr.bf16.mxu1 %v6494_v43 }
 0xec3   :  { %3643 = vmatprep.mubr.f32.mxu0 %v7010_v0  ;;  %3714 = vmatprep.mubr.f32.mxu1 %v7010_v0  ;;  %v3762_v0 = vld [vmem:[#allocation10] sm:$0xff] }
 0xec4   :  { %v5218_v54 = vpack.c.bf16 %v3763_v62, %v3762_v0 }
 0xec5   :  { %5161 = vmatpush1.bf16.msra.mxu0 %v6496_v21  ;;  %5193 = vmatpush1.bf16.msra.mxu1 %v6499_v23 }
 0xec6   :  { %5163 = vmatprep.subr.bf16.mxu0 %v6504_v30  ;;  %5195 = vmatprep.subr.bf16.mxu1 %v6506_v28 }
 0xec9   :  { %5165 = vmatpush1.bf16.msra.mxu0 %v6508_v49  ;;  %5197 = vmatpush1.bf16.msra.mxu1 %v6511_v55 }
 0xeca   :  { %5167 = vmatprep.subr.bf16.mxu0 %v6516_v45  ;;  %5199 = vmatprep.subr.bf16.mxu1 %v6518_v37 }
 0xecd   :  { %5169 = vmatpush1.bf16.msra.mxu0 %v6520_v27  ;;  %5201 = vmatpush1.bf16.msra.mxu1 %v6523_v26 }
 0xece   :  { %5171 = vmatprep.subr.bf16.mxu0 %v6527_v52  ;;  %5203 = vmatprep.subr.bf16.mxu1 %v6529_v57 }
 0xed1   :  { %5173 = vmatpush1.bf16.msra.mxu0 %v6532_v20  ;;  %5205 = vmatpush1.bf16.msra.mxu1 %v6536_v12 }
 0xed2   :  { %5175 = vmatprep.subr.bf16.mxu0 %v6538_v24  ;;  %5207 = vmatprep.subr.bf16.mxu1 %v6540_v7 }
 0xed5   :  { %5177 = vmatpush1.bf16.msra.mxu0 %v6543_v56  ;;  %5209 = vmatpush1.bf16.msra.mxu1 %v6547_v58 }
 0xed6   :  { %5179 = vmatprep.subr.bf16.mxu0 %v6549_v14  ;;  %5211 = vmatprep.subr.bf16.mxu1 %v6552_v46 }
 0xed9   :  { %5181 = vmatpush1.bf16.msra.mxu0 %v6555_v9  ;;  %5213 = vmatpush1.bf16.msra.mxu1 %v6559_v18  ;;  %v3764_v18 = vld [vmem:[#allocation10 + $0x10] sm:$0xff] }
 0xeda   :  { %5183 = vmatprep.subr.bf16.mxu0 %v6564_v59  ;;  %5215 = vmatprep.subr.bf16.mxu1 %v6566_v13  ;;  %v3765_v59 = vld [vmem:[#allocation10 + $0x18] sm:$0xff] }
 0xedb   :  { %v5222_v39 = vpack.c.bf16 %v3765_v59, %v3764_v18 }
 0xedd   :  { %5185 = vmatpush1.bf16.msra.mxu0 %v6568_v22  ;;  %5217 = vmatpush1.bf16.msra.mxu1 %v6571_v44 }
 0xede   :  { %5219 = vmatprep.subr.bf16.mxu0 %v5218_v54 }
 0xf93   :  { %v3470_v25 = vpop.f32.mrb[28].mxu0  ;;  %v3541_v43 = vpop.f32.mrb[44].mxu1 }
 0xf94   :  { %v5310_v21 = vadd.f32 %v3470_v25, %v6626_v1  ;;  %v3472_v23 = vpop.f32.mrb[29].mxu0  ;;  %v3543_v30 = vpop.f32.mrb[45].mxu1  ;;  %v5326_v27 = vadd.f32 %v3541_v43, %v6641_v31 }
 0xf95   :  { %v5311_v28 = vadd.f32 %v3472_v23, %v6630_v15  ;;  %v5327_v45 = vadd.f32 %v3543_v30, %v6636_v2 }
 0xf96   :  { %v3991_v49 = vmul.f32 -1.442695, %v5310_v21 }
 0xf97   :  { %v3992_v55 = vmul.f32 -1.442695, %v5311_v28  ;;  %v3993_v37 = vmul.f32 -1.442695, %v5327_v45 }
 0xf98   :  { %5614 = vpow2.f32 %v3991_v49 }
 0xf99   :  { %5616 = vpow2.f32 %v3992_v55 }
 0xf9a   :  { %5618 = vpow2.f32 %v3993_v37 }
 0xf9b   :  { %5620 = vtanh.f32 %v5326_v27 }
 0xfa2   :  { %v5615_v26 = vpop.eup %5614 }
 0xfa3   :  { %v5617_v52 = vpop.eup %5616  ;;  %v3553_v57 = vadd.f32 1.0, %v5615_v26 }
 0xfa4   :  { %v3559_v20 = vadd.f32 1.0, %v5617_v52  ;;  %v5619_v12 = vpop.eup %5618 }
 0xfa5   :  { %5622 = vrcp.f32 %v3553_v57  ;;  %v5621_v24 = vpop.eup %5620  ;;  %v3566_v14 = vadd.f32 1.0, %v5619_v12 }
 0xfa6   :  { %5624 = vrcp.f32 %v3559_v20 }
 0xfa7   :  { %5626 = vrcp.f32 %v3566_v14 }
 0xfaf   :  { %v5623_v7 = vpop.eup %5622 }
 0xfb0   :  { %v5625_v56 = vpop.eup %5624  ;;  %v3570_v58 = vmul.f32 %v5623_v7, %v5621_v24 }
 0xfb1   :  { %v3569_v46 = vmul.f32 %v5625_v56, %v6874_v8  ;;  %v5627_v13 = vpop.eup %5626 }
 0xfb3   :  { %v6918_v9 = vadd.f32 %v3570_v58, %v3569_v46 }
 0xfb5   :  { %5628 = vtanh.f32 %v6918_v9 }
 0xfbf   :  { %v5629_v22 = vpop.eup %5628 }
 0xfc0   :  { %v3573_v44 = vmul.f32 %v5629_v22, %v5627_v13 }
 0xfc2   :  { %3644 = vmatmul.mubr.f32.vlgmr.msra.gmra.mrb[30].mxu0 %v3573_v44  ;;  %3715 = vmatmul.mubr.f32.vlgmr.msra.gmra.mrb[46].mxu1 %v3573_v44 }
 0xfc3   :  { %5221 = vmatpush3.bf16.msra.mxu0 %v5218_v54  ;;  %4054 = vmatprep.mubr.f32.mxu0 %v6647_v29  ;;  %v5242_v29 = vpack.c.bf16 %v3775_v53, %v3774_v16 }
 0xfc4   :  { %5223 = vmatprep.subr.bf16.mxu0 %v5222_v39 }
 0xfc7   :  { %5225 = vmatpush3.bf16.msra.mxu0 %v5222_v39 }
 0xfc8   :  { %5227 = vmatprep.subr.bf16.mxu0 %v5226_v40 }
 0xfcb   :  { %5229 = vmatpush3.bf16.msra.mxu0 %v5226_v40 }
 0xfcc   :  { %5231 = vmatprep.subr.bf16.mxu0 %v5230_v4 }
 0xfcf   :  { %5233 = vmatpush3.bf16.msra.mxu0 %v5230_v4 }
 0xfd0   :  { %5235 = vmatprep.subr.bf16.mxu0 %v5234_v47 }
 0xfd3   :  { %5237 = vmatpush3.bf16.msra.mxu0 %v5234_v47 }
 0xfd4   :  { %5239 = vmatprep.subr.bf16.mxu0 %v5238_v3 }
 0xfd7   :  { %5241 = vmatpush3.bf16.msra.mxu0 %v5238_v3 }
 0xfd8   :  { %5243 = vmatprep.subr.bf16.mxu0 %v5242_v29 }
 0xfdb   :  { %5245 = vmatpush3.bf16.msra.mxu0 %v5242_v29 }
 0xfdc   :  { %5247 = vmatprep.subr.bf16.mxu0 %v5246_v35 }
 0xfdf   :  { %5249 = vmatpush3.bf16.msra.mxu0 %v5246_v35 }
 0xfe2   :  { %4055 = vmatmul.mubr.f32.vlgmr.msra.gmra.mrb[32].mxu0 %v6693_v34 }
 0xfe3   :  { %4057 = vmatprep.mubr.f32.mxu0 %v6739_v63 }
 0xfe6   :  { %4058 = vmatmul.mubr.f32.gmra.mrb[34].mxu0 %v6785_v41 }
 0xfe7   :  { %4060 = vmatprep.mubr.f32.mxu0 %v6831_v48 }
 0xfea   :  { %4061 = vmatmul.mubr.f32.gmra.mrb[36].mxu0 %v6877_v33 }
 0xfeb   :  { %4063 = vmatprep.mubr.f32.mxu0 %v3573_v44 }
0x1095   :  { %v3645_v42 = vpop.f32.mrb[30].mxu0  ;;  %v3716_v5 = vpop.f32.mrb[46].mxu1 }
0x1096   :  { %v5312_v8 = vadd.f32 %v3645_v42, %v6626_v1  ;;  %v3647_v50 = vpop.f32.mrb[31].mxu0  ;;  %v3718_v17 = vpop.f32.mrb[47].mxu1  ;;  %v5328_v41 = vadd.f32 %v3716_v5, %v6641_v31 }
0x1097   :  { %v5313_v0 = vadd.f32 %v3647_v50, %v6630_v15  ;;  %v5329_v34 = vadd.f32 %v3718_v17, %v6636_v2  ;;  %v6935_v2 = vld [vmem:[%s6995_s5] ss:$0 sm:$0xff]  ;;  %s5819_s5 = smov [#allocation13]  }
0x1098   :  { %v3994_v62 = vmul.f32 -1.442695, %v5312_v8  ;;  %s3915_s17 = sshll.u32 %s5819_s5, 4  ;;  %s3916_s17 = int_to_ptr.vmem [resolvable:$true] %s3915_s17 }
0x1099   :  { %v3995_v54 = vmul.f32 -1.442695, %v5313_v0  ;;  %v3996_v63 = vmul.f32 -1.442695, %v5329_v34  ;;  %s5734_s18 = scalar_lea.vmem %s3916_s17, 256  ;;  %p5739_p5 = scmp.lt.s32.totalorder %s3916_s17, %s3916_s17 }
0x109a   :  { %5630 = vpow2.f32 %v3994_v62  ;;  %p5735_p4 = scmp.ne.s32.totalorder %s3916_s17, %s5734_s18  ;;  %p5740_p6 = scmp.lt.s32.totalorder %s5734_s18, %s5734_s18 }
0x109b   :  { %5632 = vpow2.f32 %v3995_v54 }
0x109c   :  { %5634 = vpow2.f32 %v3996_v63  ;;  %p5741_p7 = por %p5740_p6, %p5739_p5 }
0x109d   :  { %5636 = vtanh.f32 %v5328_v41 }
0x109e   :  { %p5742_p8 = pnand %p5741_p7, %p5735_p4 }
0x10a4   :  { %v5631_v48 = vpop.eup %5630 }
0x10a5   :  { %v5633_v33 = vpop.eup %5632  ;;  %v3728_v25 = vadd.f32 1.0, %v5631_v48 }
0x10a6   :  { %v3734_v43 = vadd.f32 1.0, %v5633_v33  ;;  %v5635_v1 = vpop.eup %5634 }
0x10a7   :  { %5638 = vrcp.f32 %v3728_v25  ;;  %v5637_v21 = vpop.eup %5636  ;;  %v3741_v28 = vadd.f32 1.0, %v5635_v1 }
0x10a8   :  { %5640 = vrcp.f32 %v3734_v43 }
0x10a9   :  { %5642 = vrcp.f32 %v3741_v28 }
0x10b1   :  { %v5639_v15 = vpop.eup %5638 }
0x10b2   :  { %v5641_v23 = vpop.eup %5640  ;;  %v3745_v30 = vmul.f32 %v5639_v15, %v5637_v21 }
0x10b3   :  { %v3744_v49 = vmul.f32 %v5641_v23, %v6918_v9  ;;  %v5643_v58 = vpop.eup %5642 }
0x10b5   :  { %v4056_v31 = vpop.f32.mrb[32].mxu0  ;;  %v3746_v55 = vadd.f32 %v3745_v30, %v3744_v49 }
0x10b6   :  { %v3857_v45 = vadd.f32 %v4056_v31, %v6935_v2  ;;  %v3851_v37 = vpop.f32.mrb[33].mxu0 }
0x10b7   :  { %v3852_v27 = vadd.f32 %v6935_v2, %v3851_v37  ;;  %5644 = vtanh.f32 %v3746_v55  ;;  %3753 = vst [vmem:[#allocation15 + $0x8] sm:$0xff] %v3746_v55 }
0x10b8   :  { %3891 = vst [vmem:[#allocation12 + $0x8] sm:$0xff] %v3857_v45 }
0x10b9   :  { %3890 = vst [vmem:[#allocation12] sm:$0xff] %v3852_v27  ;;  %v4059_v26 = vpop.f32.mrb[34].mxu0 }
0x10ba   :  { %v3867_v52 = vadd.f32 %v4059_v26, %v6935_v2  ;;  %v3861_v57 = vpop.f32.mrb[35].mxu0 }
0x10bb   :  { %v3862_v20 = vadd.f32 %v6935_v2, %v3861_v57 }
0x10bc   :  { %3893 = vst [vmem:[#allocation12 + $0x18] sm:$0xff] %v3867_v52 }
0x10bd   :  { %3892 = vst [vmem:[#allocation12 + $0x10] sm:$0xff] %v3862_v20  ;;  %v4062_v12 = vpop.f32.mrb[36].mxu0 }
0x10be   :  { %v3877_v24 = vadd.f32 %v4062_v12, %v6935_v2  ;;  %v3871_v7 = vpop.f32.mrb[37].mxu0 }
0x10bf   :  { %v3872_v56 = vadd.f32 %v6935_v2, %v3871_v7 }
0x10c0   :  { %3895 = vst [vmem:[#allocation12 + $0x28] sm:$0xff] %v3877_v24 }
0x10c1   :  { %v5645_v14 = vpop.eup %5644  ;;  %3894 = vst [vmem:[#allocation12 + $0x20] sm:$0xff] %v3872_v56 }
0x10c2   :  { %v3748_v46 = vmul.f32 %v5645_v14, %v5643_v58 }
0x10c4   :  { %4064 = vmatmul.mubr.f32.gmra.mrb[38].mxu0 %v3748_v46  ;;  %3751 = vst [vmem:[#allocation13 + $0x8] sm:$0xff] %v3748_v46 }
0x10c5   :  { %5745 = shalt.err (!%p5742_p8)
}
0x10c6   :  { %s5746_s22 = scalar_lea.hbm %s6997_s7, 256 }
0x10c7   :  { %p5747_p9 = scmp.ne.s32.totalorder %s6997_s7, %s5746_s22  ;;  %p5750_p10 = scmp.lt.u32.totalorder %s5746_s22, %s6997_s7 }
0x10c9   :  { %p5752_p11 = pnand %p5750_p10, %p5747_p9 }
0x10cb   :  { %5755 = shalt.err (!%p5752_p11)
}
0x10cc   :  { %3921 = dma.vmem_to_hbm [thread:$0]  %s3916_s17, 256, %s6997_s7, [#allocation14], %s5814_s1, %s5814_s1, %s5815_s28  }
0x10cd   :  { %s5820_s27 = smov [#allocation15]  }
0x10ce   :  { %s3927_s29 = sshll.u32 %s5820_s27, 4  ;;  %s3928_s29 = int_to_ptr.vmem [resolvable:$true] %s3927_s29 }
0x10cf   :  { %s5756_s30 = scalar_lea.vmem %s3928_s29, 256  ;;  %p5761_p13 = scmp.lt.s32.totalorder %s3928_s29, %s3928_s29 }
0x10d0   :  { %p5757_p12 = scmp.ne.s32.totalorder %s3928_s29, %s5756_s30  ;;  %p5762_p0 = scmp.lt.s32.totalorder %s5756_s30, %s5756_s30 }
0x10d2   :  { %p5763_p1 = por %p5762_p0, %p5761_p13 }
0x10d4   :  { %p5764_p2 = pnand %p5763_p1, %p5757_p12 }
0x10d6   :  { %5767 = shalt.err (!%p5764_p2)
}
0x10d7   :  { %s5768_s12 = scalar_lea.hbm %s6998_s8, 256 }
0x10d8   :  { %p5769_p3 = scmp.ne.s32.totalorder %s6998_s8, %s5768_s12  ;;  %p5772_p4 = scmp.lt.u32.totalorder %s5768_s12, %s6998_s8 }
0x10da   :  { %p5774_p5 = pnand %p5772_p4, %p5769_p3 }
0x10dc   :  { %5777 = shalt.err (!%p5774_p5)
}
0x10dd   :  { %3933 = dma.vmem_to_hbm [thread:$0]  %s3928_s29, 256, %s6998_s8, [#allocation14], %s5814_s1, %s5814_s1, %s5815_s28  }
0x10de   :  { %s5821_s13 = smov [#allocation12]  }
0x10df   :  { %s3903_s3 = sshll.u32 %s5821_s13, 4  ;;  %s3904_s3 = int_to_ptr.vmem [resolvable:$true] %s3903_s3 }
0x10e0   :  { %s5778_s14 = scalar_lea.vmem %s3904_s3, 1024  ;;  %p5783_p7 = scmp.lt.s32.totalorder %s3904_s3, %s3904_s3 }
0x10e1   :  { %p5779_p6 = scmp.ne.s32.totalorder %s3904_s3, %s5778_s14  ;;  %p5784_p8 = scmp.lt.s32.totalorder %s5778_s14, %s5778_s14 }
0x10e3   :  { %p5785_p9 = por %p5784_p8, %p5783_p7 }
0x10e5   :  { %p5786_p10 = pnand %p5785_p9, %p5779_p6 }
0x1197   :  { %v4065_v9 = vpop.f32.mrb[38].mxu0 }
0x1198   :  { %v3887_v18 = vadd.f32 %v4065_v9, %v6935_v2  ;;  %v3881_v59 = vpop.f32.mrb[39].mxu0 }
0x1199   :  { %v3882_v13 = vadd.f32 %v6935_v2, %v3881_v59 }
0x119a   :  { %3897 = vst [vmem:[#allocation12 + $0x38] sm:$0xff] %v3887_v18 }
0x119b   :  { %3896 = vst [vmem:[#allocation12 + $0x30] sm:$0xff] %v3882_v13 }
0x119c   :  { %5789 = shalt.err (!%p5786_p10)
}
0x119d   :  { %s5790_s17 = scalar_lea.hbm %s6996_s6, 1024 }
0x119e   :  { %p5791_p11 = scmp.ne.s32.totalorder %s6996_s6, %s5790_s17  ;;  %p5794_p12 = scmp.lt.u32.totalorder %s5790_s17, %s6996_s6 }
0x11a0   :  { %p5796_p13 = pnand %p5794_p12, %p5791_p11 }
0x11a2   :  { %5799 = shalt.err (!%p5796_p13)
}
0x11a3   :  { %3909 = dma.vmem_to_hbm [thread:$0]  %s3904_s3, 1024, %s6996_s6, [#allocation6], %s5814_s1, %s5814_s1, %s5815_s28  }
0x11a4   :  { %5806 = dma.done.wait [#allocation6], 1024  }
0x11a5   :  { %5807 = vsyncadd [#allocation6], 4294966272 }
0x11a6   :  { %5808 = dma.done.wait [#allocation14], 512  }
0x11a7   :  { %5809 = vsyncadd [#allocation14], 4294966784 }
0x11a8   :  { %3943 = vsyncpa [#allocation5], 1 }
0x11a9   :  { %3944 = vsyncpa [#allocation8], 1 }
0x11aa   :  { %3945 = vsyncpa [#allocation11], 1 }
0x11ab   :  { %3946 = vsyncpa [#allocation6], 1 }
0x11ac   :  { %3947 = vsyncpa [#allocation14], 1 }

</bundles_post_ra>
